<compile_context>
chip_gen: v7x
topology: tpu7x:2x2x1
jax: 0.10.0
libtpu: 0.0.40
codegen_flags: <defaults>
</compile_context>

<pallas_src>
import jax
import jax.numpy as jnp
from jax.experimental import pallas as pl
from jax.experimental.pallas import tpu as pltpu


# --------------------- input projection (all timesteps at once) ---------------------
def _in_proj_kernel(x_ref, w_ref, b_ref, o_ref):
    """o = sum_p x[p] @ w[p] + b for the current direction (grid axis 0)."""
    P = x_ref.shape[0]
    acc = jnp.dot(x_ref[0], w_ref[0], preferred_element_type=jnp.float32)
    for p in range(1, P):
        acc = acc + jnp.dot(x_ref[p], w_ref[p], preferred_element_type=jnp.float32)
    o_ref[...] = acc + b_ref[...]


def input_projection(x_slabs, w_ih, b_ih):
    """gi[d] = sum_p x_slabs[p] @ w_ih[d, p] + b_ih[d]   ->  [2, N, 3H] f32.

    x_slabs: [P, N, F] bf16   (P=1 for layer 0, P=2 halves for deeper layers)
    w_ih:    [2, P, F, 3H] bf16
    b_ih:    [2, 1, 3H] f32
    """
    P, N, F = x_slabs.shape
    G = w_ih.shape[-1]
    return pl.pallas_call(
        _in_proj_kernel,
        out_shape=jax.ShapeDtypeStruct((2, N, G), jnp.float32),
        grid=(2,),
        in_specs=[
            pl.BlockSpec((P, N, F), lambda d: (0, 0, 0)),
            pl.BlockSpec((None, P, F, G), lambda d: (d, 0, 0, 0)),
            pl.BlockSpec((None, 1, G), lambda d: (d, 0, 0)),
        ],
        out_specs=pl.BlockSpec((None, N, G), lambda d: (d, 0, 0)),
        compiler_params=pltpu.CompilerParams(dimension_semantics=("parallel",)),
    )(x_slabs, w_ih, b_ih)


# --------------------- fused bidirectional GRU recurrence kernel --------------------
def _gru_seq_kernel(gi_ref, whh_ref, bhh_ref, out_ref, hfin_ref, h_scr):
    """One grid step = one direction x one chunk of Tc timesteps.

    PyTorch GRU gate order (r, z, n):
      r = sigmoid(gi_r + W_hr h + b_hr)
      z = sigmoid(gi_z + W_hz h + b_hz)
      n = tanh  (gi_n + r * (W_hn h + b_hn))
      h' = (1 - z) * n + z * h
    where gi = x @ W_ih + b_ih was precomputed outside the loop.
    """
    d = pl.program_id(0)            # 0 = forward, 1 = backward
    t = pl.program_id(1)            # time-chunk index (processing order)
    nT = pl.num_programs(1)
    Tc, B, G = gi_ref.shape
    H = G // 3

    @pl.when(t == 0)
    def _():
        h_scr[...] = jnp.zeros_like(h_scr)

    w = whh_ref[...]                                          # (H, 3H) bf16
    bhh = jnp.broadcast_to(bhh_ref[...], (B, G))              # hoisted out of inner loop

    def step(j, h):
        # Backward direction walks the chunk in reversed within-chunk order.
        row = j + d * (Tc - 1 - 2 * j)
        gi = gi_ref[row]                                      # (B, 3H) f32, b_ih folded in
        gh = jnp.dot(h.astype(w.dtype), w,
                     preferred_element_type=jnp.float32) + bhh
        r = jax.nn.sigmoid(gi[:, 0:H] + gh[:, 0:H])
        z = jax.nn.sigmoid(gi[:, H:2 * H] + gh[:, H:2 * H])
        n = jnp.tanh(gi[:, 2 * H:] + r * gh[:, 2 * H:])
        h_new = (1.0 - z) * n + z * h
        out_ref[row] = h_new.astype(out_ref.dtype)
        return h_new

    h_last = jax.lax.fori_loop(0, Tc, step, h_scr[...], unroll=True)
    h_scr[...] = h_last

    @pl.when(t == nT - 1)
    def _():
        hfin_ref[...] = h_last


def gru_layer(gi, w_hh, b_hh, Tc):
    """Bidirectional GRU layer over precomputed input projections.

    gi:   [2, L, B, 3H] f32   (dir, time [natural order], batch, gates)
    w_hh: [2, H, 3H]    bf16
    b_hh: [2, 1, 3H]    f32
    Returns out_dirs [2, L, B, H] bf16 (both directions, natural time order)
            h_fin    [2, B, H]    f32  (final hidden per direction)
    """
    _, L, B, G = gi.shape
    H = G // 3
    assert L % Tc == 0
    nT = L // Tc

    out_dirs, h_fin = pl.pallas_call(
        _gru_seq_kernel,
        out_shape=(jax.ShapeDtypeStruct((2, L, B, H), jnp.bfloat16),
                   jax.ShapeDtypeStruct((2, B, H), jnp.float32)),
        grid_spec=pltpu.PrefetchScalarGridSpec(
            num_scalar_prefetch=0,
            grid=(2, nT),
            in_specs=[
                # backward dir (d=1) fetches chunks in reverse order via the index_map
                pl.BlockSpec((None, Tc, B, G),
                             lambda d, t: (d, t + d * (nT - 1 - 2 * t), 0, 0)),
                pl.BlockSpec((None, H, G), lambda d, t: (d, 0, 0)),
                pl.BlockSpec((None, 1, G), lambda d, t: (d, 0, 0)),
            ],
            out_specs=(
                pl.BlockSpec((None, Tc, B, H),
                             lambda d, t: (d, t + d * (nT - 1 - 2 * t), 0, 0)),
                pl.BlockSpec((None, B, H), lambda d, t: (d, 0, 0)),
            ),
            scratch_shapes=[pltpu.VMEM((B, H), jnp.float32)],
        ),
        compiler_params=pltpu.CompilerParams(
            dimension_semantics=("parallel", "arbitrary")),  # dir || , time carries state
    )(gi, w_hh, b_hh)
    return out_dirs, h_fin


# ------------------------------- Model parameters -------------------------------
def init_params(key, vocab_size, embedding_dim, hidden_dim, output_dim, n_layers):
    H = hidden_dim
    keys = iter(jax.random.split(key, 1 + 4 * n_layers + 2))
    s = 0.1
    p = {
        'emb': (jax.random.normal(next(keys), (vocab_size, embedding_dim)) * s
                ).astype(jnp.bfloat16),
        'gru': [],
    }
    for layer in range(n_layers):
        P = 1 if layer == 0 else 2                 # input slabs (fwd/bwd halves)
        F = embedding_dim if layer == 0 else H
        p['gru'].append({
            'w_ih': (jax.random.normal(next(keys), (2, P, F, 3 * H)) * s).astype(jnp.bfloat16),
            'w_hh': (jax.random.normal(next(keys), (2, H, 3 * H)) * s).astype(jnp.bfloat16),
            'b_ih': (jax.random.normal(next(keys), (2, 1, 3 * H)) * s).astype(jnp.float32),
            'b_hh': (jax.random.normal(next(keys), (2, 1, 3 * H)) * s).astype(jnp.float32),
        })
    p['out_w'] = (jax.random.normal(next(keys), (2 * H, output_dim)) * s).astype(jnp.float32)
    p['out_b'] = (jax.random.normal(next(keys), (1, output_dim)) * s).astype(jnp.float32)
    return p


# --------------------------------- Forward pass ---------------------------------
def bert_gru_sentiment_forward(params, text, hidden_dim, time_chunk=8):
    H = hidden_dim
    B, L = text.shape
    Tc = min(time_chunk, L)
    assert L % Tc == 0

    # "bert(text)[0]" stand-in: embedding lookup gathered directly in time-major
    # order (avoids a separate [B,L,E]->[L,B,E] transpose copy).
    x_tm = jnp.take(params['emb'], text.T, axis=0)            # [L, B, E] bf16
    x_slabs = x_tm.reshape(1, L * B, -1)                      # [1, L*B, E]

    h_fin = None
    for layer_p in params['gru']:
        gi = input_projection(x_slabs, layer_p['w_ih'], layer_p['b_ih'])   # [2, L*B, 3H]
        gi = gi.reshape(2, L, B, 3 * H)
        out_dirs, h_fin = gru_layer(gi, layer_p['w_hh'], layer_p['b_hh'], Tc)
        # next layer consumes both direction halves directly (== feature concat)
        x_slabs = out_dirs.reshape(2, L * B, H)
        # inter-layer GRU dropout: identity in eval mode

    # hidden = dropout(cat(hidden[-2], hidden[-1], dim=1)); dropout identity in eval
    hidden = jnp.concatenate([h_fin[0], h_fin[1]], axis=-1).astype(jnp.float32)  # [B, 2H]
    # Tiny head (output_dim << 128): plain JAX per perf review.
    return hidden @ params['out_w'] + params['out_b']


if __name__ == "__main__":
    B, L = 8, 16                 # batch, sequence length
    VOCAB, E = 64, 128           # vocab / bert hidden_size stand-in
    HIDDEN, OUT, N_LAYERS = 128, 3, 2

    key = jax.random.PRNGKey(0)
    k_text, k_param = jax.random.split(key)
    text = jax.random.randint(k_text, (B, L), 0, VOCAB, dtype=jnp.int32)
    params = init_params(k_param, VOCAB, E, HIDDEN, OUT, N_LAYERS)

    fwd = jax.jit(lambda p, t: bert_gru_sentiment_forward(p, t, HIDDEN, time_chunk=8))
    logits = fwd(params, text)
    jax.block_until_ready(logits)
    assert logits.shape == (B, OUT) and logits.dtype == jnp.float32
    print("KERNEL_OK")
</pallas_src>

<mosaic_0001>
module attributes {stable_mosaic.version = 11 : i64} {
  func.func @_in_proj_kernel(%arg0: i32, %arg1: memref<1x128x128xbf16, #tpu.memory_space<vmem>>, %arg2: memref<1x1x128x384xbf16, #tpu.memory_space<vmem>>, %arg3: memref<1x1x384xf32, #tpu.memory_space<vmem>>, %arg4: memref<1x128x384xf32, #tpu.memory_space<vmem>>) attributes {dimension_semantics = [#tpu.dimension_semantics<parallel>], iteration_bounds = array<i64: 2>, scalar_prefetch = 0 : i64, scratch_operands = 0 : i64, tpu.core_type = #tpu.core_type<tc>, window_params = [{pipeline_mode = #tpu.pipeline_mode<synchronous>, transform_indices = @transform_0, window_bounds = array<i64: 1, 128, 128>}, {transform_indices = @transform_1, window_bounds = array<i64: 1, 1, 128, 384>}, {transform_indices = @transform_2, window_bounds = array<i64: 1, 1, 384>}, {transform_indices = @transform_3, window_bounds = array<i64: 1, 128, 384>}]} {
    %c0 = arith.constant 0 : index
    %c0_0 = arith.constant 0 : index
    %c0_1 = arith.constant 0 : index
    %0 = vector.load %arg1[%c0, %c0_0, %c0_1] : memref<1x128x128xbf16, #tpu.memory_space<vmem>>, vector<1x128x128xbf16>
    %1 = vector.shape_cast %0 : vector<1x128x128xbf16> to vector<128x128xbf16>
    %c0_2 = arith.constant 0 : index
    %c0_3 = arith.constant 0 : index
    %c0_4 = arith.constant 0 : index
    %c0_5 = arith.constant 0 : index
    %2 = vector.load %arg2[%c0_2, %c0_3, %c0_4, %c0_5] : memref<1x1x128x384xbf16, #tpu.memory_space<vmem>>, vector<1x1x128x384xbf16>
    %3 = vector.shape_cast %2 : vector<1x1x128x384xbf16> to vector<128x384xbf16>
    %cst = arith.constant dense<0.000000e+00> : vector<128x384xf32>
    %4 = tpu.matmul %1, %3, %cst {dimension_numbers = #tpu.dot_dimension_numbers<[1], [0], [0], [1], [0, 0, 1, 1], [], []>} : vector<128x128xbf16>, vector<128x384xbf16>, vector<128x384xf32> -> vector<128x384xf32>
    %c0_6 = arith.constant 0 : index
    %c0_7 = arith.constant 0 : index
    %c0_8 = arith.constant 0 : index
    %5 = vector.load %arg3[%c0_6, %c0_7, %c0_8] : memref<1x1x384xf32, #tpu.memory_space<vmem>>, vector<1x1x384xf32>
    %6 = vector.shape_cast %5 : vector<1x1x384xf32> to vector<1x384xf32>
    %7 = vector.broadcast %6 : vector<1x384xf32> to vector<128x384xf32>
    %8 = arith.addf %4, %7 : vector<128x384xf32>
    %c0_9 = arith.constant 0 : index
    %c0_10 = arith.constant 0 : index
    %c0_11 = arith.constant 0 : index
    %9 = vector.load %arg4[%c0_9, %c0_10, %c0_11] : memref<1x128x384xf32, #tpu.memory_space<vmem>>, vector<1x128x384xf32>
    %10 = vector.shape_cast %9 : vector<1x128x384xf32> to vector<128x384xf32>
    %11 = vector.shape_cast %8 : vector<128x384xf32> to vector<1x128x384xf32>
    tpu.vector_store %arg4[%c0_9, %c0_10, %c0_11], %11 {strides = array<i32>} : memref<1x128x384xf32, #tpu.memory_space<vmem>>, vector<1x128x384xf32>,
    return
  }
  func.func @transform_0(%arg0: i32) -> (i32, i32, i32) {
    %c0_i32 = arith.constant 0 : i32
    %c0_i32_0 = arith.constant 0 : i32
    %c0_i32_1 = arith.constant 0 : i32
    %c0_i32_2 = arith.constant 0 : i32
    return %c0_i32, %c0_i32_0, %c0_i32_1 : i32, i32, i32
  }
  func.func @transform_1(%arg0: i32) -> (i32, i32, i32, i32) {
    %c0_i32 = arith.constant 0 : i32
    %c0_i32_0 = arith.constant 0 : i32
    %c0_i32_1 = arith.constant 0 : i32
    %c0_i32_2 = arith.constant 0 : i32
    return %arg0, %c0_i32, %c0_i32_0, %c0_i32_1 : i32, i32, i32, i32
  }
  func.func @transform_2(%arg0: i32) -> (i32, i32, i32) {
    %c0_i32 = arith.constant 0 : i32
    %c0_i32_0 = arith.constant 0 : i32
    %c0_i32_1 = arith.constant 0 : i32
    return %arg0, %c0_i32, %c0_i32_0 : i32, i32, i32
  }
  func.func @transform_3(%arg0: i32) -> (i32, i32, i32) {
    %c0_i32 = arith.constant 0 : i32
    %c0_i32_0 = arith.constant 0 : i32
    %c0_i32_1 = arith.constant 0 : i32
    return %arg0, %c0_i32, %c0_i32_0 : i32, i32, i32
  }
}

module attributes {stable_mosaic.version = 11 : i64} {
  func.func @_in_proj_kernel(%arg0: i32, %arg1: memref<2x128x128xbf16, #tpu.memory_space<vmem>>, %arg2: memref<1x2x128x384xbf16, #tpu.memory_space<vmem>>, %arg3: memref<1x1x384xf32, #tpu.memory_space<vmem>>, %arg4: memref<1x128x384xf32, #tpu.memory_space<vmem>>) attributes {dimension_semantics = [#tpu.dimension_semantics<parallel>], iteration_bounds = array<i64: 2>, scalar_prefetch = 0 : i64, scratch_operands = 0 : i64, tpu.core_type = #tpu.core_type<tc>, window_params = [{pipeline_mode = #tpu.pipeline_mode<synchronous>, transform_indices = @transform_0, window_bounds = array<i64: 2, 128, 128>}, {transform_indices = @transform_1, window_bounds = array<i64: 1, 2, 128, 384>}, {transform_indices = @transform_2, window_bounds = array<i64: 1, 1, 384>}, {transform_indices = @transform_3, window_bounds = array<i64: 1, 128, 384>}]} {
    %c0 = arith.constant 0 : index
    %c0_0 = arith.constant 0 : index
    %c0_1 = arith.constant 0 : index
    %0 = vector.load %arg1[%c0, %c0_0, %c0_1] : memref<2x128x128xbf16, #tpu.memory_space<vmem>>, vector<1x128x128xbf16>
    %1 = vector.shape_cast %0 : vector<1x128x128xbf16> to vector<128x128xbf16>
    %c0_2 = arith.constant 0 : index
    %c0_3 = arith.constant 0 : index
    %c0_4 = arith.constant 0 : index
    %c0_5 = arith.constant 0 : index
    %2 = vector.load %arg2[%c0_2, %c0_3, %c0_4, %c0_5] : memref<1x2x128x384xbf16, #tpu.memory_space<vmem>>, vector<1x1x128x384xbf16>
    %3 = vector.shape_cast %2 : vector<1x1x128x384xbf16> to vector<128x384xbf16>
    %cst = arith.constant dense<0.000000e+00> : vector<128x384xf32>
    %4 = tpu.matmul %1, %3, %cst {dimension_numbers = #tpu.dot_dimension_numbers<[1], [0], [0], [1], [0, 0, 1, 1], [], []>} : vector<128x128xbf16>, vector<128x384xbf16>, vector<128x384xf32> -> vector<128x384xf32>
    %c1 = arith.constant 1 : index
    %c0_6 = arith.constant 0 : index
    %c0_7 = arith.constant 0 : index
    %5 = vector.load %arg1[%c1, %c0_6, %c0_7] : memref<2x128x128xbf16, #tpu.memory_space<vmem>>, vector<1x128x128xbf16>
    %6 = vector.shape_cast %5 : vector<1x128x128xbf16> to vector<128x128xbf16>
    %c0_8 = arith.constant 0 : index
    %c1_9 = arith.constant 1 : index
    %c0_10 = arith.constant 0 : index
    %c0_11 = arith.constant 0 : index
    %7 = vector.load %arg2[%c0_8, %c1_9, %c0_10, %c0_11] : memref<1x2x128x384xbf16, #tpu.memory_space<vmem>>, vector<1x1x128x384xbf16>
    %8 = vector.shape_cast %7 : vector<1x1x128x384xbf16> to vector<128x384xbf16>
    %cst_12 = arith.constant dense<0.000000e+00> : vector<128x384xf32>
    %9 = tpu.matmul %6, %8, %cst_12 {dimension_numbers = #tpu.dot_dimension_numbers<[1], [0], [0], [1], [0, 0, 1, 1], [], []>} : vector<128x128xbf16>, vector<128x384xbf16>, vector<128x384xf32> -> vector<128x384xf32>
    %10 = arith.addf %4, %9 : vector<128x384xf32>
    %c0_13 = arith.constant 0 : index
    %c0_14 = arith.constant 0 : index
    %c0_15 = arith.constant 0 : index
    %11 = vector.load %arg3[%c0_13, %c0_14, %c0_15] : memref<1x1x384xf32, #tpu.memory_space<vmem>>, vector<1x1x384xf32>
    %12 = vector.shape_cast %11 : vector<1x1x384xf32> to vector<1x384xf32>
    %13 = vector.broadcast %12 : vector<1x384xf32> to vector<128x384xf32>
    %14 = arith.addf %10, %13 : vector<128x384xf32>
    %c0_16 = arith.constant 0 : index
    %c0_17 = arith.constant 0 : index
    %c0_18 = arith.constant 0 : index
    %15 = vector.load %arg4[%c0_16, %c0_17, %c0_18] : memref<1x128x384xf32, #tpu.memory_space<vmem>>, vector<1x128x384xf32>
    %16 = vector.shape_cast %15 : vector<1x128x384xf32> to vector<128x384xf32>
    %17 = vector.shape_cast %14 : vector<128x384xf32> to vector<1x128x384xf32>
    tpu.vector_store %arg4[%c0_16, %c0_17, %c0_18], %17 {strides = array<i32>} : memref<1x128x384xf32, #tpu.memory_space<vmem>>, vector<1x128x384xf32>,
    return
  }
  func.func @transform_0(%arg0: i32) -> (i32, i32, i32) {
    %c0_i32 = arith.constant 0 : i32
    %c0_i32_0 = arith.constant 0 : i32
    %c0_i32_1 = arith.constant 0 : i32
    %c0_i32_2 = arith.constant 0 : i32
    return %c0_i32, %c0_i32_0, %c0_i32_1 : i32, i32, i32
  }
  func.func @transform_1(%arg0: i32) -> (i32, i32, i32, i32) {
    %c0_i32 = arith.constant 0 : i32
    %c0_i32_0 = arith.constant 0 : i32
    %c0_i32_1 = arith.constant 0 : i32
    %c0_i32_2 = arith.constant 0 : i32
    return %arg0, %c0_i32, %c0_i32_0, %c0_i32_1 : i32, i32, i32, i32
  }
  func.func @transform_2(%arg0: i32) -> (i32, i32, i32) {
    %c0_i32 = arith.constant 0 : i32
    %c0_i32_0 = arith.constant 0 : i32
    %c0_i32_1 = arith.constant 0 : i32
    return %arg0, %c0_i32, %c0_i32_0 : i32, i32, i32
  }
  func.func @transform_3(%arg0: i32) -> (i32, i32, i32) {
    %c0_i32 = arith.constant 0 : i32
    %c0_i32_0 = arith.constant 0 : i32
    %c0_i32_1 = arith.constant 0 : i32
    return %arg0, %c0_i32, %c0_i32_0 : i32, i32, i32
  }
}

module attributes {stable_mosaic.version = 11 : i64} {
  func.func @_gru_seq_kernel(%arg0: i32, %arg1: i32, %arg2: memref<1x8x8x384xf32, #tpu.memory_space<vmem>>, %arg3: memref<1x128x384xbf16, #tpu.memory_space<vmem>>, %arg4: memref<1x1x384xf32, #tpu.memory_space<vmem>>, %arg5: memref<1x8x8x128xbf16, #tpu.memory_space<vmem>>, %arg6: memref<1x8x128xf32, #tpu.memory_space<vmem>>, %arg7: memref<8x128xf32, #tpu.memory_space<vmem>>) attributes {dimension_semantics = [#tpu.dimension_semantics<parallel>, #tpu.dimension_semantics<arbitrary>], iteration_bounds = array<i64: 2, 2>, scalar_prefetch = 0 : i64, scratch_operands = 1 : i64, tpu.core_type = #tpu.core_type<tc>, window_params = [{transform_indices = @transform_0, window_bounds = array<i64: 1, 8, 8, 384>}, {transform_indices = @transform_1, window_bounds = array<i64: 1, 128, 384>}, {transform_indices = @transform_2, window_bounds = array<i64: 1, 1, 384>}, {transform_indices = @transform_3, window_bounds = array<i64: 1, 8, 8, 128>}, {transform_indices = @transform_4, window_bounds = array<i64: 1, 8, 128>}]} {
    %c0_i32 = arith.constant 0 : i32
    %0 = arith.cmpi eq, %arg1, %c0_i32 : i32
    %1 = arith.extui %0 : i1 to i32
    %c0_i32_0 = arith.constant 0 : i32
    %2 = arith.cmpi ne, %1, %c0_i32_0 : i32
    scf.if %2 {
      %cst_108 = arith.constant 0.000000e+00 : f32
      %342 = vector.broadcast %cst_108 : f32 to vector<8x128xf32>
      %c0_109 = arith.constant 0 : index
      %c0_110 = arith.constant 0 : index
      %343 = vector.load %arg7[%c0_109, %c0_110] : memref<8x128xf32, #tpu.memory_space<vmem>>, vector<8x128xf32>
      tpu.vector_store %arg7[%c0_109, %c0_110], %342 {strides = array<i32>} : memref<8x128xf32, #tpu.memory_space<vmem>>, vector<8x128xf32>,
    } else {
    }
    %c0 = arith.constant 0 : index
    %c0_1 = arith.constant 0 : index
    %c0_2 = arith.constant 0 : index
    %3 = vector.load %arg3[%c0, %c0_1, %c0_2] : memref<1x128x384xbf16, #tpu.memory_space<vmem>>, vector<1x128x384xbf16>
    %4 = vector.shape_cast %3 : vector<1x128x384xbf16> to vector<128x384xbf16>
    %c0_3 = arith.constant 0 : index
    %c0_4 = arith.constant 0 : index
    %c0_5 = arith.constant 0 : index
    %5 = vector.load %arg4[%c0_3, %c0_4, %c0_5] : memref<1x1x384xf32, #tpu.memory_space<vmem>>, vector<1x1x384xf32>
    %6 = vector.shape_cast %5 : vector<1x1x384xf32> to vector<1x384xf32>
    %7 = vector.shape_cast %6 : vector<1x384xf32> to vector<1x384xf32>
    %8 = vector.broadcast %7 : vector<1x384xf32> to vector<8x384xf32>
    %c0_6 = arith.constant 0 : index
    %c0_7 = arith.constant 0 : index
    %9 = vector.load %arg7[%c0_6, %c0_7] : memref<8x128xf32, #tpu.memory_space<vmem>>, vector<8x128xf32>
    %c0_i32_8 = arith.constant 0 : i32
    %c2_i32 = arith.constant 2 : i32
    %10 = arith.muli %c2_i32, %c0_i32_8 : i32
    %c7_i32 = arith.constant 7 : i32
    %11 = arith.subi %c7_i32, %10 : i32
    %12 = arith.muli %arg0, %11 : i32
    %13 = arith.addi %c0_i32_8, %12 : i32
    %c0_9 = arith.constant 0 : index
    %14 = arith.index_cast %13 : i32 to index
    %c0_10 = arith.constant 0 : index
    %c0_11 = arith.constant 0 : index
    %15 = vector.load %arg2[%c0_9, %14, %c0_10, %c0_11] : memref<1x8x8x384xf32, #tpu.memory_space<vmem>>, vector<1x1x8x384xf32>
    %16 = vector.shape_cast %15 : vector<1x1x8x384xf32> to vector<8x384xf32>
    %17 = arith.truncf %9 : vector<8x128xf32> to vector<8x128xbf16>
    %cst = arith.constant dense<0.000000e+00> : vector<8x384xf32>
    %18 = tpu.matmul %17, %4, %cst {dimension_numbers = #tpu.dot_dimension_numbers<[1], [0], [0], [1], [0, 0, 1, 1], [], []>} : vector<8x128xbf16>, vector<128x384xbf16>, vector<8x384xf32> -> vector<8x384xf32>
    %19 = arith.addf %18, %8 : vector<8x384xf32>
    %20 = vector.extract_strided_slice %16 {offsets = [0, 0], sizes = [8, 128], strides = [1, 1]} : vector<8x384xf32> to vector<8x128xf32>
    %21 = vector.extract_strided_slice %19 {offsets = [0, 0], sizes = [8, 128], strides = [1, 1]} : vector<8x384xf32> to vector<8x128xf32>
    %22 = arith.addf %20, %21 : vector<8x128xf32>
    %23 = arith.negf %22 : vector<8x128xf32>
    %24 = math.exp %23 : vector<8x128xf32>
    %cst_12 = arith.constant 1.000000e+00 : f32
    %25 = vector.broadcast %cst_12 : f32 to vector<8x128xf32>
    %26 = arith.addf %25, %24 : vector<8x128xf32>
    %27 = arith.divf %25, %26 : vector<8x128xf32>
    %28 = vector.extract_strided_slice %16 {offsets = [0, 128], sizes = [8, 128], strides = [1, 1]} : vector<8x384xf32> to vector<8x128xf32>
    %29 = vector.extract_strided_slice %19 {offsets = [0, 128], sizes = [8, 128], strides = [1, 1]} : vector<8x384xf32> to vector<8x128xf32>
    %30 = arith.addf %28, %29 : vector<8x128xf32>
    %31 = arith.negf %30 : vector<8x128xf32>
    %32 = math.exp %31 : vector<8x128xf32>
    %cst_13 = arith.constant 1.000000e+00 : f32
    %33 = vector.broadcast %cst_13 : f32 to vector<8x128xf32>
    %34 = arith.addf %33, %32 : vector<8x128xf32>
    %35 = arith.divf %33, %34 : vector<8x128xf32>
    %36 = vector.extract_strided_slice %16 {offsets = [0, 256], sizes = [8, 128], strides = [1, 1]} : vector<8x384xf32> to vector<8x128xf32>
    %37 = vector.extract_strided_slice %19 {offsets = [0, 256], sizes = [8, 128], strides = [1, 1]} : vector<8x384xf32> to vector<8x128xf32>
    %38 = arith.mulf %27, %37 : vector<8x128xf32>
    %39 = arith.addf %36, %38 : vector<8x128xf32>
    %40 = math.tanh %39 : vector<8x128xf32>
    %cst_14 = arith.constant 1.000000e+00 : f32
    %41 = vector.broadcast %cst_14 : f32 to vector<8x128xf32>
    %42 = arith.subf %41, %35 : vector<8x128xf32>
    %43 = arith.mulf %42, %40 : vector<8x128xf32>
    %44 = arith.mulf %35, %9 : vector<8x128xf32>
    %45 = arith.addf %43, %44 : vector<8x128xf32>
    %46 = arith.truncf %45 : vector<8x128xf32> to vector<8x128xbf16>
    %c0_15 = arith.constant 0 : index
    %47 = arith.index_cast %13 : i32 to index
    %c0_16 = arith.constant 0 : index
    %c0_17 = arith.constant 0 : index
    %48 = vector.load %arg5[%c0_15, %47, %c0_16, %c0_17] : memref<1x8x8x128xbf16, #tpu.memory_space<vmem>>, vector<1x1x8x128xbf16>
    %49 = vector.shape_cast %48 : vector<1x1x8x128xbf16> to vector<8x128xbf16>
    %50 = vector.shape_cast %46 : vector<8x128xbf16> to vector<1x1x8x128xbf16>
    tpu.vector_store %arg5[%c0_15, %47, %c0_16, %c0_17], %50 {strides = array<i32>} : memref<1x8x8x128xbf16, #tpu.memory_space<vmem>>, vector<1x1x8x128xbf16>,
    %c1_i32 = arith.constant 1 : i32
    %c2_i32_18 = arith.constant 2 : i32
    %51 = arith.muli %c2_i32_18, %c1_i32 : i32
    %c7_i32_19 = arith.constant 7 : i32
    %52 = arith.subi %c7_i32_19, %51 : i32
    %53 = arith.muli %arg0, %52 : i32
    %54 = arith.addi %c1_i32, %53 : i32
    %c0_20 = arith.constant 0 : index
    %55 = arith.index_cast %54 : i32 to index
    %c0_21 = arith.constant 0 : index
    %c0_22 = arith.constant 0 : index
    %56 = vector.load %arg2[%c0_20, %55, %c0_21, %c0_22] : memref<1x8x8x384xf32, #tpu.memory_space<vmem>>, vector<1x1x8x384xf32>
    %57 = vector.shape_cast %56 : vector<1x1x8x384xf32> to vector<8x384xf32>
    %58 = arith.truncf %45 : vector<8x128xf32> to vector<8x128xbf16>
    %cst_23 = arith.constant dense<0.000000e+00> : vector<8x384xf32>
    %59 = tpu.matmul %58, %4, %cst_23 {dimension_numbers = #tpu.dot_dimension_numbers<[1], [0], [0], [1], [0, 0, 1, 1], [], []>} : vector<8x128xbf16>, vector<128x384xbf16>, vector<8x384xf32> -> vector<8x384xf32>
    %60 = arith.addf %59, %8 : vector<8x384xf32>
    %61 = vector.extract_strided_slice %57 {offsets = [0, 0], sizes = [8, 128], strides = [1, 1]} : vector<8x384xf32> to vector<8x128xf32>
    %62 = vector.extract_strided_slice %60 {offsets = [0, 0], sizes = [8, 128], strides = [1, 1]} : vector<8x384xf32> to vector<8x128xf32>
    %63 = arith.addf %61, %62 : vector<8x128xf32>
    %64 = arith.negf %63 : vector<8x128xf32>
    %65 = math.exp %64 : vector<8x128xf32>
    %cst_24 = arith.constant 1.000000e+00 : f32
    %66 = vector.broadcast %cst_24 : f32 to vector<8x128xf32>
    %67 = arith.addf %66, %65 : vector<8x128xf32>
    %68 = arith.divf %66, %67 : vector<8x128xf32>
    %69 = vector.extract_strided_slice %57 {offsets = [0, 128], sizes = [8, 128], strides = [1, 1]} : vector<8x384xf32> to vector<8x128xf32>
    %70 = vector.extract_strided_slice %60 {offsets = [0, 128], sizes = [8, 128], strides = [1, 1]} : vector<8x384xf32> to vector<8x128xf32>
    %71 = arith.addf %69, %70 : vector<8x128xf32>
    %72 = arith.negf %71 : vector<8x128xf32>
    %73 = math.exp %72 : vector<8x128xf32>
    %cst_25 = arith.constant 1.000000e+00 : f32
    %74 = vector.broadcast %cst_25 : f32 to vector<8x128xf32>
    %75 = arith.addf %74, %73 : vector<8x128xf32>
    %76 = arith.divf %74, %75 : vector<8x128xf32>
    %77 = vector.extract_strided_slice %57 {offsets = [0, 256], sizes = [8, 128], strides = [1, 1]} : vector<8x384xf32> to vector<8x128xf32>
    %78 = vector.extract_strided_slice %60 {offsets = [0, 256], sizes = [8, 128], strides = [1, 1]} : vector<8x384xf32> to vector<8x128xf32>
    %79 = arith.mulf %68, %78 : vector<8x128xf32>
    %80 = arith.addf %77, %79 : vector<8x128xf32>
    %81 = math.tanh %80 : vector<8x128xf32>
    %cst_26 = arith.constant 1.000000e+00 : f32
    %82 = vector.broadcast %cst_26 : f32 to vector<8x128xf32>
    %83 = arith.subf %82, %76 : vector<8x128xf32>
    %84 = arith.mulf %83, %81 : vector<8x128xf32>
    %85 = arith.mulf %76, %45 : vector<8x128xf32>
    %86 = arith.addf %84, %85 : vector<8x128xf32>
    %87 = arith.truncf %86 : vector<8x128xf32> to vector<8x128xbf16>
    %c0_27 = arith.constant 0 : index
    %88 = arith.index_cast %54 : i32 to index
    %c0_28 = arith.constant 0 : index
    %c0_29 = arith.constant 0 : index
    %89 = vector.load %arg5[%c0_27, %88, %c0_28, %c0_29] : memref<1x8x8x128xbf16, #tpu.memory_space<vmem>>, vector<1x1x8x128xbf16>
    %90 = vector.shape_cast %89 : vector<1x1x8x128xbf16> to vector<8x128xbf16>
    %91 = vector.shape_cast %87 : vector<8x128xbf16> to vector<1x1x8x128xbf16>
    tpu.vector_store %arg5[%c0_27, %88, %c0_28, %c0_29], %91 {strides = array<i32>} : memref<1x8x8x128xbf16, #tpu.memory_space<vmem>>, vector<1x1x8x128xbf16>,
    %c2_i32_30 = arith.constant 2 : i32
    %c2_i32_31 = arith.constant 2 : i32
    %92 = arith.muli %c2_i32_31, %c2_i32_30 : i32
    %c7_i32_32 = arith.constant 7 : i32
    %93 = arith.subi %c7_i32_32, %92 : i32
    %94 = arith.muli %arg0, %93 : i32
    %95 = arith.addi %c2_i32_30, %94 : i32
    %c0_33 = arith.constant 0 : index
    %96 = arith.index_cast %95 : i32 to index
    %c0_34 = arith.constant 0 : index
    %c0_35 = arith.constant 0 : index
    %97 = vector.load %arg2[%c0_33, %96, %c0_34, %c0_35] : memref<1x8x8x384xf32, #tpu.memory_space<vmem>>, vector<1x1x8x384xf32>
    %98 = vector.shape_cast %97 : vector<1x1x8x384xf32> to vector<8x384xf32>
    %99 = arith.truncf %86 : vector<8x128xf32> to vector<8x128xbf16>
    %cst_36 = arith.constant dense<0.000000e+00> : vector<8x384xf32>
    %100 = tpu.matmul %99, %4, %cst_36 {dimension_numbers = #tpu.dot_dimension_numbers<[1], [0], [0], [1], [0, 0, 1, 1], [], []>} : vector<8x128xbf16>, vector<128x384xbf16>, vector<8x384xf32> -> vector<8x384xf32>
    %101 = arith.addf %100, %8 : vector<8x384xf32>
    %102 = vector.extract_strided_slice %98 {offsets = [0, 0], sizes = [8, 128], strides = [1, 1]} : vector<8x384xf32> to vector<8x128xf32>
    %103 = vector.extract_strided_slice %101 {offsets = [0, 0], sizes = [8, 128], strides = [1, 1]} : vector<8x384xf32> to vector<8x128xf32>
    %104 = arith.addf %102, %103 : vector<8x128xf32>
    %105 = arith.negf %104 : vector<8x128xf32>
    %106 = math.exp %105 : vector<8x128xf32>
    %cst_37 = arith.constant 1.000000e+00 : f32
    %107 = vector.broadcast %cst_37 : f32 to vector<8x128xf32>
    %108 = arith.addf %107, %106 : vector<8x128xf32>
    %109 = arith.divf %107, %108 : vector<8x128xf32>
    %110 = vector.extract_strided_slice %98 {offsets = [0, 128], sizes = [8, 128], strides = [1, 1]} : vector<8x384xf32> to vector<8x128xf32>
    %111 = vector.extract_strided_slice %101 {offsets = [0, 128], sizes = [8, 128], strides = [1, 1]} : vector<8x384xf32> to vector<8x128xf32>
    %112 = arith.addf %110, %111 : vector<8x128xf32>
    %113 = arith.negf %112 : vector<8x128xf32>
    %114 = math.exp %113 : vector<8x128xf32>
    %cst_38 = arith.constant 1.000000e+00 : f32
    %115 = vector.broadcast %cst_38 : f32 to vector<8x128xf32>
    %116 = arith.addf %115, %114 : vector<8x128xf32>
    %117 = arith.divf %115, %116 : vector<8x128xf32>
    %118 = vector.extract_strided_slice %98 {offsets = [0, 256], sizes = [8, 128], strides = [1, 1]} : vector<8x384xf32> to vector<8x128xf32>
    %119 = vector.extract_strided_slice %101 {offsets = [0, 256], sizes = [8, 128], strides = [1, 1]} : vector<8x384xf32> to vector<8x128xf32>
    %120 = arith.mulf %109, %119 : vector<8x128xf32>
    %121 = arith.addf %118, %120 : vector<8x128xf32>
    %122 = math.tanh %121 : vector<8x128xf32>
    %cst_39 = arith.constant 1.000000e+00 : f32
    %123 = vector.broadcast %cst_39 : f32 to vector<8x128xf32>
    %124 = arith.subf %123, %117 : vector<8x128xf32>
    %125 = arith.mulf %124, %122 : vector<8x128xf32>
    %126 = arith.mulf %117, %86 : vector<8x128xf32>
    %127 = arith.addf %125, %126 : vector<8x128xf32>
    %128 = arith.truncf %127 : vector<8x128xf32> to vector<8x128xbf16>
    %c0_40 = arith.constant 0 : index
    %129 = arith.index_cast %95 : i32 to index
    %c0_41 = arith.constant 0 : index
    %c0_42 = arith.constant 0 : index
    %130 = vector.load %arg5[%c0_40, %129, %c0_41, %c0_42] : memref<1x8x8x128xbf16, #tpu.memory_space<vmem>>, vector<1x1x8x128xbf16>
    %131 = vector.shape_cast %130 : vector<1x1x8x128xbf16> to vector<8x128xbf16>
    %132 = vector.shape_cast %128 : vector<8x128xbf16> to vector<1x1x8x128xbf16>
    tpu.vector_store %arg5[%c0_40, %129, %c0_41, %c0_42], %132 {strides = array<i32>} : memref<1x8x8x128xbf16, #tpu.memory_space<vmem>>, vector<1x1x8x128xbf16>,
    %c3_i32 = arith.constant 3 : i32
    %c2_i32_43 = arith.constant 2 : i32
    %133 = arith.muli %c2_i32_43, %c3_i32 : i32
    %c7_i32_44 = arith.constant 7 : i32
    %134 = arith.subi %c7_i32_44, %133 : i32
    %135 = arith.muli %arg0, %134 : i32
    %136 = arith.addi %c3_i32, %135 : i32
    %c0_45 = arith.constant 0 : index
    %137 = arith.index_cast %136 : i32 to index
    %c0_46 = arith.constant 0 : index
    %c0_47 = arith.constant 0 : index
    %138 = vector.load %arg2[%c0_45, %137, %c0_46, %c0_47] : memref<1x8x8x384xf32, #tpu.memory_space<vmem>>, vector<1x1x8x384xf32>
    %139 = vector.shape_cast %138 : vector<1x1x8x384xf32> to vector<8x384xf32>
    %140 = arith.truncf %127 : vector<8x128xf32> to vector<8x128xbf16>
    %cst_48 = arith.constant dense<0.000000e+00> : vector<8x384xf32>
    %141 = tpu.matmul %140, %4, %cst_48 {dimension_numbers = #tpu.dot_dimension_numbers<[1], [0], [0], [1], [0, 0, 1, 1], [], []>} : vector<8x128xbf16>, vector<128x384xbf16>, vector<8x384xf32> -> vector<8x384xf32>
    %142 = arith.addf %141, %8 : vector<8x384xf32>
    %143 = vector.extract_strided_slice %139 {offsets = [0, 0], sizes = [8, 128], strides = [1, 1]} : vector<8x384xf32> to vector<8x128xf32>
    %144 = vector.extract_strided_slice %142 {offsets = [0, 0], sizes = [8, 128], strides = [1, 1]} : vector<8x384xf32> to vector<8x128xf32>
    %145 = arith.addf %143, %144 : vector<8x128xf32>
    %146 = arith.negf %145 : vector<8x128xf32>
    %147 = math.exp %146 : vector<8x128xf32>
    %cst_49 = arith.constant 1.000000e+00 : f32
    %148 = vector.broadcast %cst_49 : f32 to vector<8x128xf32>
    %149 = arith.addf %148, %147 : vector<8x128xf32>
    %150 = arith.divf %148, %149 : vector<8x128xf32>
    %151 = vector.extract_strided_slice %139 {offsets = [0, 128], sizes = [8, 128], strides = [1, 1]} : vector<8x384xf32> to vector<8x128xf32>
    %152 = vector.extract_strided_slice %142 {offsets = [0, 128], sizes = [8, 128], strides = [1, 1]} : vector<8x384xf32> to vector<8x128xf32>
    %153 = arith.addf %151, %152 : vector<8x128xf32>
    %154 = arith.negf %153 : vector<8x128xf32>
    %155 = math.exp %154 : vector<8x128xf32>
    %cst_50 = arith.constant 1.000000e+00 : f32
    %156 = vector.broadcast %cst_50 : f32 to vector<8x128xf32>
    %157 = arith.addf %156, %155 : vector<8x128xf32>
    %158 = arith.divf %156, %157 : vector<8x128xf32>
    %159 = vector.extract_strided_slice %139 {offsets = [0, 256], sizes = [8, 128], strides = [1, 1]} : vector<8x384xf32> to vector<8x128xf32>
    %160 = vector.extract_strided_slice %142 {offsets = [0, 256], sizes = [8, 128], strides = [1, 1]} : vector<8x384xf32> to vector<8x128xf32>
    %161 = arith.mulf %150, %160 : vector<8x128xf32>
    %162 = arith.addf %159, %161 : vector<8x128xf32>
    %163 = math.tanh %162 : vector<8x128xf32>
    %cst_51 = arith.constant 1.000000e+00 : f32
    %164 = vector.broadcast %cst_51 : f32 to vector<8x128xf32>
    %165 = arith.subf %164, %158 : vector<8x128xf32>
    %166 = arith.mulf %165, %163 : vector<8x128xf32>
    %167 = arith.mulf %158, %127 : vector<8x128xf32>
    %168 = arith.addf %166, %167 : vector<8x128xf32>
    %169 = arith.truncf %168 : vector<8x128xf32> to vector<8x128xbf16>
    %c0_52 = arith.constant 0 : index
    %170 = arith.index_cast %136 : i32 to index
    %c0_53 = arith.constant 0 : index
    %c0_54 = arith.constant 0 : index
    %171 = vector.load %arg5[%c0_52, %170, %c0_53, %c0_54] : memref<1x8x8x128xbf16, #tpu.memory_space<vmem>>, vector<1x1x8x128xbf16>
    %172 = vector.shape_cast %171 : vector<1x1x8x128xbf16> to vector<8x128xbf16>
    %173 = vector.shape_cast %169 : vector<8x128xbf16> to vector<1x1x8x128xbf16>
    tpu.vector_store %arg5[%c0_52, %170, %c0_53, %c0_54], %173 {strides = array<i32>} : memref<1x8x8x128xbf16, #tpu.memory_space<vmem>>, vector<1x1x8x128xbf16>,
    %c4_i32 = arith.constant 4 : i32
    %c2_i32_55 = arith.constant 2 : i32
    %174 = arith.muli %c2_i32_55, %c4_i32 : i32
    %c7_i32_56 = arith.constant 7 : i32
    %175 = arith.subi %c7_i32_56, %174 : i32
    %176 = arith.muli %arg0, %175 : i32
    %177 = arith.addi %c4_i32, %176 : i32
    %c0_57 = arith.constant 0 : index
    %178 = arith.index_cast %177 : i32 to index
    %c0_58 = arith.constant 0 : index
    %c0_59 = arith.constant 0 : index
    %179 = vector.load %arg2[%c0_57, %178, %c0_58, %c0_59] : memref<1x8x8x384xf32, #tpu.memory_space<vmem>>, vector<1x1x8x384xf32>
    %180 = vector.shape_cast %179 : vector<1x1x8x384xf32> to vector<8x384xf32>
    %181 = arith.truncf %168 : vector<8x128xf32> to vector<8x128xbf16>
    %cst_60 = arith.constant dense<0.000000e+00> : vector<8x384xf32>
    %182 = tpu.matmul %181, %4, %cst_60 {dimension_numbers = #tpu.dot_dimension_numbers<[1], [0], [0], [1], [0, 0, 1, 1], [], []>} : vector<8x128xbf16>, vector<128x384xbf16>, vector<8x384xf32> -> vector<8x384xf32>
    %183 = arith.addf %182, %8 : vector<8x384xf32>
    %184 = vector.extract_strided_slice %180 {offsets = [0, 0], sizes = [8, 128], strides = [1, 1]} : vector<8x384xf32> to vector<8x128xf32>
    %185 = vector.extract_strided_slice %183 {offsets = [0, 0], sizes = [8, 128], strides = [1, 1]} : vector<8x384xf32> to vector<8x128xf32>
    %186 = arith.addf %184, %185 : vector<8x128xf32>
    %187 = arith.negf %186 : vector<8x128xf32>
    %188 = math.exp %187 : vector<8x128xf32>
    %cst_61 = arith.constant 1.000000e+00 : f32
    %189 = vector.broadcast %cst_61 : f32 to vector<8x128xf32>
    %190 = arith.addf %189, %188 : vector<8x128xf32>
    %191 = arith.divf %189, %190 : vector<8x128xf32>
    %192 = vector.extract_strided_slice %180 {offsets = [0, 128], sizes = [8, 128], strides = [1, 1]} : vector<8x384xf32> to vector<8x128xf32>
    %193 = vector.extract_strided_slice %183 {offsets = [0, 128], sizes = [8, 128], strides = [1, 1]} : vector<8x384xf32> to vector<8x128xf32>
    %194 = arith.addf %192, %193 : vector<8x128xf32>
    %195 = arith.negf %194 : vector<8x128xf32>
    %196 = math.exp %195 : vector<8x128xf32>
    %cst_62 = arith.constant 1.000000e+00 : f32
    %197 = vector.broadcast %cst_62 : f32 to vector<8x128xf32>
    %198 = arith.addf %197, %196 : vector<8x128xf32>
    %199 = arith.divf %197, %198 : vector<8x128xf32>
    %200 = vector.extract_strided_slice %180 {offsets = [0, 256], sizes = [8, 128], strides = [1, 1]} : vector<8x384xf32> to vector<8x128xf32>
    %201 = vector.extract_strided_slice %183 {offsets = [0, 256], sizes = [8, 128], strides = [1, 1]} : vector<8x384xf32> to vector<8x128xf32>
    %202 = arith.mulf %191, %201 : vector<8x128xf32>
    %203 = arith.addf %200, %202 : vector<8x128xf32>
    %204 = math.tanh %203 : vector<8x128xf32>
    %cst_63 = arith.constant 1.000000e+00 : f32
    %205 = vector.broadcast %cst_63 : f32 to vector<8x128xf32>
    %206 = arith.subf %205, %199 : vector<8x128xf32>
    %207 = arith.mulf %206, %204 : vector<8x128xf32>
    %208 = arith.mulf %199, %168 : vector<8x128xf32>
    %209 = arith.addf %207, %208 : vector<8x128xf32>
    %210 = arith.truncf %209 : vector<8x128xf32> to vector<8x128xbf16>
    %c0_64 = arith.constant 0 : index
    %211 = arith.index_cast %177 : i32 to index
    %c0_65 = arith.constant 0 : index
    %c0_66 = arith.constant 0 : index
    %212 = vector.load %arg5[%c0_64, %211, %c0_65, %c0_66] : memref<1x8x8x128xbf16, #tpu.memory_space<vmem>>, vector<1x1x8x128xbf16>
    %213 = vector.shape_cast %212 : vector<1x1x8x128xbf16> to vector<8x128xbf16>
    %214 = vector.shape_cast %210 : vector<8x128xbf16> to vector<1x1x8x128xbf16>
    tpu.vector_store %arg5[%c0_64, %211, %c0_65, %c0_66], %214 {strides = array<i32>} : memref<1x8x8x128xbf16, #tpu.memory_space<vmem>>, vector<1x1x8x128xbf16>,
    %c5_i32 = arith.constant 5 : i32
    %c2_i32_67 = arith.constant 2 : i32
    %215 = arith.muli %c2_i32_67, %c5_i32 : i32
    %c7_i32_68 = arith.constant 7 : i32
    %216 = arith.subi %c7_i32_68, %215 : i32
    %217 = arith.muli %arg0, %216 : i32
    %218 = arith.addi %c5_i32, %217 : i32
    %c0_69 = arith.constant 0 : index
    %219 = arith.index_cast %218 : i32 to index
    %c0_70 = arith.constant 0 : index
    %c0_71 = arith.constant 0 : index
    %220 = vector.load %arg2[%c0_69, %219, %c0_70, %c0_71] : memref<1x8x8x384xf32, #tpu.memory_space<vmem>>, vector<1x1x8x384xf32>
    %221 = vector.shape_cast %220 : vector<1x1x8x384xf32> to vector<8x384xf32>
    %222 = arith.truncf %209 : vector<8x128xf32> to vector<8x128xbf16>
    %cst_72 = arith.constant dense<0.000000e+00> : vector<8x384xf32>
    %223 = tpu.matmul %222, %4, %cst_72 {dimension_numbers = #tpu.dot_dimension_numbers<[1], [0], [0], [1], [0, 0, 1, 1], [], []>} : vector<8x128xbf16>, vector<128x384xbf16>, vector<8x384xf32> -> vector<8x384xf32>
    %224 = arith.addf %223, %8 : vector<8x384xf32>
    %225 = vector.extract_strided_slice %221 {offsets = [0, 0], sizes = [8, 128], strides = [1, 1]} : vector<8x384xf32> to vector<8x128xf32>
    %226 = vector.extract_strided_slice %224 {offsets = [0, 0], sizes = [8, 128], strides = [1, 1]} : vector<8x384xf32> to vector<8x128xf32>
    %227 = arith.addf %225, %226 : vector<8x128xf32>
    %228 = arith.negf %227 : vector<8x128xf32>
    %229 = math.exp %228 : vector<8x128xf32>
    %cst_73 = arith.constant 1.000000e+00 : f32
    %230 = vector.broadcast %cst_73 : f32 to vector<8x128xf32>
    %231 = arith.addf %230, %229 : vector<8x128xf32>
    %232 = arith.divf %230, %231 : vector<8x128xf32>
    %233 = vector.extract_strided_slice %221 {offsets = [0, 128], sizes = [8, 128], strides = [1, 1]} : vector<8x384xf32> to vector<8x128xf32>
    %234 = vector.extract_strided_slice %224 {offsets = [0, 128], sizes = [8, 128], strides = [1, 1]} : vector<8x384xf32> to vector<8x128xf32>
    %235 = arith.addf %233, %234 : vector<8x128xf32>
    %236 = arith.negf %235 : vector<8x128xf32>
    %237 = math.exp %236 : vector<8x128xf32>
    %cst_74 = arith.constant 1.000000e+00 : f32
    %238 = vector.broadcast %cst_74 : f32 to vector<8x128xf32>
    %239 = arith.addf %238, %237 : vector<8x128xf32>
    %240 = arith.divf %238, %239 : vector<8x128xf32>
    %241 = vector.extract_strided_slice %221 {offsets = [0, 256], sizes = [8, 128], strides = [1, 1]} : vector<8x384xf32> to vector<8x128xf32>
    %242 = vector.extract_strided_slice %224 {offsets = [0, 256], sizes = [8, 128], strides = [1, 1]} : vector<8x384xf32> to vector<8x128xf32>
    %243 = arith.mulf %232, %242 : vector<8x128xf32>
    %244 = arith.addf %241, %243 : vector<8x128xf32>
    %245 = math.tanh %244 : vector<8x128xf32>
    %cst_75 = arith.constant 1.000000e+00 : f32
    %246 = vector.broadcast %cst_75 : f32 to vector<8x128xf32>
    %247 = arith.subf %246, %240 : vector<8x128xf32>
    %248 = arith.mulf %247, %245 : vector<8x128xf32>
    %249 = arith.mulf %240, %209 : vector<8x128xf32>
    %250 = arith.addf %248, %249 : vector<8x128xf32>
    %251 = arith.truncf %250 : vector<8x128xf32> to vector<8x128xbf16>
    %c0_76 = arith.constant 0 : index
    %252 = arith.index_cast %218 : i32 to index
    %c0_77 = arith.constant 0 : index
    %c0_78 = arith.constant 0 : index
    %253 = vector.load %arg5[%c0_76, %252, %c0_77, %c0_78] : memref<1x8x8x128xbf16, #tpu.memory_space<vmem>>, vector<1x1x8x128xbf16>
    %254 = vector.shape_cast %253 : vector<1x1x8x128xbf16> to vector<8x128xbf16>
    %255 = vector.shape_cast %251 : vector<8x128xbf16> to vector<1x1x8x128xbf16>
    tpu.vector_store %arg5[%c0_76, %252, %c0_77, %c0_78], %255 {strides = array<i32>} : memref<1x8x8x128xbf16, #tpu.memory_space<vmem>>, vector<1x1x8x128xbf16>,
    %c6_i32 = arith.constant 6 : i32
    %c2_i32_79 = arith.constant 2 : i32
    %256 = arith.muli %c2_i32_79, %c6_i32 : i32
    %c7_i32_80 = arith.constant 7 : i32
    %257 = arith.subi %c7_i32_80, %256 : i32
    %258 = arith.muli %arg0, %257 : i32
    %259 = arith.addi %c6_i32, %258 : i32
    %c0_81 = arith.constant 0 : index
    %260 = arith.index_cast %259 : i32 to index
    %c0_82 = arith.constant 0 : index
    %c0_83 = arith.constant 0 : index
    %261 = vector.load %arg2[%c0_81, %260, %c0_82, %c0_83] : memref<1x8x8x384xf32, #tpu.memory_space<vmem>>, vector<1x1x8x384xf32>
    %262 = vector.shape_cast %261 : vector<1x1x8x384xf32> to vector<8x384xf32>
    %263 = arith.truncf %250 : vector<8x128xf32> to vector<8x128xbf16>
    %cst_84 = arith.constant dense<0.000000e+00> : vector<8x384xf32>
    %264 = tpu.matmul %263, %4, %cst_84 {dimension_numbers = #tpu.dot_dimension_numbers<[1], [0], [0], [1], [0, 0, 1, 1], [], []>} : vector<8x128xbf16>, vector<128x384xbf16>, vector<8x384xf32> -> vector<8x384xf32>
    %265 = arith.addf %264, %8 : vector<8x384xf32>
    %266 = vector.extract_strided_slice %262 {offsets = [0, 0], sizes = [8, 128], strides = [1, 1]} : vector<8x384xf32> to vector<8x128xf32>
    %267 = vector.extract_strided_slice %265 {offsets = [0, 0], sizes = [8, 128], strides = [1, 1]} : vector<8x384xf32> to vector<8x128xf32>
    %268 = arith.addf %266, %267 : vector<8x128xf32>
    %269 = arith.negf %268 : vector<8x128xf32>
    %270 = math.exp %269 : vector<8x128xf32>
    %cst_85 = arith.constant 1.000000e+00 : f32
    %271 = vector.broadcast %cst_85 : f32 to vector<8x128xf32>
    %272 = arith.addf %271, %270 : vector<8x128xf32>
    %273 = arith.divf %271, %272 : vector<8x128xf32>
    %274 = vector.extract_strided_slice %262 {offsets = [0, 128], sizes = [8, 128], strides = [1, 1]} : vector<8x384xf32> to vector<8x128xf32>
    %275 = vector.extract_strided_slice %265 {offsets = [0, 128], sizes = [8, 128], strides = [1, 1]} : vector<8x384xf32> to vector<8x128xf32>
    %276 = arith.addf %274, %275 : vector<8x128xf32>
    %277 = arith.negf %276 : vector<8x128xf32>
    %278 = math.exp %277 : vector<8x128xf32>
    %cst_86 = arith.constant 1.000000e+00 : f32
    %279 = vector.broadcast %cst_86 : f32 to vector<8x128xf32>
    %280 = arith.addf %279, %278 : vector<8x128xf32>
    %281 = arith.divf %279, %280 : vector<8x128xf32>
    %282 = vector.extract_strided_slice %262 {offsets = [0, 256], sizes = [8, 128], strides = [1, 1]} : vector<8x384xf32> to vector<8x128xf32>
    %283 = vector.extract_strided_slice %265 {offsets = [0, 256], sizes = [8, 128], strides = [1, 1]} : vector<8x384xf32> to vector<8x128xf32>
    %284 = arith.mulf %273, %283 : vector<8x128xf32>
    %285 = arith.addf %282, %284 : vector<8x128xf32>
    %286 = math.tanh %285 : vector<8x128xf32>
    %cst_87 = arith.constant 1.000000e+00 : f32
    %287 = vector.broadcast %cst_87 : f32 to vector<8x128xf32>
    %288 = arith.subf %287, %281 : vector<8x128xf32>
    %289 = arith.mulf %288, %286 : vector<8x128xf32>
    %290 = arith.mulf %281, %250 : vector<8x128xf32>
    %291 = arith.addf %289, %290 : vector<8x128xf32>
    %292 = arith.truncf %291 : vector<8x128xf32> to vector<8x128xbf16>
    %c0_88 = arith.constant 0 : index
    %293 = arith.index_cast %259 : i32 to index
    %c0_89 = arith.constant 0 : index
    %c0_90 = arith.constant 0 : index
    %294 = vector.load %arg5[%c0_88, %293, %c0_89, %c0_90] : memref<1x8x8x128xbf16, #tpu.memory_space<vmem>>, vector<1x1x8x128xbf16>
    %295 = vector.shape_cast %294 : vector<1x1x8x128xbf16> to vector<8x128xbf16>
    %296 = vector.shape_cast %292 : vector<8x128xbf16> to vector<1x1x8x128xbf16>
    tpu.vector_store %arg5[%c0_88, %293, %c0_89, %c0_90], %296 {strides = array<i32>} : memref<1x8x8x128xbf16, #tpu.memory_space<vmem>>, vector<1x1x8x128xbf16>,
    %c7_i32_91 = arith.constant 7 : i32
    %c2_i32_92 = arith.constant 2 : i32
    %297 = arith.muli %c2_i32_92, %c7_i32_91 : i32
    %c7_i32_93 = arith.constant 7 : i32
    %298 = arith.subi %c7_i32_93, %297 : i32
    %299 = arith.muli %arg0, %298 : i32
    %300 = arith.addi %c7_i32_91, %299 : i32
    %c0_94 = arith.constant 0 : index
    %301 = arith.index_cast %300 : i32 to index
    %c0_95 = arith.constant 0 : index
    %c0_96 = arith.constant 0 : index
    %302 = vector.load %arg2[%c0_94, %301, %c0_95, %c0_96] : memref<1x8x8x384xf32, #tpu.memory_space<vmem>>, vector<1x1x8x384xf32>
    %303 = vector.shape_cast %302 : vector<1x1x8x384xf32> to vector<8x384xf32>
    %304 = arith.truncf %291 : vector<8x128xf32> to vector<8x128xbf16>
    %cst_97 = arith.constant dense<0.000000e+00> : vector<8x384xf32>
    %305 = tpu.matmul %304, %4, %cst_97 {dimension_numbers = #tpu.dot_dimension_numbers<[1], [0], [0], [1], [0, 0, 1, 1], [], []>} : vector<8x128xbf16>, vector<128x384xbf16>, vector<8x384xf32> -> vector<8x384xf32>
    %306 = arith.addf %305, %8 : vector<8x384xf32>
    %307 = vector.extract_strided_slice %303 {offsets = [0, 0], sizes = [8, 128], strides = [1, 1]} : vector<8x384xf32> to vector<8x128xf32>
    %308 = vector.extract_strided_slice %306 {offsets = [0, 0], sizes = [8, 128], strides = [1, 1]} : vector<8x384xf32> to vector<8x128xf32>
    %309 = arith.addf %307, %308 : vector<8x128xf32>
    %310 = arith.negf %309 : vector<8x128xf32>
    %311 = math.exp %310 : vector<8x128xf32>
    %cst_98 = arith.constant 1.000000e+00 : f32
    %312 = vector.broadcast %cst_98 : f32 to vector<8x128xf32>
    %313 = arith.addf %312, %311 : vector<8x128xf32>
    %314 = arith.divf %312, %313 : vector<8x128xf32>
    %315 = vector.extract_strided_slice %303 {offsets = [0, 128], sizes = [8, 128], strides = [1, 1]} : vector<8x384xf32> to vector<8x128xf32>
    %316 = vector.extract_strided_slice %306 {offsets = [0, 128], sizes = [8, 128], strides = [1, 1]} : vector<8x384xf32> to vector<8x128xf32>
    %317 = arith.addf %315, %316 : vector<8x128xf32>
    %318 = arith.negf %317 : vector<8x128xf32>
    %319 = math.exp %318 : vector<8x128xf32>
    %cst_99 = arith.constant 1.000000e+00 : f32
    %320 = vector.broadcast %cst_99 : f32 to vector<8x128xf32>
    %321 = arith.addf %320, %319 : vector<8x128xf32>
    %322 = arith.divf %320, %321 : vector<8x128xf32>
    %323 = vector.extract_strided_slice %303 {offsets = [0, 256], sizes = [8, 128], strides = [1, 1]} : vector<8x384xf32> to vector<8x128xf32>
    %324 = vector.extract_strided_slice %306 {offsets = [0, 256], sizes = [8, 128], strides = [1, 1]} : vector<8x384xf32> to vector<8x128xf32>
    %325 = arith.mulf %314, %324 : vector<8x128xf32>
    %326 = arith.addf %323, %325 : vector<8x128xf32>
    %327 = math.tanh %326 : vector<8x128xf32>
    %cst_100 = arith.constant 1.000000e+00 : f32
    %328 = vector.broadcast %cst_100 : f32 to vector<8x128xf32>
    %329 = arith.subf %328, %322 : vector<8x128xf32>
    %330 = arith.mulf %329, %327 : vector<8x128xf32>
    %331 = arith.mulf %322, %291 : vector<8x128xf32>
    %332 = arith.addf %330, %331 : vector<8x128xf32>
    %333 = arith.truncf %332 : vector<8x128xf32> to vector<8x128xbf16>
    %c0_101 = arith.constant 0 : index
    %334 = arith.index_cast %300 : i32 to index
    %c0_102 = arith.constant 0 : index
    %c0_103 = arith.constant 0 : index
    %335 = vector.load %arg5[%c0_101, %334, %c0_102, %c0_103] : memref<1x8x8x128xbf16, #tpu.memory_space<vmem>>, vector<1x1x8x128xbf16>
    %336 = vector.shape_cast %335 : vector<1x1x8x128xbf16> to vector<8x128xbf16>
    %337 = vector.shape_cast %333 : vector<8x128xbf16> to vector<1x1x8x128xbf16>
    tpu.vector_store %arg5[%c0_101, %334, %c0_102, %c0_103], %337 {strides = array<i32>} : memref<1x8x8x128xbf16, #tpu.memory_space<vmem>>, vector<1x1x8x128xbf16>,
    %c8_i32 = arith.constant 8 : i32
    %c0_104 = arith.constant 0 : index
    %c0_105 = arith.constant 0 : index
    %338 = vector.load %arg7[%c0_104, %c0_105] : memref<8x128xf32, #tpu.memory_space<vmem>>, vector<8x128xf32>
    tpu.vector_store %arg7[%c0_104, %c0_105], %332 {strides = array<i32>} : memref<8x128xf32, #tpu.memory_space<vmem>>, vector<8x128xf32>,
    %c1_i32_106 = arith.constant 1 : i32
    %339 = arith.cmpi eq, %arg1, %c1_i32_106 : i32
    %340 = arith.extui %339 : i1 to i32
    %c0_i32_107 = arith.constant 0 : i32
    %341 = arith.cmpi ne, %340, %c0_i32_107 : i32
    scf.if %341 {
      %c0_108 = arith.constant 0 : index
      %c0_109 = arith.constant 0 : index
      %c0_110 = arith.constant 0 : index
      %342 = vector.load %arg6[%c0_108, %c0_109, %c0_110] : memref<1x8x128xf32, #tpu.memory_space<vmem>>, vector<1x8x128xf32>
      %343 = vector.shape_cast %342 : vector<1x8x128xf32> to vector<8x128xf32>
      %344 = vector.shape_cast %332 : vector<8x128xf32> to vector<1x8x128xf32>
      tpu.vector_store %arg6[%c0_108, %c0_109, %c0_110], %344 {strides = array<i32>} : memref<1x8x128xf32, #tpu.memory_space<vmem>>, vector<1x8x128xf32>,
    } else {
    }
    return
  }
  func.func @transform_0(%arg0: i32, %arg1: i32) -> (i32, i32, i32, i32) {
    %c2_i32 = arith.constant 2 : i32
    %0 = arith.muli %c2_i32, %arg1 : i32
    %c1_i32 = arith.constant 1 : i32
    %1 = arith.subi %c1_i32, %0 : i32
    %2 = arith.muli %arg0, %1 : i32
    %3 = arith.addi %arg1, %2 : i32
    %c0_i32 = arith.constant 0 : i32
    %c0_i32_0 = arith.constant 0 : i32
    %c0_i32_1 = arith.constant 0 : i32
    return %arg0, %3, %c0_i32, %c0_i32_0 : i32, i32, i32, i32
  }
  func.func @transform_1(%arg0: i32, %arg1: i32) -> (i32, i32, i32) {
    %c0_i32 = arith.constant 0 : i32
    %c0_i32_0 = arith.constant 0 : i32
    %c0_i32_1 = arith.constant 0 : i32
    return %arg0, %c0_i32, %c0_i32_0 : i32, i32, i32
  }
  func.func @transform_2(%arg0: i32, %arg1: i32) -> (i32, i32, i32) {
    %c0_i32 = arith.constant 0 : i32
    %c0_i32_0 = arith.constant 0 : i32
    %c0_i32_1 = arith.constant 0 : i32
    return %arg0, %c0_i32, %c0_i32_0 : i32, i32, i32
  }
  func.func @transform_3(%arg0: i32, %arg1: i32) -> (i32, i32, i32, i32) {
    %c2_i32 = arith.constant 2 : i32
    %0 = arith.muli %c2_i32, %arg1 : i32
    %c1_i32 = arith.constant 1 : i32
    %1 = arith.subi %c1_i32, %0 : i32
    %2 = arith.muli %arg0, %1 : i32
    %3 = arith.addi %arg1, %2 : i32
    %c0_i32 = arith.constant 0 : i32
    %c0_i32_0 = arith.constant 0 : i32
    %c0_i32_1 = arith.constant 0 : i32
    return %arg0, %3, %c0_i32, %c0_i32_0 : i32, i32, i32, i32
  }
  func.func @transform_4(%arg0: i32, %arg1: i32) -> (i32, i32, i32) {
    %c0_i32 = arith.constant 0 : i32
    %c0_i32_0 = arith.constant 0 : i32
    %c0_i32_1 = arith.constant 0 : i32
    return %arg0, %c0_i32, %c0_i32_0 : i32, i32, i32
  }
}

module attributes {stable_mosaic.version = 11 : i64} {
  func.func @_gru_seq_kernel(%arg0: i32, %arg1: i32, %arg2: memref<1x8x8x384xf32, #tpu.memory_space<vmem>>, %arg3: memref<1x128x384xbf16, #tpu.memory_space<vmem>>, %arg4: memref<1x1x384xf32, #tpu.memory_space<vmem>>, %arg5: memref<1x8x8x128xbf16, #tpu.memory_space<vmem>>, %arg6: memref<1x8x128xf32, #tpu.memory_space<vmem>>, %arg7: memref<8x128xf32, #tpu.memory_space<vmem>>) attributes {dimension_semantics = [#tpu.dimension_semantics<parallel>, #tpu.dimension_semantics<arbitrary>], iteration_bounds = array<i64: 2, 2>, scalar_prefetch = 0 : i64, scratch_operands = 1 : i64, tpu.core_type = #tpu.core_type<tc>, window_params = [{transform_indices = @transform_0, window_bounds = array<i64: 1, 8, 8, 384>}, {transform_indices = @transform_1, window_bounds = array<i64: 1, 128, 384>}, {transform_indices = @transform_2, window_bounds = array<i64: 1, 1, 384>}, {transform_indices = @transform_3, window_bounds = array<i64: 1, 8, 8, 128>}, {transform_indices = @transform_4, window_bounds = array<i64: 1, 8, 128>}]} {
    %c0_i32 = arith.constant 0 : i32
    %0 = arith.cmpi eq, %arg1, %c0_i32 : i32
    %1 = arith.extui %0 : i1 to i32
    %c0_i32_0 = arith.constant 0 : i32
    %2 = arith.cmpi ne, %1, %c0_i32_0 : i32
    scf.if %2 {
      %cst_108 = arith.constant 0.000000e+00 : f32
      %342 = vector.broadcast %cst_108 : f32 to vector<8x128xf32>
      %c0_109 = arith.constant 0 : index
      %c0_110 = arith.constant 0 : index
      %343 = vector.load %arg7[%c0_109, %c0_110] : memref<8x128xf32, #tpu.memory_space<vmem>>, vector<8x128xf32>
      tpu.vector_store %arg7[%c0_109, %c0_110], %342 {strides = array<i32>} : memref<8x128xf32, #tpu.memory_space<vmem>>, vector<8x128xf32>,
    } else {
    }
    %c0 = arith.constant 0 : index
    %c0_1 = arith.constant 0 : index
    %c0_2 = arith.constant 0 : index
    %3 = vector.load %arg3[%c0, %c0_1, %c0_2] : memref<1x128x384xbf16, #tpu.memory_space<vmem>>, vector<1x128x384xbf16>
    %4 = vector.shape_cast %3 : vector<1x128x384xbf16> to vector<128x384xbf16>
    %c0_3 = arith.constant 0 : index
    %c0_4 = arith.constant 0 : index
    %c0_5 = arith.constant 0 : index
    %5 = vector.load %arg4[%c0_3, %c0_4, %c0_5] : memref<1x1x384xf32, #tpu.memory_space<vmem>>, vector<1x1x384xf32>
    %6 = vector.shape_cast %5 : vector<1x1x384xf32> to vector<1x384xf32>
    %7 = vector.shape_cast %6 : vector<1x384xf32> to vector<1x384xf32>
    %8 = vector.broadcast %7 : vector<1x384xf32> to vector<8x384xf32>
    %c0_6 = arith.constant 0 : index
    %c0_7 = arith.constant 0 : index
    %9 = vector.load %arg7[%c0_6, %c0_7] : memref<8x128xf32, #tpu.memory_space<vmem>>, vector<8x128xf32>
    %c0_i32_8 = arith.constant 0 : i32
    %c2_i32 = arith.constant 2 : i32
    %10 = arith.muli %c2_i32, %c0_i32_8 : i32
    %c7_i32 = arith.constant 7 : i32
    %11 = arith.subi %c7_i32, %10 : i32
    %12 = arith.muli %arg0, %11 : i32
    %13 = arith.addi %c0_i32_8, %12 : i32
    %c0_9 = arith.constant 0 : index
    %14 = arith.index_cast %13 : i32 to index
    %c0_10 = arith.constant 0 : index
    %c0_11 = arith.constant 0 : index
    %15 = vector.load %arg2[%c0_9, %14, %c0_10, %c0_11] : memref<1x8x8x384xf32, #tpu.memory_space<vmem>>, vector<1x1x8x384xf32>
    %16 = vector.shape_cast %15 : vector<1x1x8x384xf32> to vector<8x384xf32>
    %17 = arith.truncf %9 : vector<8x128xf32> to vector<8x128xbf16>
    %cst = arith.constant dense<0.000000e+00> : vector<8x384xf32>
    %18 = tpu.matmul %17, %4, %cst {dimension_numbers = #tpu.dot_dimension_numbers<[1], [0], [0], [1], [0, 0, 1, 1], [], []>} : vector<8x128xbf16>, vector<128x384xbf16>, vector<8x384xf32> -> vector<8x384xf32>
    %19 = arith.addf %18, %8 : vector<8x384xf32>
    %20 = vector.extract_strided_slice %16 {offsets = [0, 0], sizes = [8, 128], strides = [1, 1]} : vector<8x384xf32> to vector<8x128xf32>
    %21 = vector.extract_strided_slice %19 {offsets = [0, 0], sizes = [8, 128], strides = [1, 1]} : vector<8x384xf32> to vector<8x128xf32>
    %22 = arith.addf %20, %21 : vector<8x128xf32>
    %23 = arith.negf %22 : vector<8x128xf32>
    %24 = math.exp %23 : vector<8x128xf32>
    %cst_12 = arith.constant 1.000000e+00 : f32
    %25 = vector.broadcast %cst_12 : f32 to vector<8x128xf32>
    %26 = arith.addf %25, %24 : vector<8x128xf32>
    %27 = arith.divf %25, %26 : vector<8x128xf32>
    %28 = vector.extract_strided_slice %16 {offsets = [0, 128], sizes = [8, 128], strides = [1, 1]} : vector<8x384xf32> to vector<8x128xf32>
    %29 = vector.extract_strided_slice %19 {offsets = [0, 128], sizes = [8, 128], strides = [1, 1]} : vector<8x384xf32> to vector<8x128xf32>
    %30 = arith.addf %28, %29 : vector<8x128xf32>
    %31 = arith.negf %30 : vector<8x128xf32>
    %32 = math.exp %31 : vector<8x128xf32>
    %cst_13 = arith.constant 1.000000e+00 : f32
    %33 = vector.broadcast %cst_13 : f32 to vector<8x128xf32>
    %34 = arith.addf %33, %32 : vector<8x128xf32>
    %35 = arith.divf %33, %34 : vector<8x128xf32>
    %36 = vector.extract_strided_slice %16 {offsets = [0, 256], sizes = [8, 128], strides = [1, 1]} : vector<8x384xf32> to vector<8x128xf32>
    %37 = vector.extract_strided_slice %19 {offsets = [0, 256], sizes = [8, 128], strides = [1, 1]} : vector<8x384xf32> to vector<8x128xf32>
    %38 = arith.mulf %27, %37 : vector<8x128xf32>
    %39 = arith.addf %36, %38 : vector<8x128xf32>
    %40 = math.tanh %39 : vector<8x128xf32>
    %cst_14 = arith.constant 1.000000e+00 : f32
    %41 = vector.broadcast %cst_14 : f32 to vector<8x128xf32>
    %42 = arith.subf %41, %35 : vector<8x128xf32>
    %43 = arith.mulf %42, %40 : vector<8x128xf32>
    %44 = arith.mulf %35, %9 : vector<8x128xf32>
    %45 = arith.addf %43, %44 : vector<8x128xf32>
    %46 = arith.truncf %45 : vector<8x128xf32> to vector<8x128xbf16>
    %c0_15 = arith.constant 0 : index
    %47 = arith.index_cast %13 : i32 to index
    %c0_16 = arith.constant 0 : index
    %c0_17 = arith.constant 0 : index
    %48 = vector.load %arg5[%c0_15, %47, %c0_16, %c0_17] : memref<1x8x8x128xbf16, #tpu.memory_space<vmem>>, vector<1x1x8x128xbf16>
    %49 = vector.shape_cast %48 : vector<1x1x8x128xbf16> to vector<8x128xbf16>
    %50 = vector.shape_cast %46 : vector<8x128xbf16> to vector<1x1x8x128xbf16>
    tpu.vector_store %arg5[%c0_15, %47, %c0_16, %c0_17], %50 {strides = array<i32>} : memref<1x8x8x128xbf16, #tpu.memory_space<vmem>>, vector<1x1x8x128xbf16>,
    %c1_i32 = arith.constant 1 : i32
    %c2_i32_18 = arith.constant 2 : i32
    %51 = arith.muli %c2_i32_18, %c1_i32 : i32
    %c7_i32_19 = arith.constant 7 : i32
    %52 = arith.subi %c7_i32_19, %51 : i32
    %53 = arith.muli %arg0, %52 : i32
    %54 = arith.addi %c1_i32, %53 : i32
    %c0_20 = arith.constant 0 : index
    %55 = arith.index_cast %54 : i32 to index
    %c0_21 = arith.constant 0 : index
    %c0_22 = arith.constant 0 : index
    %56 = vector.load %arg2[%c0_20, %55, %c0_21, %c0_22] : memref<1x8x8x384xf32, #tpu.memory_space<vmem>>, vector<1x1x8x384xf32>
    %57 = vector.shape_cast %56 : vector<1x1x8x384xf32> to vector<8x384xf32>
    %58 = arith.truncf %45 : vector<8x128xf32> to vector<8x128xbf16>
    %cst_23 = arith.constant dense<0.000000e+00> : vector<8x384xf32>
    %59 = tpu.matmul %58, %4, %cst_23 {dimension_numbers = #tpu.dot_dimension_numbers<[1], [0], [0], [1], [0, 0, 1, 1], [], []>} : vector<8x128xbf16>, vector<128x384xbf16>, vector<8x384xf32> -> vector<8x384xf32>
    %60 = arith.addf %59, %8 : vector<8x384xf32>
    %61 = vector.extract_strided_slice %57 {offsets = [0, 0], sizes = [8, 128], strides = [1, 1]} : vector<8x384xf32> to vector<8x128xf32>
    %62 = vector.extract_strided_slice %60 {offsets = [0, 0], sizes = [8, 128], strides = [1, 1]} : vector<8x384xf32> to vector<8x128xf32>
    %63 = arith.addf %61, %62 : vector<8x128xf32>
    %64 = arith.negf %63 : vector<8x128xf32>
    %65 = math.exp %64 : vector<8x128xf32>
    %cst_24 = arith.constant 1.000000e+00 : f32
    %66 = vector.broadcast %cst_24 : f32 to vector<8x128xf32>
    %67 = arith.addf %66, %65 : vector<8x128xf32>
    %68 = arith.divf %66, %67 : vector<8x128xf32>
    %69 = vector.extract_strided_slice %57 {offsets = [0, 128], sizes = [8, 128], strides = [1, 1]} : vector<8x384xf32> to vector<8x128xf32>
    %70 = vector.extract_strided_slice %60 {offsets = [0, 128], sizes = [8, 128], strides = [1, 1]} : vector<8x384xf32> to vector<8x128xf32>
    %71 = arith.addf %69, %70 : vector<8x128xf32>
    %72 = arith.negf %71 : vector<8x128xf32>
    %73 = math.exp %72 : vector<8x128xf32>
    %cst_25 = arith.constant 1.000000e+00 : f32
    %74 = vector.broadcast %cst_25 : f32 to vector<8x128xf32>
    %75 = arith.addf %74, %73 : vector<8x128xf32>
    %76 = arith.divf %74, %75 : vector<8x128xf32>
    %77 = vector.extract_strided_slice %57 {offsets = [0, 256], sizes = [8, 128], strides = [1, 1]} : vector<8x384xf32> to vector<8x128xf32>
    %78 = vector.extract_strided_slice %60 {offsets = [0, 256], sizes = [8, 128], strides = [1, 1]} : vector<8x384xf32> to vector<8x128xf32>
    %79 = arith.mulf %68, %78 : vector<8x128xf32>
    %80 = arith.addf %77, %79 : vector<8x128xf32>
    %81 = math.tanh %80 : vector<8x128xf32>
    %cst_26 = arith.constant 1.000000e+00 : f32
    %82 = vector.broadcast %cst_26 : f32 to vector<8x128xf32>
    %83 = arith.subf %82, %76 : vector<8x128xf32>
    %84 = arith.mulf %83, %81 : vector<8x128xf32>
    %85 = arith.mulf %76, %45 : vector<8x128xf32>
    %86 = arith.addf %84, %85 : vector<8x128xf32>
    %87 = arith.truncf %86 : vector<8x128xf32> to vector<8x128xbf16>
    %c0_27 = arith.constant 0 : index
    %88 = arith.index_cast %54 : i32 to index
    %c0_28 = arith.constant 0 : index
    %c0_29 = arith.constant 0 : index
    %89 = vector.load %arg5[%c0_27, %88, %c0_28, %c0_29] : memref<1x8x8x128xbf16, #tpu.memory_space<vmem>>, vector<1x1x8x128xbf16>
    %90 = vector.shape_cast %89 : vector<1x1x8x128xbf16> to vector<8x128xbf16>
    %91 = vector.shape_cast %87 : vector<8x128xbf16> to vector<1x1x8x128xbf16>
    tpu.vector_store %arg5[%c0_27, %88, %c0_28, %c0_29], %91 {strides = array<i32>} : memref<1x8x8x128xbf16, #tpu.memory_space<vmem>>, vector<1x1x8x128xbf16>,
    %c2_i32_30 = arith.constant 2 : i32
    %c2_i32_31 = arith.constant 2 : i32
    %92 = arith.muli %c2_i32_31, %c2_i32_30 : i32
    %c7_i32_32 = arith.constant 7 : i32
    %93 = arith.subi %c7_i32_32, %92 : i32
    %94 = arith.muli %arg0, %93 : i32
    %95 = arith.addi %c2_i32_30, %94 : i32
    %c0_33 = arith.constant 0 : index
    %96 = arith.index_cast %95 : i32 to index
    %c0_34 = arith.constant 0 : index
    %c0_35 = arith.constant 0 : index
    %97 = vector.load %arg2[%c0_33, %96, %c0_34, %c0_35] : memref<1x8x8x384xf32, #tpu.memory_space<vmem>>, vector<1x1x8x384xf32>
    %98 = vector.shape_cast %97 : vector<1x1x8x384xf32> to vector<8x384xf32>
    %99 = arith.truncf %86 : vector<8x128xf32> to vector<8x128xbf16>
    %cst_36 = arith.constant dense<0.000000e+00> : vector<8x384xf32>
    %100 = tpu.matmul %99, %4, %cst_36 {dimension_numbers = #tpu.dot_dimension_numbers<[1], [0], [0], [1], [0, 0, 1, 1], [], []>} : vector<8x128xbf16>, vector<128x384xbf16>, vector<8x384xf32> -> vector<8x384xf32>
    %101 = arith.addf %100, %8 : vector<8x384xf32>
    %102 = vector.extract_strided_slice %98 {offsets = [0, 0], sizes = [8, 128], strides = [1, 1]} : vector<8x384xf32> to vector<8x128xf32>
    %103 = vector.extract_strided_slice %101 {offsets = [0, 0], sizes = [8, 128], strides = [1, 1]} : vector<8x384xf32> to vector<8x128xf32>
    %104 = arith.addf %102, %103 : vector<8x128xf32>
    %105 = arith.negf %104 : vector<8x128xf32>
    %106 = math.exp %105 : vector<8x128xf32>
    %cst_37 = arith.constant 1.000000e+00 : f32
    %107 = vector.broadcast %cst_37 : f32 to vector<8x128xf32>
    %108 = arith.addf %107, %106 : vector<8x128xf32>
    %109 = arith.divf %107, %108 : vector<8x128xf32>
    %110 = vector.extract_strided_slice %98 {offsets = [0, 128], sizes = [8, 128], strides = [1, 1]} : vector<8x384xf32> to vector<8x128xf32>
    %111 = vector.extract_strided_slice %101 {offsets = [0, 128], sizes = [8, 128], strides = [1, 1]} : vector<8x384xf32> to vector<8x128xf32>
    %112 = arith.addf %110, %111 : vector<8x128xf32>
    %113 = arith.negf %112 : vector<8x128xf32>
    %114 = math.exp %113 : vector<8x128xf32>
    %cst_38 = arith.constant 1.000000e+00 : f32
    %115 = vector.broadcast %cst_38 : f32 to vector<8x128xf32>
    %116 = arith.addf %115, %114 : vector<8x128xf32>
    %117 = arith.divf %115, %116 : vector<8x128xf32>
    %118 = vector.extract_strided_slice %98 {offsets = [0, 256], sizes = [8, 128], strides = [1, 1]} : vector<8x384xf32> to vector<8x128xf32>
    %119 = vector.extract_strided_slice %101 {offsets = [0, 256], sizes = [8, 128], strides = [1, 1]} : vector<8x384xf32> to vector<8x128xf32>
    %120 = arith.mulf %109, %119 : vector<8x128xf32>
    %121 = arith.addf %118, %120 : vector<8x128xf32>
    %122 = math.tanh %121 : vector<8x128xf32>
    %cst_39 = arith.constant 1.000000e+00 : f32
    %123 = vector.broadcast %cst_39 : f32 to vector<8x128xf32>
    %124 = arith.subf %123, %117 : vector<8x128xf32>
    %125 = arith.mulf %124, %122 : vector<8x128xf32>
    %126 = arith.mulf %117, %86 : vector<8x128xf32>
    %127 = arith.addf %125, %126 : vector<8x128xf32>
    %128 = arith.truncf %127 : vector<8x128xf32> to vector<8x128xbf16>
    %c0_40 = arith.constant 0 : index
    %129 = arith.index_cast %95 : i32 to index
    %c0_41 = arith.constant 0 : index
    %c0_42 = arith.constant 0 : index
    %130 = vector.load %arg5[%c0_40, %129, %c0_41, %c0_42] : memref<1x8x8x128xbf16, #tpu.memory_space<vmem>>, vector<1x1x8x128xbf16>
    %131 = vector.shape_cast %130 : vector<1x1x8x128xbf16> to vector<8x128xbf16>
    %132 = vector.shape_cast %128 : vector<8x128xbf16> to vector<1x1x8x128xbf16>
    tpu.vector_store %arg5[%c0_40, %129, %c0_41, %c0_42], %132 {strides = array<i32>} : memref<1x8x8x128xbf16, #tpu.memory_space<vmem>>, vector<1x1x8x128xbf16>,
    %c3_i32 = arith.constant 3 : i32
    %c2_i32_43 = arith.constant 2 : i32
    %133 = arith.muli %c2_i32_43, %c3_i32 : i32
    %c7_i32_44 = arith.constant 7 : i32
    %134 = arith.subi %c7_i32_44, %133 : i32
    %135 = arith.muli %arg0, %134 : i32
    %136 = arith.addi %c3_i32, %135 : i32
    %c0_45 = arith.constant 0 : index
    %137 = arith.index_cast %136 : i32 to index
    %c0_46 = arith.constant 0 : index
    %c0_47 = arith.constant 0 : index
    %138 = vector.load %arg2[%c0_45, %137, %c0_46, %c0_47] : memref<1x8x8x384xf32, #tpu.memory_space<vmem>>, vector<1x1x8x384xf32>
    %139 = vector.shape_cast %138 : vector<1x1x8x384xf32> to vector<8x384xf32>
    %140 = arith.truncf %127 : vector<8x128xf32> to vector<8x128xbf16>
    %cst_48 = arith.constant dense<0.000000e+00> : vector<8x384xf32>
    %141 = tpu.matmul %140, %4, %cst_48 {dimension_numbers = #tpu.dot_dimension_numbers<[1], [0], [0], [1], [0, 0, 1, 1], [], []>} : vector<8x128xbf16>, vector<128x384xbf16>, vector<8x384xf32> -> vector<8x384xf32>
    %142 = arith.addf %141, %8 : vector<8x384xf32>
    %143 = vector.extract_strided_slice %139 {offsets = [0, 0], sizes = [8, 128], strides = [1, 1]} : vector<8x384xf32> to vector<8x128xf32>
    %144 = vector.extract_strided_slice %142 {offsets = [0, 0], sizes = [8, 128], strides = [1, 1]} : vector<8x384xf32> to vector<8x128xf32>
    %145 = arith.addf %143, %144 : vector<8x128xf32>
    %146 = arith.negf %145 : vector<8x128xf32>
    %147 = math.exp %146 : vector<8x128xf32>
    %cst_49 = arith.constant 1.000000e+00 : f32
    %148 = vector.broadcast %cst_49 : f32 to vector<8x128xf32>
    %149 = arith.addf %148, %147 : vector<8x128xf32>
    %150 = arith.divf %148, %149 : vector<8x128xf32>
    %151 = vector.extract_strided_slice %139 {offsets = [0, 128], sizes = [8, 128], strides = [1, 1]} : vector<8x384xf32> to vector<8x128xf32>
    %152 = vector.extract_strided_slice %142 {offsets = [0, 128], sizes = [8, 128], strides = [1, 1]} : vector<8x384xf32> to vector<8x128xf32>
    %153 = arith.addf %151, %152 : vector<8x128xf32>
    %154 = arith.negf %153 : vector<8x128xf32>
    %155 = math.exp %154 : vector<8x128xf32>
    %cst_50 = arith.constant 1.000000e+00 : f32
    %156 = vector.broadcast %cst_50 : f32 to vector<8x128xf32>
    %157 = arith.addf %156, %155 : vector<8x128xf32>
    %158 = arith.divf %156, %157 : vector<8x128xf32>
    %159 = vector.extract_strided_slice %139 {offsets = [0, 256], sizes = [8, 128], strides = [1, 1]} : vector<8x384xf32> to vector<8x128xf32>
    %160 = vector.extract_strided_slice %142 {offsets = [0, 256], sizes = [8, 128], strides = [1, 1]} : vector<8x384xf32> to vector<8x128xf32>
    %161 = arith.mulf %150, %160 : vector<8x128xf32>
    %162 = arith.addf %159, %161 : vector<8x128xf32>
    %163 = math.tanh %162 : vector<8x128xf32>
    %cst_51 = arith.constant 1.000000e+00 : f32
    %164 = vector.broadcast %cst_51 : f32 to vector<8x128xf32>
    %165 = arith.subf %164, %158 : vector<8x128xf32>
    %166 = arith.mulf %165, %163 : vector<8x128xf32>
    %167 = arith.mulf %158, %127 : vector<8x128xf32>
    %168 = arith.addf %166, %167 : vector<8x128xf32>
    %169 = arith.truncf %168 : vector<8x128xf32> to vector<8x128xbf16>
    %c0_52 = arith.constant 0 : index
    %170 = arith.index_cast %136 : i32 to index
    %c0_53 = arith.constant 0 : index
    %c0_54 = arith.constant 0 : index
    %171 = vector.load %arg5[%c0_52, %170, %c0_53, %c0_54] : memref<1x8x8x128xbf16, #tpu.memory_space<vmem>>, vector<1x1x8x128xbf16>
    %172 = vector.shape_cast %171 : vector<1x1x8x128xbf16> to vector<8x128xbf16>
    %173 = vector.shape_cast %169 : vector<8x128xbf16> to vector<1x1x8x128xbf16>
    tpu.vector_store %arg5[%c0_52, %170, %c0_53, %c0_54], %173 {strides = array<i32>} : memref<1x8x8x128xbf16, #tpu.memory_space<vmem>>, vector<1x1x8x128xbf16>,
    %c4_i32 = arith.constant 4 : i32
    %c2_i32_55 = arith.constant 2 : i32
    %174 = arith.muli %c2_i32_55, %c4_i32 : i32
    %c7_i32_56 = arith.constant 7 : i32
    %175 = arith.subi %c7_i32_56, %174 : i32
    %176 = arith.muli %arg0, %175 : i32
    %177 = arith.addi %c4_i32, %176 : i32
    %c0_57 = arith.constant 0 : index
    %178 = arith.index_cast %177 : i32 to index
    %c0_58 = arith.constant 0 : index
    %c0_59 = arith.constant 0 : index
    %179 = vector.load %arg2[%c0_57, %178, %c0_58, %c0_59] : memref<1x8x8x384xf32, #tpu.memory_space<vmem>>, vector<1x1x8x384xf32>
    %180 = vector.shape_cast %179 : vector<1x1x8x384xf32> to vector<8x384xf32>
    %181 = arith.truncf %168 : vector<8x128xf32> to vector<8x128xbf16>
    %cst_60 = arith.constant dense<0.000000e+00> : vector<8x384xf32>
    %182 = tpu.matmul %181, %4, %cst_60 {dimension_numbers = #tpu.dot_dimension_numbers<[1], [0], [0], [1], [0, 0, 1, 1], [], []>} : vector<8x128xbf16>, vector<128x384xbf16>, vector<8x384xf32> -> vector<8x384xf32>
    %183 = arith.addf %182, %8 : vector<8x384xf32>
    %184 = vector.extract_strided_slice %180 {offsets = [0, 0], sizes = [8, 128], strides = [1, 1]} : vector<8x384xf32> to vector<8x128xf32>
    %185 = vector.extract_strided_slice %183 {offsets = [0, 0], sizes = [8, 128], strides = [1, 1]} : vector<8x384xf32> to vector<8x128xf32>
    %186 = arith.addf %184, %185 : vector<8x128xf32>
    %187 = arith.negf %186 : vector<8x128xf32>
    %188 = math.exp %187 : vector<8x128xf32>
    %cst_61 = arith.constant 1.000000e+00 : f32
    %189 = vector.broadcast %cst_61 : f32 to vector<8x128xf32>
    %190 = arith.addf %189, %188 : vector<8x128xf32>
    %191 = arith.divf %189, %190 : vector<8x128xf32>
    %192 = vector.extract_strided_slice %180 {offsets = [0, 128], sizes = [8, 128], strides = [1, 1]} : vector<8x384xf32> to vector<8x128xf32>
    %193 = vector.extract_strided_slice %183 {offsets = [0, 128], sizes = [8, 128], strides = [1, 1]} : vector<8x384xf32> to vector<8x128xf32>
    %194 = arith.addf %192, %193 : vector<8x128xf32>
    %195 = arith.negf %194 : vector<8x128xf32>
    %196 = math.exp %195 : vector<8x128xf32>
    %cst_62 = arith.constant 1.000000e+00 : f32
    %197 = vector.broadcast %cst_62 : f32 to vector<8x128xf32>
    %198 = arith.addf %197, %196 : vector<8x128xf32>
    %199 = arith.divf %197, %198 : vector<8x128xf32>
    %200 = vector.extract_strided_slice %180 {offsets = [0, 256], sizes = [8, 128], strides = [1, 1]} : vector<8x384xf32> to vector<8x128xf32>
    %201 = vector.extract_strided_slice %183 {offsets = [0, 256], sizes = [8, 128], strides = [1, 1]} : vector<8x384xf32> to vector<8x128xf32>
    %202 = arith.mulf %191, %201 : vector<8x128xf32>
    %203 = arith.addf %200, %202 : vector<8x128xf32>
    %204 = math.tanh %203 : vector<8x128xf32>
    %cst_63 = arith.constant 1.000000e+00 : f32
    %205 = vector.broadcast %cst_63 : f32 to vector<8x128xf32>
    %206 = arith.subf %205, %199 : vector<8x128xf32>
    %207 = arith.mulf %206, %204 : vector<8x128xf32>
    %208 = arith.mulf %199, %168 : vector<8x128xf32>
    %209 = arith.addf %207, %208 : vector<8x128xf32>
    %210 = arith.truncf %209 : vector<8x128xf32> to vector<8x128xbf16>
    %c0_64 = arith.constant 0 : index
    %211 = arith.index_cast %177 : i32 to index
    %c0_65 = arith.constant 0 : index
    %c0_66 = arith.constant 0 : index
    %212 = vector.load %arg5[%c0_64, %211, %c0_65, %c0_66] : memref<1x8x8x128xbf16, #tpu.memory_space<vmem>>, vector<1x1x8x128xbf16>
    %213 = vector.shape_cast %212 : vector<1x1x8x128xbf16> to vector<8x128xbf16>
    %214 = vector.shape_cast %210 : vector<8x128xbf16> to vector<1x1x8x128xbf16>
    tpu.vector_store %arg5[%c0_64, %211, %c0_65, %c0_66], %214 {strides = array<i32>} : memref<1x8x8x128xbf16, #tpu.memory_space<vmem>>, vector<1x1x8x128xbf16>,
    %c5_i32 = arith.constant 5 : i32
    %c2_i32_67 = arith.constant 2 : i32
    %215 = arith.muli %c2_i32_67, %c5_i32 : i32
    %c7_i32_68 = arith.constant 7 : i32
    %216 = arith.subi %c7_i32_68, %215 : i32
    %217 = arith.muli %arg0, %216 : i32
    %218 = arith.addi %c5_i32, %217 : i32
    %c0_69 = arith.constant 0 : index
    %219 = arith.index_cast %218 : i32 to index
    %c0_70 = arith.constant 0 : index
    %c0_71 = arith.constant 0 : index
    %220 = vector.load %arg2[%c0_69, %219, %c0_70, %c0_71] : memref<1x8x8x384xf32, #tpu.memory_space<vmem>>, vector<1x1x8x384xf32>
    %221 = vector.shape_cast %220 : vector<1x1x8x384xf32> to vector<8x384xf32>
    %222 = arith.truncf %209 : vector<8x128xf32> to vector<8x128xbf16>
    %cst_72 = arith.constant dense<0.000000e+00> : vector<8x384xf32>
    %223 = tpu.matmul %222, %4, %cst_72 {dimension_numbers = #tpu.dot_dimension_numbers<[1], [0], [0], [1], [0, 0, 1, 1], [], []>} : vector<8x128xbf16>, vector<128x384xbf16>, vector<8x384xf32> -> vector<8x384xf32>
    %224 = arith.addf %223, %8 : vector<8x384xf32>
    %225 = vector.extract_strided_slice %221 {offsets = [0, 0], sizes = [8, 128], strides = [1, 1]} : vector<8x384xf32> to vector<8x128xf32>
    %226 = vector.extract_strided_slice %224 {offsets = [0, 0], sizes = [8, 128], strides = [1, 1]} : vector<8x384xf32> to vector<8x128xf32>
    %227 = arith.addf %225, %226 : vector<8x128xf32>
    %228 = arith.negf %227 : vector<8x128xf32>
    %229 = math.exp %228 : vector<8x128xf32>
    %cst_73 = arith.constant 1.000000e+00 : f32
    %230 = vector.broadcast %cst_73 : f32 to vector<8x128xf32>
    %231 = arith.addf %230, %229 : vector<8x128xf32>
    %232 = arith.divf %230, %231 : vector<8x128xf32>
    %233 = vector.extract_strided_slice %221 {offsets = [0, 128], sizes = [8, 128], strides = [1, 1]} : vector<8x384xf32> to vector<8x128xf32>
    %234 = vector.extract_strided_slice %224 {offsets = [0, 128], sizes = [8, 128], strides = [1, 1]} : vector<8x384xf32> to vector<8x128xf32>
    %235 = arith.addf %233, %234 : vector<8x128xf32>
    %236 = arith.negf %235 : vector<8x128xf32>
    %237 = math.exp %236 : vector<8x128xf32>
    %cst_74 = arith.constant 1.000000e+00 : f32
    %238 = vector.broadcast %cst_74 : f32 to vector<8x128xf32>
    %239 = arith.addf %238, %237 : vector<8x128xf32>
    %240 = arith.divf %238, %239 : vector<8x128xf32>
    %241 = vector.extract_strided_slice %221 {offsets = [0, 256], sizes = [8, 128], strides = [1, 1]} : vector<8x384xf32> to vector<8x128xf32>
    %242 = vector.extract_strided_slice %224 {offsets = [0, 256], sizes = [8, 128], strides = [1, 1]} : vector<8x384xf32> to vector<8x128xf32>
    %243 = arith.mulf %232, %242 : vector<8x128xf32>
    %244 = arith.addf %241, %243 : vector<8x128xf32>
    %245 = math.tanh %244 : vector<8x128xf32>
    %cst_75 = arith.constant 1.000000e+00 : f32
    %246 = vector.broadcast %cst_75 : f32 to vector<8x128xf32>
    %247 = arith.subf %246, %240 : vector<8x128xf32>
    %248 = arith.mulf %247, %245 : vector<8x128xf32>
    %249 = arith.mulf %240, %209 : vector<8x128xf32>
    %250 = arith.addf %248, %249 : vector<8x128xf32>
    %251 = arith.truncf %250 : vector<8x128xf32> to vector<8x128xbf16>
    %c0_76 = arith.constant 0 : index
    %252 = arith.index_cast %218 : i32 to index
    %c0_77 = arith.constant 0 : index
    %c0_78 = arith.constant 0 : index
    %253 = vector.load %arg5[%c0_76, %252, %c0_77, %c0_78] : memref<1x8x8x128xbf16, #tpu.memory_space<vmem>>, vector<1x1x8x128xbf16>
    %254 = vector.shape_cast %253 : vector<1x1x8x128xbf16> to vector<8x128xbf16>
    %255 = vector.shape_cast %251 : vector<8x128xbf16> to vector<1x1x8x128xbf16>
    tpu.vector_store %arg5[%c0_76, %252, %c0_77, %c0_78], %255 {strides = array<i32>} : memref<1x8x8x128xbf16, #tpu.memory_space<vmem>>, vector<1x1x8x128xbf16>,
    %c6_i32 = arith.constant 6 : i32
    %c2_i32_79 = arith.constant 2 : i32
    %256 = arith.muli %c2_i32_79, %c6_i32 : i32
    %c7_i32_80 = arith.constant 7 : i32
    %257 = arith.subi %c7_i32_80, %256 : i32
    %258 = arith.muli %arg0, %257 : i32
    %259 = arith.addi %c6_i32, %258 : i32
    %c0_81 = arith.constant 0 : index
    %260 = arith.index_cast %259 : i32 to index
    %c0_82 = arith.constant 0 : index
    %c0_83 = arith.constant 0 : index
    %261 = vector.load %arg2[%c0_81, %260, %c0_82, %c0_83] : memref<1x8x8x384xf32, #tpu.memory_space<vmem>>, vector<1x1x8x384xf32>
    %262 = vector.shape_cast %261 : vector<1x1x8x384xf32> to vector<8x384xf32>
    %263 = arith.truncf %250 : vector<8x128xf32> to vector<8x128xbf16>
    %cst_84 = arith.constant dense<0.000000e+00> : vector<8x384xf32>
    %264 = tpu.matmul %263, %4, %cst_84 {dimension_numbers = #tpu.dot_dimension_numbers<[1], [0], [0], [1], [0, 0, 1, 1], [], []>} : vector<8x128xbf16>, vector<128x384xbf16>, vector<8x384xf32> -> vector<8x384xf32>
    %265 = arith.addf %264, %8 : vector<8x384xf32>
    %266 = vector.extract_strided_slice %262 {offsets = [0, 0], sizes = [8, 128], strides = [1, 1]} : vector<8x384xf32> to vector<8x128xf32>
    %267 = vector.extract_strided_slice %265 {offsets = [0, 0], sizes = [8, 128], strides = [1, 1]} : vector<8x384xf32> to vector<8x128xf32>
    %268 = arith.addf %266, %267 : vector<8x128xf32>
    %269 = arith.negf %268 : vector<8x128xf32>
    %270 = math.exp %269 : vector<8x128xf32>
    %cst_85 = arith.constant 1.000000e+00 : f32
    %271 = vector.broadcast %cst_85 : f32 to vector<8x128xf32>
    %272 = arith.addf %271, %270 : vector<8x128xf32>
    %273 = arith.divf %271, %272 : vector<8x128xf32>
    %274 = vector.extract_strided_slice %262 {offsets = [0, 128], sizes = [8, 128], strides = [1, 1]} : vector<8x384xf32> to vector<8x128xf32>
    %275 = vector.extract_strided_slice %265 {offsets = [0, 128], sizes = [8, 128], strides = [1, 1]} : vector<8x384xf32> to vector<8x128xf32>
    %276 = arith.addf %274, %275 : vector<8x128xf32>
    %277 = arith.negf %276 : vector<8x128xf32>
    %278 = math.exp %277 : vector<8x128xf32>
    %cst_86 = arith.constant 1.000000e+00 : f32
    %279 = vector.broadcast %cst_86 : f32 to vector<8x128xf32>
    %280 = arith.addf %279, %278 : vector<8x128xf32>
    %281 = arith.divf %279, %280 : vector<8x128xf32>
    %282 = vector.extract_strided_slice %262 {offsets = [0, 256], sizes = [8, 128], strides = [1, 1]} : vector<8x384xf32> to vector<8x128xf32>
    %283 = vector.extract_strided_slice %265 {offsets = [0, 256], sizes = [8, 128], strides = [1, 1]} : vector<8x384xf32> to vector<8x128xf32>
    %284 = arith.mulf %273, %283 : vector<8x128xf32>
    %285 = arith.addf %282, %284 : vector<8x128xf32>
    %286 = math.tanh %285 : vector<8x128xf32>
    %cst_87 = arith.constant 1.000000e+00 : f32
    %287 = vector.broadcast %cst_87 : f32 to vector<8x128xf32>
    %288 = arith.subf %287, %281 : vector<8x128xf32>
    %289 = arith.mulf %288, %286 : vector<8x128xf32>
    %290 = arith.mulf %281, %250 : vector<8x128xf32>
    %291 = arith.addf %289, %290 : vector<8x128xf32>
    %292 = arith.truncf %291 : vector<8x128xf32> to vector<8x128xbf16>
    %c0_88 = arith.constant 0 : index
    %293 = arith.index_cast %259 : i32 to index
    %c0_89 = arith.constant 0 : index
    %c0_90 = arith.constant 0 : index
    %294 = vector.load %arg5[%c0_88, %293, %c0_89, %c0_90] : memref<1x8x8x128xbf16, #tpu.memory_space<vmem>>, vector<1x1x8x128xbf16>
    %295 = vector.shape_cast %294 : vector<1x1x8x128xbf16> to vector<8x128xbf16>
    %296 = vector.shape_cast %292 : vector<8x128xbf16> to vector<1x1x8x128xbf16>
    tpu.vector_store %arg5[%c0_88, %293, %c0_89, %c0_90], %296 {strides = array<i32>} : memref<1x8x8x128xbf16, #tpu.memory_space<vmem>>, vector<1x1x8x128xbf16>,
    %c7_i32_91 = arith.constant 7 : i32
    %c2_i32_92 = arith.constant 2 : i32
    %297 = arith.muli %c2_i32_92, %c7_i32_91 : i32
    %c7_i32_93 = arith.constant 7 : i32
    %298 = arith.subi %c7_i32_93, %297 : i32
    %299 = arith.muli %arg0, %298 : i32
    %300 = arith.addi %c7_i32_91, %299 : i32
    %c0_94 = arith.constant 0 : index
    %301 = arith.index_cast %300 : i32 to index
    %c0_95 = arith.constant 0 : index
    %c0_96 = arith.constant 0 : index
    %302 = vector.load %arg2[%c0_94, %301, %c0_95, %c0_96] : memref<1x8x8x384xf32, #tpu.memory_space<vmem>>, vector<1x1x8x384xf32>
    %303 = vector.shape_cast %302 : vector<1x1x8x384xf32> to vector<8x384xf32>
    %304 = arith.truncf %291 : vector<8x128xf32> to vector<8x128xbf16>
    %cst_97 = arith.constant dense<0.000000e+00> : vector<8x384xf32>
    %305 = tpu.matmul %304, %4, %cst_97 {dimension_numbers = #tpu.dot_dimension_numbers<[1], [0], [0], [1], [0, 0, 1, 1], [], []>} : vector<8x128xbf16>, vector<128x384xbf16>, vector<8x384xf32> -> vector<8x384xf32>
    %306 = arith.addf %305, %8 : vector<8x384xf32>
    %307 = vector.extract_strided_slice %303 {offsets = [0, 0], sizes = [8, 128], strides = [1, 1]} : vector<8x384xf32> to vector<8x128xf32>
    %308 = vector.extract_strided_slice %306 {offsets = [0, 0], sizes = [8, 128], strides = [1, 1]} : vector<8x384xf32> to vector<8x128xf32>
    %309 = arith.addf %307, %308 : vector<8x128xf32>
    %310 = arith.negf %309 : vector<8x128xf32>
    %311 = math.exp %310 : vector<8x128xf32>
    %cst_98 = arith.constant 1.000000e+00 : f32
    %312 = vector.broadcast %cst_98 : f32 to vector<8x128xf32>
    %313 = arith.addf %312, %311 : vector<8x128xf32>
    %314 = arith.divf %312, %313 : vector<8x128xf32>
    %315 = vector.extract_strided_slice %303 {offsets = [0, 128], sizes = [8, 128], strides = [1, 1]} : vector<8x384xf32> to vector<8x128xf32>
    %316 = vector.extract_strided_slice %306 {offsets = [0, 128], sizes = [8, 128], strides = [1, 1]} : vector<8x384xf32> to vector<8x128xf32>
    %317 = arith.addf %315, %316 : vector<8x128xf32>
    %318 = arith.negf %317 : vector<8x128xf32>
    %319 = math.exp %318 : vector<8x128xf32>
    %cst_99 = arith.constant 1.000000e+00 : f32
    %320 = vector.broadcast %cst_99 : f32 to vector<8x128xf32>
    %321 = arith.addf %320, %319 : vector<8x128xf32>
    %322 = arith.divf %320, %321 : vector<8x128xf32>
    %323 = vector.extract_strided_slice %303 {offsets = [0, 256], sizes = [8, 128], strides = [1, 1]} : vector<8x384xf32> to vector<8x128xf32>
    %324 = vector.extract_strided_slice %306 {offsets = [0, 256], sizes = [8, 128], strides = [1, 1]} : vector<8x384xf32> to vector<8x128xf32>
    %325 = arith.mulf %314, %324 : vector<8x128xf32>
    %326 = arith.addf %323, %325 : vector<8x128xf32>
    %327 = math.tanh %326 : vector<8x128xf32>
    %cst_100 = arith.constant 1.000000e+00 : f32
    %328 = vector.broadcast %cst_100 : f32 to vector<8x128xf32>
    %329 = arith.subf %328, %322 : vector<8x128xf32>
    %330 = arith.mulf %329, %327 : vector<8x128xf32>
    %331 = arith.mulf %322, %291 : vector<8x128xf32>
    %332 = arith.addf %330, %331 : vector<8x128xf32>
    %333 = arith.truncf %332 : vector<8x128xf32> to vector<8x128xbf16>
    %c0_101 = arith.constant 0 : index
    %334 = arith.index_cast %300 : i32 to index
    %c0_102 = arith.constant 0 : index
    %c0_103 = arith.constant 0 : index
    %335 = vector.load %arg5[%c0_101, %334, %c0_102, %c0_103] : memref<1x8x8x128xbf16, #tpu.memory_space<vmem>>, vector<1x1x8x128xbf16>
    %336 = vector.shape_cast %335 : vector<1x1x8x128xbf16> to vector<8x128xbf16>
    %337 = vector.shape_cast %333 : vector<8x128xbf16> to vector<1x1x8x128xbf16>
    tpu.vector_store %arg5[%c0_101, %334, %c0_102, %c0_103], %337 {strides = array<i32>} : memref<1x8x8x128xbf16, #tpu.memory_space<vmem>>, vector<1x1x8x128xbf16>,
    %c8_i32 = arith.constant 8 : i32
    %c0_104 = arith.constant 0 : index
    %c0_105 = arith.constant 0 : index
    %338 = vector.load %arg7[%c0_104, %c0_105] : memref<8x128xf32, #tpu.memory_space<vmem>>, vector<8x128xf32>
    tpu.vector_store %arg7[%c0_104, %c0_105], %332 {strides = array<i32>} : memref<8x128xf32, #tpu.memory_space<vmem>>, vector<8x128xf32>,
    %c1_i32_106 = arith.constant 1 : i32
    %339 = arith.cmpi eq, %arg1, %c1_i32_106 : i32
    %340 = arith.extui %339 : i1 to i32
    %c0_i32_107 = arith.constant 0 : i32
    %341 = arith.cmpi ne, %340, %c0_i32_107 : i32
    scf.if %341 {
      %c0_108 = arith.constant 0 : index
      %c0_109 = arith.constant 0 : index
      %c0_110 = arith.constant 0 : index
      %342 = vector.load %arg6[%c0_108, %c0_109, %c0_110] : memref<1x8x128xf32, #tpu.memory_space<vmem>>, vector<1x8x128xf32>
      %343 = vector.shape_cast %342 : vector<1x8x128xf32> to vector<8x128xf32>
      %344 = vector.shape_cast %332 : vector<8x128xf32> to vector<1x8x128xf32>
      tpu.vector_store %arg6[%c0_108, %c0_109, %c0_110], %344 {strides = array<i32>} : memref<1x8x128xf32, #tpu.memory_space<vmem>>, vector<1x8x128xf32>,
    } else {
    }
    return
  }
  func.func @transform_0(%arg0: i32, %arg1: i32) -> (i32, i32, i32, i32) {
    %c2_i32 = arith.constant 2 : i32
    %0 = arith.muli %c2_i32, %arg1 : i32
    %c1_i32 = arith.constant 1 : i32
    %1 = arith.subi %c1_i32, %0 : i32
    %2 = arith.muli %arg0, %1 : i32
    %3 = arith.addi %arg1, %2 : i32
    %c0_i32 = arith.constant 0 : i32
    %c0_i32_0 = arith.constant 0 : i32
    %c0_i32_1 = arith.constant 0 : i32
    return %arg0, %3, %c0_i32, %c0_i32_0 : i32, i32, i32, i32
  }
  func.func @transform_1(%arg0: i32, %arg1: i32) -> (i32, i32, i32) {
    %c0_i32 = arith.constant 0 : i32
    %c0_i32_0 = arith.constant 0 : i32
    %c0_i32_1 = arith.constant 0 : i32
    return %arg0, %c0_i32, %c0_i32_0 : i32, i32, i32
  }
  func.func @transform_2(%arg0: i32, %arg1: i32) -> (i32, i32, i32) {
    %c0_i32 = arith.constant 0 : i32
    %c0_i32_0 = arith.constant 0 : i32
    %c0_i32_1 = arith.constant 0 : i32
    return %arg0, %c0_i32, %c0_i32_0 : i32, i32, i32
  }
  func.func @transform_3(%arg0: i32, %arg1: i32) -> (i32, i32, i32, i32) {
    %c2_i32 = arith.constant 2 : i32
    %0 = arith.muli %c2_i32, %arg1 : i32
    %c1_i32 = arith.constant 1 : i32
    %1 = arith.subi %c1_i32, %0 : i32
    %2 = arith.muli %arg0, %1 : i32
    %3 = arith.addi %arg1, %2 : i32
    %c0_i32 = arith.constant 0 : i32
    %c0_i32_0 = arith.constant 0 : i32
    %c0_i32_1 = arith.constant 0 : i32
    return %arg0, %3, %c0_i32, %c0_i32_0 : i32, i32, i32, i32
  }
  func.func @transform_4(%arg0: i32, %arg1: i32) -> (i32, i32, i32) {
    %c0_i32 = arith.constant 0 : i32
    %c0_i32_0 = arith.constant 0 : i32
    %c0_i32_1 = arith.constant 0 : i32
    return %arg0, %c0_i32, %c0_i32_0 : i32, i32, i32
  }
}

</mosaic_0001>

<bundles_post_ra>
// kernel: _lambda_.4
= control target key start
LH: loop header
LB: loop body
LE: loop exit
PB: predicated region body
PF: predicated region fallthrough
CT: control target
= control target key end

     0   :  { %s925_s12 = smov 0   ;;  %s1112_s0 = inlined_call_operand.vmem [shape: bf16[1,128,128], index: 0, kind: input, shape index: {}]   ;;  %s1113_s1 = inlined_call_operand.vmem [shape: bf16[2,1,128,384], index: 1, kind: input, shape index: {}]   ;;  %s1114_s2 = inlined_call_operand.vmem [shape: f32[2,1,384], index: 2, kind: input, shape index: {}]   ;;  %s1115_s3 = inlined_call_operand.vmem [shape: f32[2,128,384], index: 3, kind: output, shape index: {}]  }
   0x1 LB: > { %s755_s13 = sadd.s32 4294967295, %s902_s12   ;;  %p759_p0 = scmp.ge.s32.totalorder %s902_s12, 1  ;;  %s902_s12 = sphi %s925_s12, %s13_s12  }
   0x2   : > { %p146_p1 = scmp.lt.s32.totalorder %s902_s12, 3 }
   0x4   : > { %p147_p2 = pnand %p759_p0, %p146_p1 }
   0x5   : > { %p174_p3 = scmp.lt.s32.totalorder (!%p147_p2), %s755_s13, 1  ;;  %v904_v0 = vmov (!%p147_p2), 0   ;;  %v881_v1 = vld [vmem:[%s1112_s0] sm:$0xff] (!%p147_p2)   ;;  %v884_v26 = vld [vmem:[%s1112_s0 + $0x8] sm:$0xff] (!%p147_p2)   ;;  %v887_v27 = vld [vmem:[%s1112_s0 + $0x10] sm:$0xff] (!%p147_p2)   ;;  %v239_v33 = vlaneseq (!%p147_p2) }
   0x6   : > { %150 = sbr.rel (%p147_p2) target bundleno = 324 (0x144), region = 32  ;;  %462 = vmatprep.mubr.bf16.mxu0 (!%p147_p2), %v904_v0  ;;  %828 = vmatprep.mubr.bf16.mxu1 (!%p147_p2), %v881_v1  ;;  %v890_v28 = vld [vmem:[%s1112_s0 + $0x18] sm:$0xff] (!%p147_p2)   ;;  %v892_v29 = vld [vmem:[%s1112_s0 + $0x20] sm:$0xff] (!%p147_p2)   ;;  %v893_v30 = vld [vmem:[%s1112_s0 + $0x28] sm:$0xff] (!%p147_p2)  }
   0x7   : > { %v894_v31 = vld [vmem:[%s1112_s0 + $0x30] sm:$0xff] (!%p147_p2)   ;;  %v895_v32 = vld [vmem:[%s1112_s0 + $0x38] sm:$0xff] (!%p147_p2)   ;;  %v240_v34 = vshrl.u32 (!%p147_p2), %v239_v33, 7 }
   0x9   : > { %v241_v35 = vsub.s32 (!%p147_p2), 0, %v240_v34  ;;  %v245_v37 = vsub.s32 (!%p147_p2), 1, %v240_v34  ;;  %v249_v48 = vsub.s32 (!%p147_p2), 2, %v240_v34 }
   0xd   : > { %s1117_s13 = smov (!%p174_p3, %s755_s13), 1 }
   0xe   : > { %s844_s16 = smul.u32 192, %s1117_s13 }
   0xf   : > { %s845_s7 = smul.u32 3, %s1117_s13 }
  0x10   : > { %s943_s19 = scalar_lea.vmem %s1113_s1, %s844_s16  ;;  %s846_s11 = smul.u32 384, %s1117_s13 }
  0x11   : > { %v856_v2 = vld [vmem:[%s943_s19 + $0x4] ss:$12 sps:$4 sm:$0xff]   ;;  %v858_v3 = vld [vmem:[%s943_s19] ss:$12 sps:$4 sm:$0xff]   ;;  %v859_v4 = vld [vmem:[%s943_s19 + $0x1c] ss:$12 sps:$4 sm:$0xff]   ;;  %s182_s10 = scalar_lea.vmem %s1114_s2, %s845_s7 }
  0x12   : > { %430 = vmatprep.subr.bf16.mxu0 %v856_v2  ;;  %v861_v5 = vld [vmem:[%s943_s19 + $0x18] ss:$12 sps:$4 sm:$0xff]   ;;  %v862_v6 = vld [vmem:[%s943_s19 + $0x34] ss:$12 sps:$4 sm:$0xff]   ;;  %v864_v7 = vld [vmem:[%s943_s19 + $0x30] ss:$12 sps:$4 sm:$0xff]   ;;  %s1009_s16 = scalar_lea.vmem %s1115_s3, %s846_s11 }
  0x13   : > { %431 = vmatpush1.bf16.msra.mxu0 %v858_v3  ;;  %v865_v8 = vld [vmem:[%s943_s19 + $0x4c] ss:$12 sps:$4 sm:$0xff]   ;;  %v867_v9 = vld [vmem:[%s943_s19 + $0x48] ss:$12 sps:$4 sm:$0xff]   ;;  %v868_v10 = vld [vmem:[%s943_s19 + $0x64] ss:$12 sps:$4 sm:$0xff]  }
  0x14   : > { %432 = vmatprep.subr.bf16.mxu0 %v859_v4  ;;  %v880_v11 = vld [vmem:[%s943_s19 + $0x8] ss:$12 sps:$4 sm:$0xff]   ;;  %v882_v12 = vld [vmem:[%s943_s19 + $0x20] ss:$12 sps:$4 sm:$0xff]   ;;  %v883_v14 = vld [vmem:[%s943_s19 + $0x38] ss:$12 sps:$4 sm:$0xff]  }
  0x15   : > { %812 = vmatprep.subr.bf16.mxu1 %v880_v11  ;;  %v870_v13 = vld [vmem:[%s943_s19 + $0x60] ss:$12 sps:$4 sm:$0xff]   ;;  %v871_v15 = vld [vmem:[%s943_s19 + $0x7c] ss:$12 sps:$4 sm:$0xff]   ;;  %v873_v16 = vld [vmem:[%s943_s19 + $0x78] ss:$12 sps:$4 sm:$0xff]  }
  0x16   : > { %813 = vmatpush3.bf16.msra.mxu1 %v880_v11  ;;  %v885_v17 = vld [vmem:[%s943_s19 + $0x50] ss:$12 sps:$4 sm:$0xff]   ;;  %v874_v18 = vld [vmem:[%s943_s19 + $0x94] ss:$12 sps:$4 sm:$0xff]   ;;  %v877_v21 = vld [vmem:[%s943_s19 + $0xac] ss:$12 sps:$4 sm:$0xff]  }
  0x17   : > { %433 = vmatpush1.bf16.msra.mxu0 %v861_v5  ;;  %814 = vmatprep.subr.bf16.mxu1 %v882_v12  ;;  %v876_v19 = vld [vmem:[%s943_s19 + $0x90] ss:$12 sps:$4 sm:$0xff]   ;;  %v886_v20 = vld [vmem:[%s943_s19 + $0x68] ss:$12 sps:$4 sm:$0xff]   ;;  %v888_v23 = vld [vmem:[%s943_s19 + $0x80] ss:$12 sps:$4 sm:$0xff]  }
  0x18   : > { %434 = vmatprep.subr.bf16.mxu0 %v862_v6  ;;  %v879_v22 = vld [vmem:[%s943_s19 + $0xa8] ss:$12 sps:$4 sm:$0xff]   ;;  %v889_v24 = vld [vmem:[%s943_s19 + $0x98] ss:$12 sps:$4 sm:$0xff]   ;;  %v891_v25 = vld [vmem:[%s943_s19 + $0xb0] ss:$12 sps:$4 sm:$0xff]  }
  0x19   : > { %v237_v36 = vld [vmem:[%s182_s10] sm:$0x7] }
  0x1a   : > { %815 = vmatpush3.bf16.msra.mxu1 %v882_v12  ;;  %v1002_v38 = vrot.slane %v237_v36, %v241_v35  ;;  %v1004_v39 = vrot.slane %v237_v36, %v245_v37  ;;  %v1019_v50 = vrot.slane %v237_v36, %v249_v48 }
  0x1b   : > { %435 = vmatpush1.bf16.msra.mxu0 %v864_v7  ;;  %816 = vmatprep.subr.bf16.mxu1 %v883_v14 }
  0x1c   : > { %436 = vmatprep.subr.bf16.mxu0 %v865_v8 }
  0x1e   : > { %817 = vmatpush3.bf16.msra.mxu1 %v883_v14 }
  0x1f   : > { %437 = vmatpush1.bf16.msra.mxu0 %v867_v9  ;;  %818 = vmatprep.subr.bf16.mxu1 %v885_v17 }
  0x20   : > { %438 = vmatprep.subr.bf16.mxu0 %v868_v10 }
  0x22   : > { %819 = vmatpush3.bf16.msra.mxu1 %v885_v17 }
  0x23   : > { %439 = vmatpush1.bf16.msra.mxu0 %v870_v13  ;;  %820 = vmatprep.subr.bf16.mxu1 %v886_v20 }
  0x24   : > { %440 = vmatprep.subr.bf16.mxu0 %v871_v15 }
  0x26   : > { %821 = vmatpush3.bf16.msra.mxu1 %v886_v20 }
  0x27   : > { %441 = vmatpush1.bf16.msra.mxu0 %v873_v16  ;;  %822 = vmatprep.subr.bf16.mxu1 %v888_v23 }
  0x28   : > { %442 = vmatprep.subr.bf16.mxu0 %v874_v18 }
  0x2a   : > { %823 = vmatpush3.bf16.msra.mxu1 %v888_v23 }
  0x2b   : > { %443 = vmatpush1.bf16.msra.mxu0 %v876_v19  ;;  %824 = vmatprep.subr.bf16.mxu1 %v889_v24 }
  0x2c   : > { %444 = vmatprep.subr.bf16.mxu0 %v877_v21 }
  0x2e   : > { %825 = vmatpush3.bf16.msra.mxu1 %v889_v24 }
  0x2f   : > { %445 = vmatpush1.bf16.msra.mxu0 %v879_v22  ;;  %826 = vmatprep.subr.bf16.mxu1 %v891_v25 }
  0x32   : > { %463 = vmatmul.mubr.bf16.vlgmr.msra.gmra.mrb[0].mxu0 %v881_v1  ;;  %827 = vmatpush3.bf16.msra.mxu1 %v891_v25 }
  0x33   : > { %472 = vmatprep.mubr.bf16.mxu0 %v904_v0 }
  0x35   : > { %829 = vmatmul.mubr.bf16.vlgmr.msra.gmra.mrb[0].mxu1 %v884_v26 }
  0x36   : > { %832 = vmatprep.mubr.bf16.mxu1 %v887_v27 }
  0x3a   : > { %473 = vmatmul.mubr.bf16.gmra.mrb[4].mxu0 %v884_v26 }
  0x3b   : > { %482 = vmatprep.mubr.bf16.mxu0 %v904_v0 }
  0x3d   : > { %833 = vmatmul.mubr.bf16.gmra.mrb[4].mxu1 %v890_v28 }
  0x3e   : > { %836 = vmatprep.mubr.bf16.mxu1 %v892_v29 }
  0x42   : > { %483 = vmatmul.mubr.bf16.gmra.mrb[8].mxu0 %v887_v27 }
  0x43   : > { %492 = vmatprep.mubr.bf16.mxu0 %v904_v0 }
  0x45   : > { %837 = vmatmul.mubr.bf16.gmra.mrb[8].mxu1 %v893_v30 }
  0x46   : > { %840 = vmatprep.mubr.bf16.mxu1 %v894_v31 }
  0x4a   : > { %493 = vmatmul.mubr.bf16.gmra.mrb[12].mxu0 %v890_v28 }
  0x4b   : > { %502 = vmatprep.mubr.bf16.mxu0 %v904_v0 }
  0x4d   : > { %841 = vmatmul.mubr.bf16.gmra.mrb[12].mxu1 %v895_v32 }
  0x52   : > { %503 = vmatmul.mubr.bf16.gmra.mrb[16].mxu0 %v892_v29 }
  0x53   : > { %512 = vmatprep.mubr.bf16.mxu0 %v904_v0 }
  0x5a   : > { %513 = vmatmul.mubr.bf16.gmra.mrb[20].mxu0 %v893_v30 }
  0x5b   : > { %522 = vmatprep.mubr.bf16.mxu0 %v904_v0 }
  0x62   : > { %523 = vmatmul.mubr.bf16.gmra.mrb[24].mxu0 %v894_v31 }
  0x63   : > { %532 = vmatprep.mubr.bf16.mxu0 %v904_v0 }
  0x6a   : > { %533 = vmatmul.mubr.bf16.gmra.mrb[28].mxu0 %v895_v32 }
 0x105   : > { %v464_v40 = vpop.f32.mrb[0].mxu0 }
 0x106   : > { %v465_v41 = vadd.f32 %v464_v40, %v1002_v38  ;;  %v466_v42 = vpop.f32.mrb[1].mxu0 }
 0x107   : > { %v467_v43 = vadd.f32 %v466_v42, %v1004_v39  ;;  %v468_v44 = vpop.f32.mrb[2].mxu0 }
 0x108   : > { %640 = vst [vmem:[%s1009_s16] sm:$0xff] %v465_v41  ;;  %v469_v45 = vadd.f32 %v468_v44, %v1002_v38  ;;  %v470_v46 = vpop.f32.mrb[3].mxu0  ;;  %v830_v57 = vpop.f32.mrb[0].mxu1 }
 0x109   : > { %641 = vst [vmem:[%s1009_s16 + $0x8] sm:$0xff] %v467_v43  ;;  %v471_v47 = vadd.f32 %v470_v46, %v1004_v39  ;;  %v586_v59 = vadd.f32 %v830_v57, %v1019_v50  ;;  %v577_v60 = vpop.f32.mrb[1].mxu1 }
 0x10a   : > { %643 = vst [vmem:[%s1009_s16 + $0x18] sm:$0xff] %v469_v45  ;;  %v578_v61 = vadd.f32 %v577_v60, %v1019_v50  ;;  %v831_v62 = vpop.f32.mrb[2].mxu1 }
 0x10b   : > { %644 = vst [vmem:[%s1009_s16 + $0x20] sm:$0xff] %v471_v47  ;;  %648 = vst [vmem:[%s1009_s16 + $0x40] sm:$0xff] %v586_v59  ;;  %v589_v63 = vadd.f32 %v831_v62, %v1019_v50  ;;  %v580_v0 = vpop.f32.mrb[3].mxu1 }
 0x10c   : > { %642 = vst [vmem:[%s1009_s16 + $0x10] sm:$0xff] %v578_v61  ;;  %v581_v1 = vadd.f32 %v580_v0, %v1019_v50 }
 0x10d   : > { %v474_v49 = vpop.f32.mrb[4].mxu0  ;;  %651 = vst [vmem:[%s1009_s16 + $0x58] sm:$0xff] %v589_v63 }
 0x10e   : > { %v475_v51 = vadd.f32 %v474_v49, %v1002_v38  ;;  %v476_v52 = vpop.f32.mrb[5].mxu0  ;;  %645 = vst [vmem:[%s1009_s16 + $0x28] sm:$0xff] %v581_v1 }
 0x10f   : > { %v477_v53 = vadd.f32 %v476_v52, %v1004_v39  ;;  %v478_v54 = vpop.f32.mrb[6].mxu0 }
 0x110   : > { %646 = vst [vmem:[%s1009_s16 + $0x30] sm:$0xff] %v475_v51  ;;  %v479_v55 = vadd.f32 %v478_v54, %v1002_v38  ;;  %v480_v56 = vpop.f32.mrb[7].mxu0  ;;  %v834_v9 = vpop.f32.mrb[4].mxu1 }
 0x111   : > { %647 = vst [vmem:[%s1009_s16 + $0x38] sm:$0xff] %v477_v53  ;;  %v481_v58 = vadd.f32 %v480_v56, %v1004_v39  ;;  %v602_v11 = vadd.f32 %v834_v9, %v1019_v50  ;;  %v593_v12 = vpop.f32.mrb[5].mxu1 }
 0x112   : > { %649 = vst [vmem:[%s1009_s16 + $0x48] sm:$0xff] %v479_v55  ;;  %v594_v13 = vadd.f32 %v593_v12, %v1019_v50  ;;  %v835_v14 = vpop.f32.mrb[6].mxu1 }
 0x113   : > { %650 = vst [vmem:[%s1009_s16 + $0x50] sm:$0xff] %v481_v58  ;;  %660 = vst [vmem:[%s1009_s16 + $0xa0] sm:$0xff] %v602_v11  ;;  %v605_v15 = vadd.f32 %v835_v14, %v1019_v50  ;;  %v596_v16 = vpop.f32.mrb[7].mxu1 }
 0x114   : > { %654 = vst [vmem:[%s1009_s16 + $0x70] sm:$0xff] %v594_v13  ;;  %v597_v17 = vadd.f32 %v596_v16, %v1019_v50 }
 0x115   : > { %v484_v2 = vpop.f32.mrb[8].mxu0  ;;  %663 = vst [vmem:[%s1009_s16 + $0xb8] sm:$0xff] %v605_v15 }
 0x116   : > { %v485_v3 = vadd.f32 %v484_v2, %v1002_v38  ;;  %v486_v4 = vpop.f32.mrb[9].mxu0  ;;  %657 = vst [vmem:[%s1009_s16 + $0x88] sm:$0xff] %v597_v17 }
 0x117   : > { %v487_v5 = vadd.f32 %v486_v4, %v1004_v39  ;;  %v488_v6 = vpop.f32.mrb[10].mxu0 }
 0x118   : > { %652 = vst [vmem:[%s1009_s16 + $0x60] sm:$0xff] %v485_v3  ;;  %v489_v7 = vadd.f32 %v488_v6, %v1002_v38  ;;  %v490_v8 = vpop.f32.mrb[11].mxu0  ;;  %v838_v25 = vpop.f32.mrb[8].mxu1 }
 0x119   : > { %653 = vst [vmem:[%s1009_s16 + $0x68] sm:$0xff] %v487_v5  ;;  %v491_v10 = vadd.f32 %v490_v8, %v1004_v39  ;;  %v618_v27 = vadd.f32 %v838_v25, %v1019_v50  ;;  %v609_v28 = vpop.f32.mrb[9].mxu1 }
 0x11a   : > { %655 = vst [vmem:[%s1009_s16 + $0x78] sm:$0xff] %v489_v7  ;;  %v610_v29 = vadd.f32 %v609_v28, %v1019_v50  ;;  %v839_v30 = vpop.f32.mrb[10].mxu1 }
 0x11b   : > { %656 = vst [vmem:[%s1009_s16 + $0x80] sm:$0xff] %v491_v10  ;;  %672 = vst [vmem:[%s1009_s16 + $0x100] sm:$0xff] %v618_v27  ;;  %v621_v31 = vadd.f32 %v839_v30, %v1019_v50  ;;  %v612_v32 = vpop.f32.mrb[11].mxu1 }
 0x11c   : > { %666 = vst [vmem:[%s1009_s16 + $0xd0] sm:$0xff] %v610_v29  ;;  %v613_v33 = vadd.f32 %v612_v32, %v1019_v50 }
 0x11d   : > { %v494_v18 = vpop.f32.mrb[12].mxu0  ;;  %675 = vst [vmem:[%s1009_s16 + $0x118] sm:$0xff] %v621_v31 }
 0x11e   : > { %v495_v19 = vadd.f32 %v494_v18, %v1002_v38  ;;  %v496_v20 = vpop.f32.mrb[13].mxu0  ;;  %669 = vst [vmem:[%s1009_s16 + $0xe8] sm:$0xff] %v613_v33 }
 0x11f   : > { %v497_v21 = vadd.f32 %v496_v20, %v1004_v39  ;;  %v498_v22 = vpop.f32.mrb[14].mxu0 }
 0x120   : > { %658 = vst [vmem:[%s1009_s16 + $0x90] sm:$0xff] %v495_v19  ;;  %v499_v23 = vadd.f32 %v498_v22, %v1002_v38  ;;  %v500_v24 = vpop.f32.mrb[15].mxu0  ;;  %v842_v43 = vpop.f32.mrb[12].mxu1 }
 0x121   : > { %659 = vst [vmem:[%s1009_s16 + $0x98] sm:$0xff] %v497_v21  ;;  %v501_v26 = vadd.f32 %v500_v24, %v1004_v39  ;;  %v634_v45 = vadd.f32 %v842_v43, %v1019_v50  ;;  %v625_v46 = vpop.f32.mrb[13].mxu1 }
 0x122   : > { %661 = vst [vmem:[%s1009_s16 + $0xa8] sm:$0xff] %v499_v23  ;;  %v626_v47 = vadd.f32 %v625_v46, %v1019_v50  ;;  %v843_v48 = vpop.f32.mrb[14].mxu1 }
 0x123   : > { %662 = vst [vmem:[%s1009_s16 + $0xb0] sm:$0xff] %v501_v26  ;;  %684 = vst [vmem:[%s1009_s16 + $0x160] sm:$0xff] %v634_v45  ;;  %v637_v49 = vadd.f32 %v843_v48, %v1019_v50  ;;  %v628_v51 = vpop.f32.mrb[15].mxu1 }
 0x124   : > { %678 = vst [vmem:[%s1009_s16 + $0x130] sm:$0xff] %v626_v47  ;;  %v629_v52 = vadd.f32 %v628_v51, %v1019_v50 }
 0x125   : > { %v504_v34 = vpop.f32.mrb[16].mxu0  ;;  %687 = vst [vmem:[%s1009_s16 + $0x178] sm:$0xff] %v637_v49 }
 0x126   : > { %v505_v35 = vadd.f32 %v504_v34, %v1002_v38  ;;  %v506_v36 = vpop.f32.mrb[17].mxu0  ;;  %681 = vst [vmem:[%s1009_s16 + $0x148] sm:$0xff] %v629_v52 }
 0x127   : > { %v507_v37 = vadd.f32 %v506_v36, %v1004_v39  ;;  %v508_v40 = vpop.f32.mrb[18].mxu0 }
 0x128   : > { %664 = vst [vmem:[%s1009_s16 + $0xc0] sm:$0xff] %v505_v35  ;;  %v509_v41 = vadd.f32 %v508_v40, %v1002_v38  ;;  %v510_v42 = vpop.f32.mrb[19].mxu0 }
 0x129   : > { %665 = vst [vmem:[%s1009_s16 + $0xc8] sm:$0xff] %v507_v37  ;;  %v511_v44 = vadd.f32 %v510_v42, %v1004_v39 }
 0x12a   : > { %667 = vst [vmem:[%s1009_s16 + $0xd8] sm:$0xff] %v509_v41 }
 0x12b   : > { %668 = vst [vmem:[%s1009_s16 + $0xe0] sm:$0xff] %v511_v44 }
 0x12d   : > { %v514_v53 = vpop.f32.mrb[20].mxu0 }
 0x12e   : > { %v515_v54 = vadd.f32 %v514_v53, %v1002_v38  ;;  %v516_v55 = vpop.f32.mrb[21].mxu0 }
 0x12f   : > { %v517_v56 = vadd.f32 %v516_v55, %v1004_v39  ;;  %v518_v57 = vpop.f32.mrb[22].mxu0 }
 0x130   : > { %670 = vst [vmem:[%s1009_s16 + $0xf0] sm:$0xff] %v515_v54  ;;  %v519_v58 = vadd.f32 %v518_v57, %v1002_v38  ;;  %v520_v59 = vpop.f32.mrb[23].mxu0 }
 0x131   : > { %671 = vst [vmem:[%s1009_s16 + $0xf8] sm:$0xff] %v517_v56  ;;  %v521_v50 = vadd.f32 %v520_v59, %v1004_v39 }
 0x132   : > { %673 = vst [vmem:[%s1009_s16 + $0x108] sm:$0xff] %v519_v58 }
 0x133   : > { %674 = vst [vmem:[%s1009_s16 + $0x110] sm:$0xff] %v521_v50 }
 0x135   : > { %v524_v60 = vpop.f32.mrb[24].mxu0 }
 0x136   : > { %v525_v61 = vadd.f32 %v524_v60, %v1002_v38  ;;  %v526_v62 = vpop.f32.mrb[25].mxu0 }
 0x137   : > { %v527_v63 = vadd.f32 %v526_v62, %v1004_v39  ;;  %v528_v0 = vpop.f32.mrb[26].mxu0 }
 0x138   : > { %676 = vst [vmem:[%s1009_s16 + $0x120] sm:$0xff] %v525_v61  ;;  %v529_v1 = vadd.f32 %v528_v0, %v1002_v38  ;;  %v530_v2 = vpop.f32.mrb[27].mxu0 }
 0x139   : > { %677 = vst [vmem:[%s1009_s16 + $0x128] sm:$0xff] %v527_v63  ;;  %v531_v3 = vadd.f32 %v530_v2, %v1004_v39 }
 0x13a   : > { %679 = vst [vmem:[%s1009_s16 + $0x138] sm:$0xff] %v529_v1 }
 0x13b   : > { %680 = vst [vmem:[%s1009_s16 + $0x140] sm:$0xff] %v531_v3 }
 0x13d   : > { %v534_v4 = vpop.f32.mrb[28].mxu0 }
 0x13e   : > { %v535_v5 = vadd.f32 %v534_v4, %v1002_v38  ;;  %v536_v6 = vpop.f32.mrb[29].mxu0 }
 0x13f   : > { %v537_v7 = vadd.f32 %v536_v6, %v1004_v39  ;;  %v538_v8 = vpop.f32.mrb[30].mxu0 }
 0x140   : > { %682 = vst [vmem:[%s1009_s16 + $0x150] sm:$0xff] %v535_v5  ;;  %v539_v9 = vadd.f32 %v538_v8, %v1002_v38  ;;  %v540_v10 = vpop.f32.mrb[31].mxu0 }
 0x141   : > { %683 = vst [vmem:[%s1009_s16 + $0x158] sm:$0xff] %v537_v7  ;;  %v541_v11 = vadd.f32 %v540_v10, %v1004_v39 }
 0x142   : > { %685 = vst [vmem:[%s1009_s16 + $0x168] sm:$0xff] %v539_v9 }
 0x143   : > { %686 = vst [vmem:[%s1009_s16 + $0x170] sm:$0xff] %v541_v11 }
 0x144 PF: > { %s13_s12 = sadd.s32 1, %s902_s12  }
 0x145   : > { %p10_p4 = scmp.ge.s32.totalorder %s13_s12, 4  }
 0x147   :  { %12 = sbr.rel (!%p10_p4) target bundleno = 1 (0x1), region = 65 }

// kernel: _lambda_.6
= control target key start
LH: loop header
LB: loop body
LE: loop exit
PB: predicated region body
PF: predicated region fallthrough
CT: control target
= control target key end

     0   :  { %s1640_s12 = smov 0   ;;  %s1954_s0 = inlined_call_operand.vmem [shape: bf16[2,128,128], index: 0, kind: input, shape index: {}]   ;;  %s1955_s1 = inlined_call_operand.vmem [shape: bf16[2,2,128,384], index: 1, kind: input, shape index: {}]   ;;  %s1956_s2 = inlined_call_operand.vmem [shape: f32[2,1,384], index: 2, kind: input, shape index: {}]   ;;  %s1957_s3 = inlined_call_operand.vmem [shape: f32[2,128,384], index: 3, kind: output, shape index: {}]  }
   0x1 LB: > { %s1239_s13 = sadd.s32 4294967295, %s1617_s12   ;;  %p1243_p0 = scmp.ge.s32.totalorder %s1617_s12, 1  ;;  %s1617_s12 = sphi %s1640_s12, %s13_s12  }
   0x2   : > { %p146_p1 = scmp.lt.s32.totalorder %s1617_s12, 3 }
   0x4   : > { %p147_p2 = pnand %p1243_p0, %p146_p1 }
   0x5   : > { %p174_p3 = scmp.lt.s32.totalorder (!%p147_p2), %s1239_s13, 1  ;;  %v1619_v0 = vmov (!%p147_p2), 0   ;;  %v1681_v19 = vld [vmem:[%s1954_s0 + $0x40] sm:$0xff] (!%p147_p2)   ;;  %v1698_v26 = vld [vmem:[%s1954_s0 + $0x48] sm:$0xff] (!%p147_p2)   ;;  %v1575_v35 = vld [vmem:[%s1954_s0 + $0x50] sm:$0xff] (!%p147_p2)  }
   0x6   : > { %150 = sbr.rel (%p147_p2) target bundleno = 358 (0x166), region = 32  ;;  %495 = vmatprep.mubr.bf16.mxu0 (!%p147_p2), %v1619_v0  ;;  %535 = vmatprep.mubr.bf16.mxu1 (!%p147_p2), %v1619_v0  ;;  %v1686_v20 = vld [vmem:[%s1954_s0 + $0x60] sm:$0xff] (!%p147_p2)   ;;  %v1706_v28 = vld [vmem:[%s1954_s0 + $0x68] sm:$0xff] (!%p147_p2)   ;;  %v1724_v36 = vld [vmem:[%s1954_s0 + $0x70] sm:$0xff] (!%p147_p2)  }
   0x7   : > { %v1585_v43 = vld [vmem:[%s1954_s0 + $0x58] sm:$0xff] (!%p147_p2)   ;;  %v1595_v50 = vld [vmem:[%s1954_s0] sm:$0xff] (!%p147_p2)   ;;  %v1598_v53 = vld [vmem:[%s1954_s0 + $0x8] sm:$0xff] (!%p147_p2)  }
   0x8   : > { %v1586_v44 = vld [vmem:[%s1954_s0 + $0x78] sm:$0xff] (!%p147_p2)   ;;  %v1601_v56 = vld [vmem:[%s1954_s0 + $0x10] sm:$0xff] (!%p147_p2)   ;;  %v1607_v61 = vld [vmem:[%s1954_s0 + $0x20] sm:$0xff] (!%p147_p2)  }
   0x9   : > { %v1604_v59 = vld [vmem:[%s1954_s0 + $0x18] sm:$0xff] (!%p147_p2)   ;;  %v1608_v62 = vld [vmem:[%s1954_s0 + $0x28] sm:$0xff] (!%p147_p2)   ;;  %v1609_v63 = vld [vmem:[%s1954_s0 + $0x30] sm:$0xff] (!%p147_p2)  }
   0xd   : > { %s1959_s13 = smov (!%p174_p3, %s1239_s13), 1 }
   0xe   : > { %s1520_s14 = smul.u32 384, %s1959_s13 }
   0xf   : > { %s1521_s26 = smul.u32 3, %s1959_s13 }
  0x10   : > { %s1658_s17 = scalar_lea.vmem %s1955_s1, %s1520_s14  ;;  %s1835_s5 = scalar_lea.vmem %s1957_s3, %s1520_s14 }
  0x11   : > { %v1531_v1 = vld [vmem:[%s1658_s17 + $0xc4] ss:$12 sps:$4 sm:$0xff]   ;;  %v1533_v2 = vld [vmem:[%s1658_s17 + $0xc0] ss:$12 sps:$4 sm:$0xff]   ;;  %v1534_v3 = vld [vmem:[%s1658_s17 + $0xdc] ss:$12 sps:$4 sm:$0xff]   ;;  %s182_s29 = scalar_lea.vmem %s1956_s2, %s1521_s26 }
  0x12   : > { %463 = vmatprep.subr.bf16.mxu0 %v1531_v1  ;;  %1456 = vmatprep.subr.bf16.mxu1 %v1531_v1  ;;  %v1536_v4 = vld [vmem:[%s1658_s17 + $0xd8] ss:$12 sps:$4 sm:$0xff]   ;;  %v1537_v5 = vld [vmem:[%s1658_s17 + $0xf4] ss:$12 sps:$4 sm:$0xff]   ;;  %v1539_v6 = vld [vmem:[%s1658_s17 + $0xf0] ss:$12 sps:$4 sm:$0xff]  }
  0x13   : > { %464 = vmatpush1.bf16.msra.mxu0 %v1533_v2  ;;  %1464 = vmatpush1.bf16.msra.mxu1 %v1533_v2  ;;  %v1540_v7 = vld [vmem:[%s1658_s17 + $0x10c] ss:$12 sps:$4 sm:$0xff]   ;;  %v1542_v8 = vld [vmem:[%s1658_s17 + $0x108] ss:$12 sps:$4 sm:$0xff]   ;;  %v1543_v9 = vld [vmem:[%s1658_s17 + $0x124] ss:$12 sps:$4 sm:$0xff]  }
  0x14   : > { %465 = vmatprep.subr.bf16.mxu0 %v1534_v3  ;;  %1457 = vmatprep.subr.bf16.mxu1 %v1534_v3  ;;  %v1545_v10 = vld [vmem:[%s1658_s17 + $0x120] ss:$12 sps:$4 sm:$0xff]   ;;  %v1546_v11 = vld [vmem:[%s1658_s17 + $0x13c] ss:$12 sps:$4 sm:$0xff]   ;;  %v1548_v12 = vld [vmem:[%s1658_s17 + $0x138] ss:$12 sps:$4 sm:$0xff]  }
  0x15   : > { %v1549_v13 = vld [vmem:[%s1658_s17 + $0x154] ss:$12 sps:$4 sm:$0xff]   ;;  %v1551_v14 = vld [vmem:[%s1658_s17 + $0x150] ss:$12 sps:$4 sm:$0xff]   ;;  %v1552_v15 = vld [vmem:[%s1658_s17 + $0x16c] ss:$12 sps:$4 sm:$0xff]  }
  0x16   : > { %v1554_v16 = vld [vmem:[%s1658_s17 + $0x168] ss:$12 sps:$4 sm:$0xff]   ;;  %v1560_v18 = vld [vmem:[%s1658_s17 + $0x4] ss:$12 sps:$4 sm:$0xff]   ;;  %v1558_v21 = vld [vmem:[%s1658_s17] ss:$12 sps:$4 sm:$0xff]  }
  0x17   : > { %466 = vmatpush1.bf16.msra.mxu0 %v1536_v4  ;;  %1465 = vmatpush1.bf16.msra.mxu1 %v1536_v4  ;;  %v1557_v17 = vld [vmem:[%s1658_s17 + $0xc8] ss:$12 sps:$4 sm:$0xff]   ;;  %v1561_v22 = vld [vmem:[%s1658_s17 + $0xe0] ss:$12 sps:$4 sm:$0xff]   ;;  %v1562_v24 = vld [vmem:[%s1658_s17 + $0x18] ss:$12 sps:$4 sm:$0xff]  }
  0x18   : > { %467 = vmatprep.subr.bf16.mxu0 %v1537_v5  ;;  %1458 = vmatprep.subr.bf16.mxu1 %v1537_v5  ;;  %v1564_v23 = vld [vmem:[%s1658_s17 + $0x1c] ss:$12 sps:$4 sm:$0xff]   ;;  %v1567_v25 = vld [vmem:[%s1658_s17 + $0xf8] ss:$12 sps:$4 sm:$0xff]   ;;  %v1570_v27 = vld [vmem:[%s1658_s17 + $0x34] ss:$12 sps:$4 sm:$0xff]  }
  0x19   : > { %v1568_v29 = vld [vmem:[%s1658_s17 + $0x30] ss:$12 sps:$4 sm:$0xff]   ;;  %v1574_v31 = vld [vmem:[%s1658_s17 + $0x4c] ss:$12 sps:$4 sm:$0xff]   ;;  %v1572_v32 = vld [vmem:[%s1658_s17 + $0x48] ss:$12 sps:$4 sm:$0xff]  }
  0x1a   : > { %v1571_v30 = vld [vmem:[%s1658_s17 + $0x110] ss:$12 sps:$4 sm:$0xff]   ;;  %v1577_v33 = vld [vmem:[%s1658_s17 + $0x128] ss:$12 sps:$4 sm:$0xff]   ;;  %v1578_v37 = vld [vmem:[%s1658_s17 + $0x60] ss:$12 sps:$4 sm:$0xff]  }
  0x1b   : > { %468 = vmatpush1.bf16.msra.mxu0 %v1539_v6  ;;  %1466 = vmatpush1.bf16.msra.mxu1 %v1539_v6  ;;  %v1580_v34 = vld [vmem:[%s1658_s17 + $0x64] ss:$12 sps:$4 sm:$0xff]   ;;  %v1581_v38 = vld [vmem:[%s1658_s17 + $0x140] ss:$12 sps:$4 sm:$0xff]   ;;  %v1584_v39 = vld [vmem:[%s1658_s17 + $0x7c] ss:$12 sps:$4 sm:$0xff]  }
  0x1c   : > { %469 = vmatprep.subr.bf16.mxu0 %v1540_v7  ;;  %1459 = vmatprep.subr.bf16.mxu1 %v1540_v7  ;;  %v1582_v40 = vld [vmem:[%s1658_s17 + $0x78] ss:$12 sps:$4 sm:$0xff]   ;;  %v1590_v42 = vld [vmem:[%s1658_s17 + $0x94] ss:$12 sps:$4 sm:$0xff]   ;;  %v1588_v45 = vld [vmem:[%s1658_s17 + $0x90] ss:$12 sps:$4 sm:$0xff]  }
  0x1d   : > { %v1587_v41 = vld [vmem:[%s1658_s17 + $0x158] ss:$12 sps:$4 sm:$0xff]   ;;  %v1591_v46 = vld [vmem:[%s1658_s17 + $0x170] ss:$12 sps:$4 sm:$0xff]   ;;  %v1592_v48 = vld [vmem:[%s1658_s17 + $0xa8] ss:$12 sps:$4 sm:$0xff]  }
  0x1e   : > { %v1594_v47 = vld [vmem:[%s1658_s17 + $0xac] ss:$12 sps:$4 sm:$0xff]   ;;  %v1596_v49 = vld [vmem:[%s1658_s17 + $0x8] ss:$12 sps:$4 sm:$0xff]   ;;  %v1600_v54 = vld [vmem:[%s1658_s17 + $0x50] ss:$12 sps:$4 sm:$0xff]  }
  0x1f   : > { %470 = vmatpush1.bf16.msra.mxu0 %v1542_v8  ;;  %1467 = vmatpush1.bf16.msra.mxu1 %v1542_v8  ;;  %v1597_v51 = vld [vmem:[%s1658_s17 + $0x20] ss:$12 sps:$4 sm:$0xff]   ;;  %v1599_v52 = vld [vmem:[%s1658_s17 + $0x38] ss:$12 sps:$4 sm:$0xff]   ;;  %v1602_v55 = vld [vmem:[%s1658_s17 + $0x68] ss:$12 sps:$4 sm:$0xff]  }
  0x20   : > { %471 = vmatprep.subr.bf16.mxu0 %v1543_v9  ;;  %1460 = vmatprep.subr.bf16.mxu1 %v1543_v9  ;;  %v1603_v57 = vld [vmem:[%s1658_s17 + $0x80] ss:$12 sps:$4 sm:$0xff]   ;;  %v1605_v58 = vld [vmem:[%s1658_s17 + $0x98] ss:$12 sps:$4 sm:$0xff]   ;;  %v1606_v60 = vld [vmem:[%s1658_s17 + $0xb0] ss:$12 sps:$4 sm:$0xff]  }
  0x21   : > { %v1610_v1 = vld [vmem:[%s1954_s0 + $0x38] sm:$0xff]  }
  0x23   : > { %472 = vmatpush1.bf16.msra.mxu0 %v1545_v10  ;;  %1468 = vmatpush1.bf16.msra.mxu1 %v1545_v10 }
  0x24   : > { %473 = vmatprep.subr.bf16.mxu0 %v1546_v11  ;;  %1461 = vmatprep.subr.bf16.mxu1 %v1546_v11  ;;  %v1061_v11 = vlaneseq }
  0x27   : > { %474 = vmatpush1.bf16.msra.mxu0 %v1548_v12  ;;  %1469 = vmatpush1.bf16.msra.mxu1 %v1548_v12 }
  0x28   : > { %475 = vmatprep.subr.bf16.mxu0 %v1549_v13  ;;  %1462 = vmatprep.subr.bf16.mxu1 %v1549_v13 }
  0x2b   : > { %476 = vmatpush1.bf16.msra.mxu0 %v1551_v14  ;;  %1470 = vmatpush1.bf16.msra.mxu1 %v1551_v14  ;;  %v1062_v14 = vshrl.u32 %v1061_v11, 7 }
  0x2c   : > { %477 = vmatprep.subr.bf16.mxu0 %v1552_v15  ;;  %1463 = vmatprep.subr.bf16.mxu1 %v1552_v15 }
  0x2f   : > { %478 = vmatpush1.bf16.msra.mxu0 %v1554_v16  ;;  %1471 = vmatpush1.bf16.msra.mxu1 %v1554_v16 }
  0x30   : > { %1392 = vmatprep.subr.bf16.mxu1 %v1557_v17  ;;  %849 = vmatprep.subr.bf16.mxu0 %v1560_v18 }
  0x32   : > { %496 = vmatmul.mubr.bf16.vlgmr.msra.gmra.mrb[0].mxu0 %v1681_v19  ;;  %536 = vmatmul.mubr.bf16.vlgmr.msra.gmra.mrb[0].mxu1 %v1686_v20 }
  0x33   : > { %1393 = vmatpush3.bf16.msra.mxu1 %v1557_v17  ;;  %850 = vmatpush1.bf16.msra.mxu0 %v1558_v21  ;;  %v1063_v17 = vsub.s32 0, %v1062_v14 }
  0x34   : > { %1394 = vmatprep.subr.bf16.mxu1 %v1561_v22  ;;  %851 = vmatprep.subr.bf16.mxu0 %v1564_v23 }
  0x35   : > { %505 = vmatprep.mubr.bf16.mxu0 %v1619_v0  ;;  %545 = vmatprep.mubr.bf16.mxu1 %v1619_v0 }
  0x37   : > { %1395 = vmatpush3.bf16.msra.mxu1 %v1561_v22  ;;  %852 = vmatpush1.bf16.msra.mxu0 %v1562_v24 }
  0x38   : > { %1396 = vmatprep.subr.bf16.mxu1 %v1567_v25  ;;  %853 = vmatprep.subr.bf16.mxu0 %v1570_v27 }
  0x3a   : > { %506 = vmatmul.mubr.bf16.gmra.mrb[4].mxu0 %v1698_v26  ;;  %546 = vmatmul.mubr.bf16.gmra.mrb[4].mxu1 %v1706_v28 }
  0x3b   : > { %1397 = vmatpush3.bf16.msra.mxu1 %v1567_v25  ;;  %854 = vmatpush1.bf16.msra.mxu0 %v1568_v29 }
  0x3c   : > { %1398 = vmatprep.subr.bf16.mxu1 %v1571_v30  ;;  %855 = vmatprep.subr.bf16.mxu0 %v1574_v31 }
  0x3d   : > { %515 = vmatprep.mubr.bf16.mxu0 %v1619_v0  ;;  %555 = vmatprep.mubr.bf16.mxu1 %v1619_v0 }
  0x3f   : > { %1399 = vmatpush3.bf16.msra.mxu1 %v1571_v30  ;;  %856 = vmatpush1.bf16.msra.mxu0 %v1572_v32 }
  0x40   : > { %1400 = vmatprep.subr.bf16.mxu1 %v1577_v33  ;;  %857 = vmatprep.subr.bf16.mxu0 %v1580_v34 }
  0x42   : > { %516 = vmatmul.mubr.bf16.gmra.mrb[8].mxu0 %v1575_v35  ;;  %556 = vmatmul.mubr.bf16.gmra.mrb[8].mxu1 %v1724_v36 }
  0x43   : > { %1401 = vmatpush3.bf16.msra.mxu1 %v1577_v33  ;;  %858 = vmatpush1.bf16.msra.mxu0 %v1578_v37 }
  0x44   : > { %1402 = vmatprep.subr.bf16.mxu1 %v1581_v38  ;;  %859 = vmatprep.subr.bf16.mxu0 %v1584_v39 }
  0x45   : > { %525 = vmatprep.mubr.bf16.mxu0 %v1619_v0  ;;  %565 = vmatprep.mubr.bf16.mxu1 %v1619_v0 }
  0x47   : > { %1403 = vmatpush3.bf16.msra.mxu1 %v1581_v38  ;;  %860 = vmatpush1.bf16.msra.mxu0 %v1582_v40 }
  0x48   : > { %1404 = vmatprep.subr.bf16.mxu1 %v1587_v41  ;;  %861 = vmatprep.subr.bf16.mxu0 %v1590_v42 }
  0x4a   : > { %526 = vmatmul.mubr.bf16.gmra.mrb[12].mxu0 %v1585_v43  ;;  %566 = vmatmul.mubr.bf16.gmra.mrb[12].mxu1 %v1586_v44 }
  0x4b   : > { %1405 = vmatpush3.bf16.msra.mxu1 %v1587_v41  ;;  %862 = vmatpush1.bf16.msra.mxu0 %v1588_v45 }
  0x4c   : > { %1406 = vmatprep.subr.bf16.mxu1 %v1591_v46  ;;  %863 = vmatprep.subr.bf16.mxu0 %v1594_v47 }
  0x4d   : > { %1408 = vmatprep.mubr.bf16.mxu1 %v1681_v19  ;;  %881 = vmatprep.mubr.bf16.mxu0 %v1619_v0  ;;  %v1059_v19 = vld [vmem:[%s182_s29] sm:$0x7] }
  0x4e   : > { %v1826_v22 = vrot.slane %v1059_v19, %v1063_v17 }
  0x4f   : > { %1407 = vmatpush3.bf16.msra.mxu1 %v1591_v46  ;;  %864 = vmatpush1.bf16.msra.mxu0 %v1592_v48 }
  0x50   : > { %1424 = vmatprep.subr.bf16.mxu1 %v1596_v49 }
  0x52   : > { %1409 = vmatmul.mubr.bf16.vlgmr.msra.gmra.mrb[16].mxu1 %v1698_v26  ;;  %882 = vmatmul.mubr.bf16.vlgmr.msra.gmra.mrb[0].mxu0 %v1595_v50 }
  0x53   : > { %1425 = vmatpush3.bf16.msra.mxu1 %v1596_v49  ;;  %1412 = vmatprep.mubr.bf16.mxu1 %v1575_v35 }
  0x54   : > { %1426 = vmatprep.subr.bf16.mxu1 %v1597_v51  ;;  %891 = vmatprep.mubr.bf16.mxu0 %v1619_v0 }
  0x57   : > { %1427 = vmatpush3.bf16.msra.mxu1 %v1597_v51  ;;  %v1071_v51 = vsub.s32 2, %v1062_v14 }
  0x58   : > { %1428 = vmatprep.subr.bf16.mxu1 %v1599_v52 }
  0x5a   : > { %1413 = vmatmul.mubr.bf16.gmra.mrb[20].mxu1 %v1585_v43  ;;  %892 = vmatmul.mubr.bf16.gmra.mrb[4].mxu0 %v1598_v53 }
  0x5b   : > { %1429 = vmatpush3.bf16.msra.mxu1 %v1599_v52  ;;  %1416 = vmatprep.mubr.bf16.mxu1 %v1686_v20  ;;  %v1067_v20 = vsub.s32 1, %v1062_v14 }
  0x5c   : > { %1430 = vmatprep.subr.bf16.mxu1 %v1600_v54  ;;  %901 = vmatprep.mubr.bf16.mxu0 %v1619_v0 }
  0x5d   : > { %v1828_v23 = vrot.slane %v1059_v19, %v1067_v20 }
  0x5f   : > { %1431 = vmatpush3.bf16.msra.mxu1 %v1600_v54 }
  0x60   : > { %1432 = vmatprep.subr.bf16.mxu1 %v1602_v55 }
  0x62   : > { %1417 = vmatmul.mubr.bf16.gmra.mrb[24].mxu1 %v1706_v28  ;;  %902 = vmatmul.mubr.bf16.gmra.mrb[8].mxu0 %v1601_v56 }
  0x63   : > { %1433 = vmatpush3.bf16.msra.mxu1 %v1602_v55  ;;  %1420 = vmatprep.mubr.bf16.mxu1 %v1724_v36 }
  0x64   : > { %1434 = vmatprep.subr.bf16.mxu1 %v1603_v57  ;;  %911 = vmatprep.mubr.bf16.mxu0 %v1619_v0 }
  0x67   : > { %1435 = vmatpush3.bf16.msra.mxu1 %v1603_v57  ;;  %v1868_v57 = vrot.slane %v1059_v19, %v1071_v51 }
  0x68   : > { %1436 = vmatprep.subr.bf16.mxu1 %v1605_v58 }
  0x6a   : > { %1421 = vmatmul.mubr.bf16.gmra.mrb[28].mxu1 %v1586_v44  ;;  %912 = vmatmul.mubr.bf16.gmra.mrb[12].mxu0 %v1604_v59 }
  0x6b   : > { %1437 = vmatpush3.bf16.msra.mxu1 %v1605_v58  ;;  %921 = vmatprep.mubr.bf16.mxu0 %v1619_v0 }
  0x6c   : > { %1438 = vmatprep.subr.bf16.mxu1 %v1606_v60  ;;  %1440 = vmatprep.mubr.bf16.mxu1 %v1595_v50 }
  0x6f   : > { %1439 = vmatpush3.bf16.msra.mxu1 %v1606_v60 }
  0x72   : > { %922 = vmatmul.mubr.bf16.gmra.mrb[16].mxu0 %v1607_v61  ;;  %1441 = vmatmul.mubr.bf16.vlgmr.msra.gmra.mrb[16].mxu1 %v1598_v53 }
  0x73   : > { %931 = vmatprep.mubr.bf16.mxu0 %v1619_v0  ;;  %1444 = vmatprep.mubr.bf16.mxu1 %v1601_v56 }
  0x7a   : > { %932 = vmatmul.mubr.bf16.gmra.mrb[20].mxu0 %v1608_v62  ;;  %1445 = vmatmul.mubr.bf16.gmra.mrb[20].mxu1 %v1604_v59 }
  0x7b   : > { %941 = vmatprep.mubr.bf16.mxu0 %v1619_v0  ;;  %1448 = vmatprep.mubr.bf16.mxu1 %v1607_v61 }
  0x82   : > { %942 = vmatmul.mubr.bf16.gmra.mrb[24].mxu0 %v1609_v63  ;;  %1449 = vmatmul.mubr.bf16.gmra.mrb[24].mxu1 %v1608_v62 }
  0x83   : > { %951 = vmatprep.mubr.bf16.mxu0 %v1619_v0  ;;  %1452 = vmatprep.mubr.bf16.mxu1 %v1609_v63 }
  0x8a   : > { %952 = vmatmul.mubr.bf16.gmra.mrb[28].mxu0 %v1610_v1  ;;  %1453 = vmatmul.mubr.bf16.gmra.mrb[28].mxu1 %v1610_v1 }
 0x105   : > { %v1790_v2 = vpop.f32.mrb[0].mxu1 }
 0x106   : > { %v1792_v3 = vpop.f32.mrb[1].mxu1 }
 0x107   : > { %v1794_v4 = vpop.f32.mrb[2].mxu1 }
 0x108   : > { %v1796_v5 = vpop.f32.mrb[3].mxu1 }
 0x10d   : > { %v1798_v6 = vpop.f32.mrb[4].mxu1 }
 0x10e   : > { %v1800_v7 = vpop.f32.mrb[5].mxu1 }
 0x10f   : > { %v1802_v0 = vpop.f32.mrb[6].mxu1 }
 0x110   : > { %v1804_v8 = vpop.f32.mrb[7].mxu1 }
 0x115   : > { %v1806_v9 = vpop.f32.mrb[8].mxu1 }
 0x116   : > { %v1808_v10 = vpop.f32.mrb[9].mxu1 }
 0x117   : > { %v1810_v12 = vpop.f32.mrb[10].mxu1 }
 0x118   : > { %v1812_v13 = vpop.f32.mrb[11].mxu1 }
 0x11d   : > { %v1818_v15 = vpop.f32.mrb[12].mxu1 }
 0x11e   : > { %v1820_v16 = vpop.f32.mrb[13].mxu1 }
 0x11f   : > { %v1822_v18 = vpop.f32.mrb[14].mxu1 }
 0x120   : > { %v1824_v21 = vpop.f32.mrb[15].mxu1 }
 0x125   : > { %v883_v24 = vpop.f32.mrb[0].mxu0 }
 0x126   : > { %v1076_v25 = vadd.f32 %v1826_v22, %v883_v24  ;;  %v885_v26 = vpop.f32.mrb[1].mxu0 }
 0x127   : > { %v1077_v27 = vadd.f32 %v1828_v23, %v885_v26  ;;  %v887_v28 = vpop.f32.mrb[2].mxu0 }
 0x128   : > { %1124 = vst [vmem:[%s1835_s5] sm:$0xff] %v1076_v25  ;;  %v1079_v29 = vadd.f32 %v1826_v22, %v887_v28  ;;  %v889_v30 = vpop.f32.mrb[3].mxu0 }
 0x129   : > { %1125 = vst [vmem:[%s1835_s5 + $0x8] sm:$0xff] %v1077_v27  ;;  %v1080_v31 = vadd.f32 %v1828_v23, %v889_v30 }
 0x12a   : > { %1127 = vst [vmem:[%s1835_s5 + $0x18] sm:$0xff] %v1079_v29 }
 0x12b   : > { %1128 = vst [vmem:[%s1835_s5 + $0x20] sm:$0xff] %v1080_v31 }
 0x12d   : > { %v893_v32 = vpop.f32.mrb[4].mxu0 }
 0x12e   : > { %v1082_v33 = vadd.f32 %v1826_v22, %v893_v32  ;;  %v895_v34 = vpop.f32.mrb[5].mxu0 }
 0x12f   : > { %v1083_v35 = vadd.f32 %v1828_v23, %v895_v34  ;;  %v897_v36 = vpop.f32.mrb[6].mxu0 }
 0x130   : > { %1130 = vst [vmem:[%s1835_s5 + $0x30] sm:$0xff] %v1082_v33  ;;  %v1085_v37 = vadd.f32 %v1826_v22, %v897_v36  ;;  %v899_v38 = vpop.f32.mrb[7].mxu0 }
 0x131   : > { %1131 = vst [vmem:[%s1835_s5 + $0x38] sm:$0xff] %v1083_v35  ;;  %v1086_v39 = vadd.f32 %v1828_v23, %v899_v38 }
 0x132   : > { %1133 = vst [vmem:[%s1835_s5 + $0x48] sm:$0xff] %v1085_v37 }
 0x133   : > { %1134 = vst [vmem:[%s1835_s5 + $0x50] sm:$0xff] %v1086_v39 }
 0x135   : > { %v903_v40 = vpop.f32.mrb[8].mxu0 }
 0x136   : > { %v1088_v41 = vadd.f32 %v1826_v22, %v903_v40  ;;  %v905_v42 = vpop.f32.mrb[9].mxu0 }
 0x137   : > { %v1089_v43 = vadd.f32 %v1828_v23, %v905_v42  ;;  %v907_v44 = vpop.f32.mrb[10].mxu0 }
 0x138   : > { %1136 = vst [vmem:[%s1835_s5 + $0x60] sm:$0xff] %v1088_v41  ;;  %v1091_v45 = vadd.f32 %v1826_v22, %v907_v44  ;;  %v909_v46 = vpop.f32.mrb[11].mxu0 }
 0x139   : > { %1137 = vst [vmem:[%s1835_s5 + $0x68] sm:$0xff] %v1089_v43  ;;  %v1092_v47 = vadd.f32 %v1828_v23, %v909_v46 }
 0x13a   : > { %1139 = vst [vmem:[%s1835_s5 + $0x78] sm:$0xff] %v1091_v45 }
 0x13b   : > { %1140 = vst [vmem:[%s1835_s5 + $0x80] sm:$0xff] %v1092_v47 }
 0x13d   : > { %v913_v48 = vpop.f32.mrb[12].mxu0 }
 0x13e   : > { %v1094_v49 = vadd.f32 %v1826_v22, %v913_v48  ;;  %v915_v50 = vpop.f32.mrb[13].mxu0 }
 0x13f   : > { %v1095_v52 = vadd.f32 %v1828_v23, %v915_v50  ;;  %v917_v53 = vpop.f32.mrb[14].mxu0 }
 0x140   : > { %1142 = vst [vmem:[%s1835_s5 + $0x90] sm:$0xff] %v1094_v49  ;;  %v1097_v54 = vadd.f32 %v1826_v22, %v917_v53  ;;  %v919_v55 = vpop.f32.mrb[15].mxu0 }
 0x141   : > { %1143 = vst [vmem:[%s1835_s5 + $0x98] sm:$0xff] %v1095_v52  ;;  %v1098_v56 = vadd.f32 %v1828_v23, %v919_v55 }
 0x142   : > { %1145 = vst [vmem:[%s1835_s5 + $0xa8] sm:$0xff] %v1097_v54 }
 0x143   : > { %1146 = vst [vmem:[%s1835_s5 + $0xb0] sm:$0xff] %v1098_v56 }
 0x145   : > { %v923_v58 = vpop.f32.mrb[16].mxu0  ;;  %v1442_v59 = vpop.f32.mrb[16].mxu1 }
 0x146   : > { %v924_v60 = vadd.f32 %v923_v58, %v1790_v2  ;;  %v1084_v61 = vadd.f32 %v1442_v59, %v1868_v57  ;;  %v925_v62 = vpop.f32.mrb[17].mxu0  ;;  %v996_v63 = vpop.f32.mrb[17].mxu1 }
 0x147   : > { %v926_v1 = vadd.f32 %v925_v62, %v1792_v3  ;;  %v1078_v11 = vadd.f32 %v1868_v57, %v996_v63  ;;  %v927_v14 = vpop.f32.mrb[18].mxu0  ;;  %v1443_v17 = vpop.f32.mrb[18].mxu1 }
 0x148   : > { %v1100_v19 = vadd.f32 %v1826_v22, %v924_v60  ;;  %1132 = vst [vmem:[%s1835_s5 + $0x40] sm:$0xff] %v1084_v61  ;;  %v928_v2 = vadd.f32 %v927_v14, %v1794_v4  ;;  %v1087_v20 = vadd.f32 %v1443_v17, %v1868_v57  ;;  %v929_v24 = vpop.f32.mrb[19].mxu0  ;;  %v999_v25 = vpop.f32.mrb[19].mxu1 }
 0x149   : > { %v1101_v3 = vadd.f32 %v1828_v23, %v926_v1  ;;  %1126 = vst [vmem:[%s1835_s5 + $0x10] sm:$0xff] %v1078_v11  ;;  %v930_v26 = vadd.f32 %v929_v24, %v1796_v5  ;;  %v1081_v27 = vadd.f32 %v1868_v57, %v999_v25 }
 0x14a   : > { %1148 = vst [vmem:[%s1835_s5 + $0xc0] sm:$0xff] %v1100_v19  ;;  %v1103_v28 = vadd.f32 %v1826_v22, %v928_v2  ;;  %1135 = vst [vmem:[%s1835_s5 + $0x58] sm:$0xff] %v1087_v20 }
 0x14b   : > { %1149 = vst [vmem:[%s1835_s5 + $0xc8] sm:$0xff] %v1101_v3  ;;  %v1104_v29 = vadd.f32 %v1828_v23, %v930_v26  ;;  %1129 = vst [vmem:[%s1835_s5 + $0x28] sm:$0xff] %v1081_v27 }
 0x14c   : > { %1151 = vst [vmem:[%s1835_s5 + $0xd8] sm:$0xff] %v1103_v28 }
 0x14d   : > { %1152 = vst [vmem:[%s1835_s5 + $0xe0] sm:$0xff] %v1104_v29  ;;  %v933_v4 = vpop.f32.mrb[20].mxu0  ;;  %v1446_v30 = vpop.f32.mrb[20].mxu1 }
 0x14e   : > { %v934_v31 = vadd.f32 %v933_v4, %v1798_v6  ;;  %v1096_v5 = vadd.f32 %v1446_v30, %v1868_v57  ;;  %v935_v32 = vpop.f32.mrb[21].mxu0  ;;  %v1012_v33 = vpop.f32.mrb[21].mxu1 }
 0x14f   : > { %v936_v34 = vadd.f32 %v935_v32, %v1800_v7  ;;  %v1090_v35 = vadd.f32 %v1868_v57, %v1012_v33  ;;  %v937_v36 = vpop.f32.mrb[22].mxu0  ;;  %v1447_v37 = vpop.f32.mrb[22].mxu1 }
 0x150   : > { %v1106_v38 = vadd.f32 %v1826_v22, %v934_v31  ;;  %1144 = vst [vmem:[%s1835_s5 + $0xa0] sm:$0xff] %v1096_v5  ;;  %v938_v6 = vadd.f32 %v937_v36, %v1802_v0  ;;  %v1099_v39 = vadd.f32 %v1447_v37, %v1868_v57  ;;  %v939_v40 = vpop.f32.mrb[23].mxu0  ;;  %v1015_v41 = vpop.f32.mrb[23].mxu1 }
 0x151   : > { %v1107_v7 = vadd.f32 %v1828_v23, %v936_v34  ;;  %1138 = vst [vmem:[%s1835_s5 + $0x70] sm:$0xff] %v1090_v35  ;;  %v940_v42 = vadd.f32 %v939_v40, %v1804_v8  ;;  %v1093_v43 = vadd.f32 %v1868_v57, %v1015_v41 }
 0x152   : > { %1154 = vst [vmem:[%s1835_s5 + $0xf0] sm:$0xff] %v1106_v38  ;;  %v1109_v44 = vadd.f32 %v1826_v22, %v938_v6  ;;  %1147 = vst [vmem:[%s1835_s5 + $0xb8] sm:$0xff] %v1099_v39 }
 0x153   : > { %1155 = vst [vmem:[%s1835_s5 + $0xf8] sm:$0xff] %v1107_v7  ;;  %v1110_v45 = vadd.f32 %v1828_v23, %v940_v42  ;;  %1141 = vst [vmem:[%s1835_s5 + $0x88] sm:$0xff] %v1093_v43 }
 0x154   : > { %1157 = vst [vmem:[%s1835_s5 + $0x108] sm:$0xff] %v1109_v44 }
 0x155   : > { %1158 = vst [vmem:[%s1835_s5 + $0x110] sm:$0xff] %v1110_v45  ;;  %v943_v0 = vpop.f32.mrb[24].mxu0  ;;  %v1450_v46 = vpop.f32.mrb[24].mxu1 }
 0x156   : > { %v944_v47 = vadd.f32 %v943_v0, %v1806_v9  ;;  %v1108_v8 = vadd.f32 %v1450_v46, %v1868_v57  ;;  %v945_v48 = vpop.f32.mrb[25].mxu0  ;;  %v1028_v49 = vpop.f32.mrb[25].mxu1 }
 0x157   : > { %v946_v50 = vadd.f32 %v945_v48, %v1808_v10  ;;  %v1102_v51 = vadd.f32 %v1868_v57, %v1028_v49  ;;  %v947_v52 = vpop.f32.mrb[26].mxu0  ;;  %v1451_v53 = vpop.f32.mrb[26].mxu1 }
 0x158   : > { %v1112_v54 = vadd.f32 %v1826_v22, %v944_v47  ;;  %1156 = vst [vmem:[%s1835_s5 + $0x100] sm:$0xff] %v1108_v8  ;;  %v948_v9 = vadd.f32 %v947_v52, %v1810_v12  ;;  %v1111_v55 = vadd.f32 %v1451_v53, %v1868_v57  ;;  %v949_v56 = vpop.f32.mrb[27].mxu0  ;;  %v1031_v58 = vpop.f32.mrb[27].mxu1 }
 0x159   : > { %v1113_v10 = vadd.f32 %v1828_v23, %v946_v50  ;;  %1150 = vst [vmem:[%s1835_s5 + $0xd0] sm:$0xff] %v1102_v51  ;;  %v950_v59 = vadd.f32 %v949_v56, %v1812_v13  ;;  %v1105_v60 = vadd.f32 %v1868_v57, %v1031_v58 }
 0x15a   : > { %1160 = vst [vmem:[%s1835_s5 + $0x120] sm:$0xff] %v1112_v54  ;;  %v1115_v61 = vadd.f32 %v1826_v22, %v948_v9  ;;  %1159 = vst [vmem:[%s1835_s5 + $0x118] sm:$0xff] %v1111_v55 }
 0x15b   : > { %1161 = vst [vmem:[%s1835_s5 + $0x128] sm:$0xff] %v1113_v10  ;;  %v1116_v62 = vadd.f32 %v1828_v23, %v950_v59  ;;  %1153 = vst [vmem:[%s1835_s5 + $0xe8] sm:$0xff] %v1105_v60 }
 0x15c   : > { %1163 = vst [vmem:[%s1835_s5 + $0x138] sm:$0xff] %v1115_v61 }
 0x15d   : > { %1164 = vst [vmem:[%s1835_s5 + $0x140] sm:$0xff] %v1116_v62  ;;  %v953_v12 = vpop.f32.mrb[28].mxu0  ;;  %v1454_v63 = vpop.f32.mrb[28].mxu1 }
 0x15e   : > { %v954_v1 = vadd.f32 %v953_v12, %v1818_v15  ;;  %v1120_v13 = vadd.f32 %v1454_v63, %v1868_v57  ;;  %v955_v11 = vpop.f32.mrb[29].mxu0  ;;  %v1044_v14 = vpop.f32.mrb[29].mxu1 }
 0x15f   : > { %v956_v17 = vadd.f32 %v955_v11, %v1820_v16  ;;  %v1114_v19 = vadd.f32 %v1868_v57, %v1044_v14  ;;  %v957_v2 = vpop.f32.mrb[30].mxu0  ;;  %v1455_v20 = vpop.f32.mrb[30].mxu1 }
 0x160   : > { %v1118_v24 = vadd.f32 %v1826_v22, %v954_v1  ;;  %1168 = vst [vmem:[%s1835_s5 + $0x160] sm:$0xff] %v1120_v13  ;;  %v958_v15 = vadd.f32 %v957_v2, %v1822_v18  ;;  %v1123_v25 = vadd.f32 %v1455_v20, %v1868_v57  ;;  %v959_v3 = vpop.f32.mrb[31].mxu0  ;;  %v1047_v26 = vpop.f32.mrb[31].mxu1 }
 0x161   : > { %v1119_v16 = vadd.f32 %v1828_v23, %v956_v17  ;;  %1162 = vst [vmem:[%s1835_s5 + $0x130] sm:$0xff] %v1114_v19  ;;  %v960_v27 = vadd.f32 %v959_v3, %v1824_v21  ;;  %v1117_v28 = vadd.f32 %v1868_v57, %v1047_v26 }
 0x162   : > { %1166 = vst [vmem:[%s1835_s5 + $0x150] sm:$0xff] %v1118_v24  ;;  %v1121_v29 = vadd.f32 %v1826_v22, %v958_v15  ;;  %1171 = vst [vmem:[%s1835_s5 + $0x178] sm:$0xff] %v1123_v25 }
 0x163   : > { %1167 = vst [vmem:[%s1835_s5 + $0x158] sm:$0xff] %v1119_v16  ;;  %v1122_v4 = vadd.f32 %v1828_v23, %v960_v27  ;;  %1165 = vst [vmem:[%s1835_s5 + $0x148] sm:$0xff] %v1117_v28 }
 0x164   : > { %1169 = vst [vmem:[%s1835_s5 + $0x168] sm:$0xff] %v1121_v29 }
 0x165   : > { %1170 = vst [vmem:[%s1835_s5 + $0x170] sm:$0xff] %v1122_v4 }
 0x166 PF: > { %s13_s12 = sadd.s32 1, %s1617_s12  }
 0x167   : > { %p10_p4 = scmp.ge.s32.totalorder %s13_s12, 4  }
 0x169   :  { %12 = sbr.rel (!%p10_p4) target bundleno = 1 (0x1), region = 67 }

// kernel: _lambda_.5
= control target key start
LH: loop header
LB: loop body
LE: loop exit
PB: predicated region body
PF: predicated region fallthrough
CT: control target
= control target key end

     0   :  { %10 = vsyncpa [#allocation4], 0  ;;  %s2961_s0 = inlined_call_operand.vmem [shape: f32[2,16,8,384], index: 0, kind: input, shape index: {}]   ;;  %s2962_s1 = inlined_call_operand.vmem [shape: bf16[2,128,384], index: 1, kind: input, shape index: {}]   ;;  %s2963_s2 = inlined_call_operand.vmem [shape: f32[2,1,384], index: 2, kind: input, shape index: {}]   ;;  %s2964_s3 = inlined_call_operand.vmem [shape: bf16[2,16,8,128], index: 3, kind: output, shape index: {0}]   ;;  %s2965_s4 = inlined_call_operand.hbm [shape: f32[2,8,128], index: 4, kind: output, shape index: {1}]  }
   0x1   :  { %12 = vsyncpa [#allocation4 + $0x1], 0  ;;  %s2349_s15 = smov 0   ;;  %s2351_s16 = smov 0  }
   0x2   :  { %s2353_s17 = smov 0   ;;  %s2355_s18 = smov 0  }
   0x3   :  { %s2357_s19 = smov 0   ;;  %s2359_s20 = smov 0  }
   0x4   :  { %s2361_s21 = smov 0   ;;  %s2363_s22 = smov 0  }
   0x5 LB: > { %2973 = sst [smem:[#allocation6_spill]] %s2289_s15  ;;  %s1669_s23 = sadd.s32 4294967295, %s2317_s22   ;;  %s2317_s22 = sphi %s2363_s22, %s18_s22   ;;  %s2313_s21 = sphi %s2361_s21, %s2991_s21   ;;  %s2309_s20 = sphi %s2359_s20, %s2990_s20   ;;  %s2305_s19 = sphi %s2357_s19, %s2989_s19   ;;  %s2301_s18 = sphi %s2355_s18, %s2988_s18   ;;  %s2297_s17 = sphi %s2353_s17, %s2987_s17   ;;  %s2293_s16 = sphi %s2351_s16, %s2993_s16   ;;  %s2289_s15 = sphi %s2349_s15, %s2992_s15  }
   0x6   : > { %2974 = sst [smem:[#allocation7_spill]] %s2297_s17  ;;  %s1670_s24 = sadd.s32 4294967294, %s2317_s22  }
   0x7   : > { %2975 = sst [smem:[#allocation8_spill]] %s2309_s20  ;;  %s27_s25 = sadd.s32 1, %s2309_s20 }
   0x8   : > { %2976 = sst [smem:[#allocation9_spill]] %s2313_s21  ;;  %p28_p0 = scmp.ge.s32.totalorder %s27_s25, 2 }
   0x9   : > { %s30_s26 = sadd.s32 1, %s2313_s21  ;;  %p171_p1 = scmp.ne.s32.totalorder %s2297_s17, %s2293_s16 }
   0xa   : > { %p172_p2 = scmp.eq.s32.totalorder %s1669_s23, 3  ;;  %s2995_s25 = smov (%p28_p0, %s27_s25), 0 }
   0xb   : > { %2977 = sst [smem:[#allocation10_spill]] %s2995_s25  ;;  %s2997_s26 = smov (!%p28_p0, %s30_s26), %s2313_s21 }
   0xc   : > { %p2398_p3 = por %p172_p2, %p171_p1  ;;  %p177_p4 = scmp.ne.s32.totalorder %s2293_s16, %s2289_s15 }
   0xd   : > { %p32_p5 = scmp.ge.s32.totalorder %s2997_s26, 2  ;;  %p178_p6 = scmp.eq.s32.totalorder %s1670_s24, 3 }
   0xe   : > { %p1677_p7 = scmp.ge.s32.totalorder %s2317_s22, 1  ;;  %p233_p8 = scmp.lt.s32.totalorder %s2317_s22, 5 }
   0xf   : > { %s2999_s26 = smov (%p32_p5, %s2997_s26), 0  ;;  %p2408_p9 = por %p178_p6, %p177_p4 }
  0x10   : > { %2979 = sst [smem:[#allocation11_spill]] %s2999_s26  ;;  %p234_p10 = pnand %p1677_p7, %p233_p8 }
  0x11   : > { %s2980_s28 = scalar_select %p2408_p9, 1, 0 }
  0x12   : > { %s158_s29 = ssub.s32 %s2313_s21, %s2999_s26  ;;  %s161_s30 = sadd.s32 1, %s2297_s17 }
  0x13   : > { %2981 = sst [smem:[#allocation12_spill]] %s2980_s28  ;;  %p159_p11 = scmp.eq.s32.totalorder %s158_s29, 0 }
  0x14   : > { %237 = sbr.rel (%p234_p10) target bundleno = 2208 (0x8a0), region = 32  ;;  %s2968_s6 = sand.u32 (!%p234_p10), 1, %s2293_s16  }
  0x15   : > { %s2416_s5 = scalar_select %p159_p11, %s2297_s17, %s161_s30  }
  0x16   : > { %s1679_s7 = sshll.u32 (!%p234_p10), %s2301_s18, 1  ;;  %s2422_s8 = sshll.u32 (!%p234_p10), %s2968_s6, 3 }
  0x17   : > { %2982 = sst [smem:[#allocation13_spill]] %s2416_s5  ;;  %s291_s9 = ssub.s32 (!%p234_p10), 1, %s1679_s7 }
  0x18   : > { %s292_s10 = smul.u32 (!%p234_p10), %s2305_s19, %s291_s9  ;;  %p295_p12 = scmp.lt.s32.totalorder (!%p234_p10), %s2305_s19, 1 }
  0x19   : > { %s289_s26 = scalar_lea.vmem (!%p234_p10), [#allocation3], %s2422_s8  ;;  %p1687_p0 = scmp.ne.s32.totalorder (!%p234_p10), %s2301_s18, 0 }
  0x1a   : > { %s293_s11 = sadd.s32 (!%p234_p10), %s2301_s18, %s292_s10 }
  0x1b   : > { %s1680_s12 = sshll.u32 %s293_s11, 3  ;;  %v2319_v0 = vmov (!%p1687_p0), 0.0  }
  0x1c   : > { %s296_s13 = scalar_select %p295_p12, %s2305_s19, 1 }
  0x1d   : > { %p297_p13 = scmp.lt.s32.totalorder %s1680_s12, 15  ;;  %341 = vst [vmem:[#allocation2] sm:$0xff] (!%p1687_p0), %v2319_v0 }
  0x1e   : > { %s2009_s14 = smul.u32 48, %s296_s13  ;;  %s1685_s23 = sshll.u32 %s296_s13, 4 }
  0x1f   : > { %s3001_s12 = smov (!%p297_p13, %s1680_s12), 15  ;;  %s2010_s24 = smul.u32 192, %s296_s13 }
  0x20   : > { %s2008_s29 = smul.u32 3, %s3001_s12  ;;  %s328_s30 = sadd.s32 %s1685_s23, %s3001_s12 }
  0x21   : > { %s2431_s21 = scalar_lea.vmem %s2962_s1, %s2010_s24  ;;  %s2011_s6 = smul.u32 3, %s296_s13 }
  0x22   : > { %s301_s7 = sadd.s32 %s2009_s14, %s2008_s29  ;;  %s1686_s9 = sshll.u32 %s328_s30, 2 }
  0x23   : > { %s1681_s20 = sshll.u32 %s301_s7, 3  ;;  %s2436_s5 = scalar_lea.vmem %s2963_s2, %s2011_s6 }
  0x24   : > { %s2441_s15 = scalar_lea.vmem %s2961_s0, %s1681_s20  ;;  %s2446_s25 = scalar_lea.vmem %s2964_s3, %s1686_s9 }
  0x25   : > { %340 = sbr.rel (%p1687_p0) target bundleno = 44 (0x2c), region = 36 }
  0x2c PF: > { %v2451_v1 = vld [vmem:[%s2431_s21 + $0x4] ss:$12 sps:$4 sm:$0xff]   ;;  %v2454_v2 = vld [vmem:[%s2431_s21] ss:$12 sps:$4 sm:$0xff]   ;;  %v2320_v3 = vmov 0.0   ;;  %v2321_v4 = vmov 0   ;;  %v376_v29 = vlaneseq }
  0x2d   : > { %1848 = vmatprep.subr.bf16.mxu1 %v2320_v3  ;;  %560 = vmatprep.mubr.bf16.mxu0 %v2321_v4  ;;  %v2460_v5 = vld [vmem:[%s2431_s21 + $0x1c] ss:$12 sps:$4 sm:$0xff]   ;;  %vm2322_vm0 = vmmov 0   ;;  %v2466_v6 = vld [vmem:[%s2431_s21 + $0x18] ss:$12 sps:$4 sm:$0xff]   ;;  %s1773_s17 = smul.u32 168, %s2305_s19 }
  0x2e   : > { %528 = vmatprep.subr.bf16.mxu0 %v2451_v1  ;;  %1864 = vmatprep.mubr.msk.bf16.mxu1 %vm2322_vm0, %v2320_v3  ;;  %v2470_v7 = vld [vmem:[%s2431_s21 + $0x34] ss:$12 sps:$4 sm:$0xff]   ;;  %v2474_v8 = vld [vmem:[%s2431_s21 + $0x30] ss:$12 sps:$4 sm:$0xff]   ;;  %v2478_v9 = vld [vmem:[%s2431_s21 + $0x4c] ss:$12 sps:$4 sm:$0xff]  }
  0x2f   : > { %529 = vmatpush1.bf16.msra.mxu0 %v2454_v2  ;;  %v2481_v10 = vld [vmem:[%s2431_s21 + $0x8] ss:$12 sps:$4 sm:$0xff]   ;;  %v2489_v12 = vld [vmem:[%s2431_s21 + $0x64] ss:$12 sps:$4 sm:$0xff]   ;;  %v2493_v13 = vld [vmem:[%s2431_s21 + $0x20] ss:$12 sps:$4 sm:$0xff]   ;;  %s395_s20 = scalar_lea.vmem %s2441_s15, %s1773_s17 }
  0x30   : > { %530 = vmatprep.subr.bf16.mxu0 %v2460_v5  ;;  %v2485_v11 = vld [vmem:[%s2431_s21 + $0x48] ss:$12 sps:$4 sm:$0xff]   ;;  %1849 = vmatpush3.bf16.msra.mxu1 %v2481_v10  ;;  %v2497_v14 = vld [vmem:[%s2431_s21 + $0x60] ss:$12 sps:$4 sm:$0xff]   ;;  %v2506_v16 = vld [vmem:[%s2431_s21 + $0x38] ss:$12 sps:$4 sm:$0xff]  }
  0x31   : > { %1850 = vmatprep.subr.bf16.mxu1 %v2320_v3  ;;  %v2501_v15 = vld [vmem:[%s2431_s21 + $0x7c] ss:$12 sps:$4 sm:$0xff]   ;;  %v2511_v17 = vld [vmem:[%s2431_s21 + $0x78] ss:$12 sps:$4 sm:$0xff]   ;;  %v2515_v18 = vld [vmem:[%s2431_s21 + $0x94] ss:$12 sps:$4 sm:$0xff]  }
  0x32   : > { %v2519_v19 = vld [vmem:[%s2431_s21 + $0x50] ss:$12 sps:$4 sm:$0xff]   ;;  %v2528_v21 = vld [vmem:[%s2431_s21 + $0xac] ss:$12 sps:$4 sm:$0xff]   ;;  %v2532_v22 = vld [vmem:[%s2431_s21 + $0x68] ss:$12 sps:$4 sm:$0xff]  }
  0x33   : > { %531 = vmatpush1.bf16.msra.mxu0 %v2466_v6  ;;  %v2524_v20 = vld [vmem:[%s2431_s21 + $0x90] ss:$12 sps:$4 sm:$0xff]   ;;  %v2537_v23 = vld [vmem:[%s2431_s21 + $0xa8] ss:$12 sps:$4 sm:$0xff]   ;;  %v2539_v24 = vld [vmem:[#allocation2] sm:$0xff]  ;;  %v377_v30 = vshrl.u32 %v376_v29, 7 }
  0x34   : > { %532 = vmatprep.subr.bf16.mxu0 %v2470_v7  ;;  %1851 = vmatpush3.bf16.msra.mxu1 %v2493_v13  ;;  %v2544_v25 = vld [vmem:[%s2431_s21 + $0x80] ss:$12 sps:$4 sm:$0xff]   ;;  %v399_v26 = vpack.c.bf16 %v2539_v24, %v2539_v24  ;;  %v2552_v27 = vld [vmem:[%s2431_s21 + $0x98] ss:$12 sps:$4 sm:$0xff]   ;;  %v2560_v28 = vld [vmem:[%s2431_s21 + $0xb0] ss:$12 sps:$4 sm:$0xff]  }
  0x35   : > { %1852 = vmatprep.subr.bf16.mxu1 %v2320_v3  ;;  %v378_v31 = vsub.s32 0, %v377_v30  ;;  %v374_v32 = vld [vmem:[%s2436_s5] sm:$0x7]  ;;  %v382_v33 = vsub.s32 1, %v377_v30  ;;  %v397_v43 = vld [vmem:[%s395_s20 + $0x8] sm:$0xff]  ;;  %v386_v54 = vsub.s32 2, %v377_v30 }
  0x36   : > { %v396_v36 = vld [vmem:[%s395_s20] sm:$0xff]  ;;  %v398_v60 = vld [vmem:[%s395_s20 + $0x10] sm:$0xff]  ;;  %s1774_s28 = smul.u32 28, %s2305_s19  ;;  %s1738_s12 = sshll.u32 %s2305_s19, 2 }
  0x37   : > { %533 = vmatpush1.bf16.msra.mxu0 %v2474_v8  ;;  %v2600_v34 = vrot.slane %v374_v32, %v378_v31  ;;  %v2603_v35 = vrot.slane %v374_v32, %v382_v33  ;;  %v2607_v55 = vrot.slane %v374_v32, %v386_v54  ;;  %s1717_s6 = smul.u32 120, %s2305_s19  ;;  %s1570_s23 = scalar_lea.vmem %s2446_s25, %s1738_s12 }
  0x38   : > { %534 = vmatprep.subr.bf16.mxu0 %v2478_v9  ;;  %1853 = vmatpush3.bf16.msra.mxu1 %v2506_v16  ;;  %s632_s5 = scalar_lea.vmem %s2446_s25, %s1774_s28  ;;  %s1723_s14 = smul.u32 20, %s2305_s19 }
  0x39   : > { %1854 = vmatprep.subr.bf16.mxu1 %v2320_v3  ;;  %s1552_s13 = scalar_lea.vmem %s2441_s15, %s1717_s6  ;;  %s1725_s29 = smul.u32 72, %s2305_s19 }
  0x3a   : > { %s1556_s24 = scalar_lea.vmem %s2446_s25, %s1723_s14  ;;  %s1731_s7 = smul.u32 12, %s2305_s19 }
  0x3b   : > { %535 = vmatpush1.bf16.msra.mxu0 %v2485_v11  ;;  %s1560_s30 = scalar_lea.vmem %s2441_s15, %s1725_s29  ;;  %s1566_s10 = smul.u32 24, %s2305_s19 }
  0x3c   : > { %536 = vmatprep.subr.bf16.mxu0 %v2489_v12  ;;  %1855 = vmatpush3.bf16.msra.mxu1 %v2519_v19  ;;  %s1564_s9 = scalar_lea.vmem %s2446_s25, %s1731_s7  ;;  %s975_s17 = ssub.s32 4, %s2305_s19 }
  0x3d   : > { %1856 = vmatprep.subr.bf16.mxu1 %v2320_v3  ;;  %s1567_s11 = scalar_lea.vmem %s2441_s15, %s1566_s10  ;;  %s1775_s20 = smul.u32 24, %s975_s17 }
  0x3e   : > { %s1760_s10 = smul.u32 4294967128, %s2305_s19  ;;  %p1768_p1 = scmp.ne.s32.totalorder %s2301_s18, 1 }
  0x3f   : > { %537 = vmatpush1.bf16.msra.mxu0 %v2497_v14  ;;  %s978_s28 = scalar_lea.vmem %s2441_s15, %s1775_s20 }
  0x40   : > { %538 = vmatprep.subr.bf16.mxu0 %v2501_v15  ;;  %1857 = vmatpush3.bf16.msra.mxu1 %v2532_v22 }
  0x41   : > { %1858 = vmatprep.subr.bf16.mxu1 %v2320_v3 }
  0x43   : > { %539 = vmatpush1.bf16.msra.mxu0 %v2511_v17 }
  0x44   : > { %540 = vmatprep.subr.bf16.mxu0 %v2515_v18  ;;  %1859 = vmatpush3.bf16.msra.mxu1 %v2544_v25 }
  0x45   : > { %1860 = vmatprep.subr.bf16.mxu1 %v2320_v3 }
  0x47   : > { %541 = vmatpush1.bf16.msra.mxu0 %v2524_v20 }
  0x48   : > { %542 = vmatprep.subr.bf16.mxu0 %v2528_v21  ;;  %1861 = vmatpush3.bf16.msra.mxu1 %v2552_v27 }
  0x49   : > { %1862 = vmatprep.subr.bf16.mxu1 %v2320_v3 }
  0x4b   : > { %543 = vmatpush1.bf16.msra.mxu0 %v2537_v23 }
  0x4c   : > { %642 = vmatprep.subr.bf16.mxu0 %v2451_v1  ;;  %1863 = vmatpush3.bf16.msra.mxu1 %v2560_v28 }
  0x4d   : > { %1868 = vmatprep.subr.bf16.mxu1 %v2320_v3 }
  0x4e   : > { %561 = vmatmul.mubr.bf16.vlgmr.msra.gmra.mrb[0].mxu0 %v399_v26 }
  0x4f   : > { %643 = vmatpush1.bf16.msra.mxu0 %v2454_v2  ;;  %674 = vmatprep.mubr.bf16.mxu0 %v2321_v4 }
  0x50   : > { %644 = vmatprep.subr.bf16.mxu0 %v2460_v5  ;;  %1865 = vmatmul.mubr.bf16.vlgmr.msra.gmra.mrb[0].mxu1 %v399_v26 }
  0x51   : > { %1869 = vmatpush3.bf16.msra.mxu1 %v2481_v10  ;;  %1884 = vmatprep.mubr.msk.bf16.mxu1 %vm2322_vm0, %v2320_v3 }
  0x52   : > { %1870 = vmatprep.subr.bf16.mxu1 %v2320_v3 }
  0x53   : > { %645 = vmatpush1.bf16.msra.mxu0 %v2466_v6 }
  0x54   : > { %646 = vmatprep.subr.bf16.mxu0 %v2470_v7 }
  0x55   : > { %1871 = vmatpush3.bf16.msra.mxu1 %v2493_v13 }
  0x56   : > { %1872 = vmatprep.subr.bf16.mxu1 %v2320_v3 }
  0x57   : > { %647 = vmatpush1.bf16.msra.mxu0 %v2474_v8 }
  0x58   : > { %648 = vmatprep.subr.bf16.mxu0 %v2478_v9 }
  0x59   : > { %1873 = vmatpush3.bf16.msra.mxu1 %v2506_v16 }
  0x5a   : > { %1874 = vmatprep.subr.bf16.mxu1 %v2320_v3 }
  0x5b   : > { %649 = vmatpush1.bf16.msra.mxu0 %v2485_v11 }
  0x5c   : > { %650 = vmatprep.subr.bf16.mxu0 %v2489_v12 }
  0x5d   : > { %1875 = vmatpush3.bf16.msra.mxu1 %v2519_v19 }
  0x5e   : > { %1876 = vmatprep.subr.bf16.mxu1 %v2320_v3 }
  0x5f   : > { %651 = vmatpush1.bf16.msra.mxu0 %v2497_v14 }
  0x60   : > { %652 = vmatprep.subr.bf16.mxu0 %v2501_v15 }
  0x61   : > { %1877 = vmatpush3.bf16.msra.mxu1 %v2532_v22 }
  0x62   : > { %1878 = vmatprep.subr.bf16.mxu1 %v2320_v3 }
  0x63   : > { %653 = vmatpush1.bf16.msra.mxu0 %v2511_v17 }
  0x64   : > { %654 = vmatprep.subr.bf16.mxu0 %v2515_v18 }
  0x65   : > { %1879 = vmatpush3.bf16.msra.mxu1 %v2544_v25 }
  0x66   : > { %1880 = vmatprep.subr.bf16.mxu1 %v2320_v3 }
  0x67   : > { %655 = vmatpush1.bf16.msra.mxu0 %v2524_v20 }
  0x68   : > { %656 = vmatprep.subr.bf16.mxu0 %v2528_v21 }
  0x69   : > { %1881 = vmatpush3.bf16.msra.mxu1 %v2552_v27 }
  0x6a   : > { %1882 = vmatprep.subr.bf16.mxu1 %v2320_v3 }
  0x6b   : > { %657 = vmatpush1.bf16.msra.mxu0 %v2537_v23 }
  0x6c   : > { %756 = vmatprep.subr.bf16.mxu0 %v2451_v1 }
  0x6d   : > { %1883 = vmatpush3.bf16.msra.mxu1 %v2560_v28 }
  0x6e   : > { %1888 = vmatprep.subr.bf16.mxu1 %v2320_v3 }
 0x121   : > { %v562_v37 = vpop.f32.mrb[0].mxu0 }
 0x122   : > { %v563_v38 = vadd.f32 %v562_v37, %v2600_v34  ;;  %v564_v39 = vpop.f32.mrb[1].mxu0 }
 0x123   : > { %v565_v40 = vadd.f32 %v564_v39, %v2603_v35  ;;  %v566_v41 = vpop.f32.mrb[2].mxu0  ;;  %v603_v47 = vpop.f32.mrb[0].mxu1 }
 0x124   : > { %v609_v42 = vadd.f32 %v563_v38, %v396_v36  ;;  %v567_v44 = vpop.f32.mrb[3].mxu0  ;;  %v1866_v49 = vpop.f32.mrb[1].mxu1  ;;  %v604_v58 = vadd.f32 %v603_v47, %v2607_v55 }
 0x125   : > { %v616_v46 = vadd.f32 %v565_v40, %v397_v43  ;;  %v606_v50 = vpop.f32.mrb[2].mxu1  ;;  %v1719_v44 = vld [vmem:[%s1552_s13 + $0x20] sm:$0xff] }
 0x126   : > { %v1714_v45 = vmul.f32 -1.442695, %v609_v42  ;;  %v1867_v51 = vpop.f32.mrb[3].mxu1 }
 0x127   : > { %v1715_v48 = vmul.f32 -1.442695, %v616_v46 }
 0x128   : > { %2119 = vpow2.f32 %v1714_v45 }
 0x129   : > { %2121 = vpow2.f32 %v1715_v48 }
 0x132   : > { %v2120_v52 = vpop.eup %2119 }
 0x133   : > { %v613_v53 = vadd.f32 1.0, %v2120_v52  ;;  %v2122_v56 = vpop.eup %2121 }
 0x134   : > { %v620_v57 = vadd.f32 1.0, %v2122_v56 }
 0x135   : > { %2123 = vrcp.f32 %v613_v53 }
 0x136   : > { %2125 = vrcp.f32 %v620_v57  ;;  %v1720_v57 = vld [vmem:[%s1552_s13 + $0x28] sm:$0xff] }
 0x13f   : > { %v2124_v59 = vpop.eup %2123 }
 0x140   : > { %v623_v61 = vmul.f32 %v2124_v59, %v604_v58  ;;  %v2126_v63 = vpop.eup %2125 }
 0x141   : > { %v626_v0 = vsub.f32 1.0, %v2126_v63  ;;  %v628_v30 = vmul.f32 %v2126_v63, %v2539_v24  ;;  %v1718_v24 = vld [vmem:[%s1552_s13 + $0x18] sm:$0xff]  ;;  %s1744_s13 = smul.u32 4294967224, %s2305_s19 }
 0x142   : > { %v624_v62 = vadd.f32 %v623_v61, %v398_v60 }
 0x143   : > { %s1578_s14 = scalar_lea.vmem %s2441_s15, %s1744_s13 }
 0x144   : > { %2127 = vtanh.f32 %v624_v62 }
 0x14e   : > { %v2128_v26 = vpop.eup %2127 }
 0x14f   : > { %v627_v29 = vmul.f32 %v2128_v26, %v626_v0 }
 0x151   : > { %v2612_v31 = vadd.f32 %v628_v30, %v627_v29  ;;  %v1726_v30 = vld [vmem:[%s1560_s30 + $0x30] sm:$0xff] }
 0x153   : > { %v630_v32 = vpack.c.bf16 %v2612_v31, %v2612_v31 }
 0x155   : > { %633 = vst [vmem:[%s632_s5] sm:$0xf] %v630_v32  ;;  %675 = vmatmul.mubr.bf16.vlgmr.msra.gmra.mrb[4].mxu0 %v630_v32  ;;  %1885 = vmatmul.mubr.bf16.vlgmr.msra.gmra.mrb[4].mxu1 %v630_v32  ;;  %s1743_s5 = sshll.u32 %s975_s17, 2 }
 0x156   : > { %757 = vmatpush1.bf16.msra.mxu0 %v2454_v2  ;;  %1889 = vmatpush3.bf16.msra.mxu1 %v2481_v10  ;;  %s1086_s6 = scalar_lea.vmem %s2446_s25, %s1743_s5 }
 0x157   : > { %758 = vmatprep.subr.bf16.mxu0 %v2460_v5  ;;  %1890 = vmatprep.subr.bf16.mxu1 %v2320_v3 }
 0x158   : > { %788 = vmatprep.mubr.bf16.mxu0 %v2321_v4  ;;  %1904 = vmatprep.mubr.msk.bf16.mxu1 %vm2322_vm0, %v2320_v3 }
 0x15a   : > { %759 = vmatpush1.bf16.msra.mxu0 %v2466_v6  ;;  %1891 = vmatpush3.bf16.msra.mxu1 %v2493_v13 }
 0x15b   : > { %760 = vmatprep.subr.bf16.mxu0 %v2470_v7  ;;  %1892 = vmatprep.subr.bf16.mxu1 %v2320_v3 }
 0x15e   : > { %761 = vmatpush1.bf16.msra.mxu0 %v2474_v8  ;;  %1893 = vmatpush3.bf16.msra.mxu1 %v2506_v16 }
 0x15f   : > { %762 = vmatprep.subr.bf16.mxu0 %v2478_v9  ;;  %1894 = vmatprep.subr.bf16.mxu1 %v2320_v3 }
 0x162   : > { %763 = vmatpush1.bf16.msra.mxu0 %v2485_v11  ;;  %1895 = vmatpush3.bf16.msra.mxu1 %v2519_v19 }
 0x163   : > { %764 = vmatprep.subr.bf16.mxu0 %v2489_v12  ;;  %1896 = vmatprep.subr.bf16.mxu1 %v2320_v3 }
 0x166   : > { %765 = vmatpush1.bf16.msra.mxu0 %v2497_v14  ;;  %1897 = vmatpush3.bf16.msra.mxu1 %v2532_v22 }
 0x167   : > { %766 = vmatprep.subr.bf16.mxu0 %v2501_v15  ;;  %1898 = vmatprep.subr.bf16.mxu1 %v2320_v3 }
 0x16a   : > { %767 = vmatpush1.bf16.msra.mxu0 %v2511_v17  ;;  %1899 = vmatpush3.bf16.msra.mxu1 %v2544_v25 }
 0x16b   : > { %768 = vmatprep.subr.bf16.mxu0 %v2515_v18  ;;  %1900 = vmatprep.subr.bf16.mxu1 %v2320_v3 }
 0x16e   : > { %769 = vmatpush1.bf16.msra.mxu0 %v2524_v20  ;;  %1901 = vmatpush3.bf16.msra.mxu1 %v2552_v27 }
 0x16f   : > { %770 = vmatprep.subr.bf16.mxu0 %v2528_v21  ;;  %1902 = vmatprep.subr.bf16.mxu1 %v2320_v3 }
 0x172   : > { %771 = vmatpush1.bf16.msra.mxu0 %v2537_v23  ;;  %1903 = vmatpush3.bf16.msra.mxu1 %v2560_v28 }
 0x173   : > { %869 = vmatprep.subr.bf16.mxu0 %v2451_v1  ;;  %1908 = vmatprep.subr.bf16.mxu1 %v2320_v3 }
 0x228   : > { %v676_v33 = vpop.f32.mrb[4].mxu0  ;;  %v717_v36 = vpop.f32.mrb[4].mxu1 }
 0x229   : > { %v677_v37 = vadd.f32 %v676_v33, %v2600_v34  ;;  %v678_v38 = vpop.f32.mrb[5].mxu0  ;;  %v1886_v39 = vpop.f32.mrb[5].mxu1  ;;  %v718_v54 = vadd.f32 %v717_v36, %v2607_v55 }
 0x22a   : > { %v679_v40 = vadd.f32 %v678_v38, %v2603_v35  ;;  %v680_v41 = vpop.f32.mrb[6].mxu0  ;;  %v720_v42 = vpop.f32.mrb[6].mxu1 }
 0x22b   : > { %v723_v43 = vadd.f32 %v1718_v24, %v677_v37  ;;  %v681_v45 = vpop.f32.mrb[7].mxu0  ;;  %v1887_v46 = vpop.f32.mrb[7].mxu1  ;;  %v1727_v41 = vld [vmem:[%s1560_s30 + $0x38] sm:$0xff] }
 0x22c   : > { %v730_v48 = vadd.f32 %v1719_v44, %v679_v40 }
 0x22d   : > { %v1721_v47 = vmul.f32 -1.442695, %v723_v43 }
 0x22e   : > { %v1722_v49 = vmul.f32 -1.442695, %v730_v48 }
 0x22f   : > { %2129 = vpow2.f32 %v1721_v47 }
 0x230   : > { %2131 = vpow2.f32 %v1722_v49 }
 0x239   : > { %v2130_v50 = vpop.eup %2129 }
 0x23a   : > { %v727_v51 = vadd.f32 1.0, %v2130_v50  ;;  %v2132_v52 = vpop.eup %2131 }
 0x23b   : > { %v734_v53 = vadd.f32 1.0, %v2132_v52 }
 0x23c   : > { %2133 = vrcp.f32 %v727_v51 }
 0x23d   : > { %2135 = vrcp.f32 %v734_v53  ;;  %v1728_v53 = vld [vmem:[%s1560_s30 + $0x40] sm:$0xff]  ;;  %s1752_s30 = smul.u32 4294967176, %s2305_s19 }
 0x23f   : > { %s1586_s7 = scalar_lea.vmem %s2441_s15, %s1752_s30 }
 0x246   : > { %v2134_v56 = vpop.eup %2133 }
 0x247   : > { %v737_v58 = vmul.f32 %v2134_v56, %v718_v54  ;;  %v2136_v60 = vpop.eup %2135 }
 0x248   : > { %v740_v61 = vsub.f32 1.0, %v2136_v60  ;;  %v742_v0 = vmul.f32 %v2136_v60, %v2612_v31 }
 0x249   : > { %v738_v59 = vadd.f32 %v1720_v57, %v737_v58 }
 0x24b   : > { %2137 = vtanh.f32 %v738_v59 }
 0x255   : > { %v2138_v62 = vpop.eup %2137 }
 0x256   : > { %v741_v63 = vmul.f32 %v2138_v62, %v740_v61 }
 0x258   : > { %v2659_v26 = vadd.f32 %v742_v0, %v741_v63  ;;  %v1733_v0 = vld [vmem:[%s1567_s11 + $0x48] sm:$0xff] }
 0x25a   : > { %v744_v29 = vpack.c.bf16 %v2659_v26, %v2659_v26 }
 0x25c   : > { %1724 = vst [vmem:[%s1556_s24 + $0x4] sm:$0xf] %v744_v29  ;;  %789 = vmatmul.mubr.bf16.vlgmr.msra.gmra.mrb[8].mxu0 %v744_v29  ;;  %1905 = vmatmul.mubr.bf16.vlgmr.msra.gmra.mrb[8].mxu1 %v744_v29  ;;  %s1750_s24 = smul.u32 4294967284, %s2305_s19 }
 0x25d   : > { %870 = vmatpush1.bf16.msra.mxu0 %v2454_v2  ;;  %1909 = vmatpush3.bf16.msra.mxu1 %v2481_v10 }
 0x25e   : > { %871 = vmatprep.subr.bf16.mxu0 %v2460_v5  ;;  %1910 = vmatprep.subr.bf16.mxu1 %v2320_v3  ;;  %s1582_s29 = scalar_lea.vmem %s2446_s25, %s1750_s24 }
 0x25f   : > { %901 = vmatprep.mubr.bf16.mxu0 %v2321_v4  ;;  %1924 = vmatprep.mubr.msk.bf16.mxu1 %vm2322_vm0, %v2320_v3 }
 0x261   : > { %872 = vmatpush1.bf16.msra.mxu0 %v2466_v6  ;;  %1911 = vmatpush3.bf16.msra.mxu1 %v2493_v13 }
 0x262   : > { %873 = vmatprep.subr.bf16.mxu0 %v2470_v7  ;;  %1912 = vmatprep.subr.bf16.mxu1 %v2320_v3 }
 0x265   : > { %874 = vmatpush1.bf16.msra.mxu0 %v2474_v8  ;;  %1913 = vmatpush3.bf16.msra.mxu1 %v2506_v16 }
 0x266   : > { %875 = vmatprep.subr.bf16.mxu0 %v2478_v9  ;;  %1914 = vmatprep.subr.bf16.mxu1 %v2320_v3 }
 0x269   : > { %876 = vmatpush1.bf16.msra.mxu0 %v2485_v11  ;;  %1915 = vmatpush3.bf16.msra.mxu1 %v2519_v19 }
 0x26a   : > { %877 = vmatprep.subr.bf16.mxu0 %v2489_v12  ;;  %1916 = vmatprep.subr.bf16.mxu1 %v2320_v3 }
 0x26d   : > { %878 = vmatpush1.bf16.msra.mxu0 %v2497_v14  ;;  %1917 = vmatpush3.bf16.msra.mxu1 %v2532_v22 }
 0x26e   : > { %879 = vmatprep.subr.bf16.mxu0 %v2501_v15  ;;  %1918 = vmatprep.subr.bf16.mxu1 %v2320_v3 }
 0x271   : > { %880 = vmatpush1.bf16.msra.mxu0 %v2511_v17  ;;  %1919 = vmatpush3.bf16.msra.mxu1 %v2544_v25 }
 0x272   : > { %881 = vmatprep.subr.bf16.mxu0 %v2515_v18  ;;  %1920 = vmatprep.subr.bf16.mxu1 %v2320_v3 }
 0x275   : > { %882 = vmatpush1.bf16.msra.mxu0 %v2524_v20  ;;  %1921 = vmatpush3.bf16.msra.mxu1 %v2552_v27 }
 0x276   : > { %883 = vmatprep.subr.bf16.mxu0 %v2528_v21  ;;  %1922 = vmatprep.subr.bf16.mxu1 %v2320_v3 }
 0x279   : > { %884 = vmatpush1.bf16.msra.mxu0 %v2537_v23  ;;  %1923 = vmatpush3.bf16.msra.mxu1 %v2560_v28 }
 0x27a   : > { %982 = vmatprep.subr.bf16.mxu0 %v2451_v1  ;;  %1928 = vmatprep.subr.bf16.mxu1 %v2320_v3 }
 0x32f   : > { %v790_v31 = vpop.f32.mrb[8].mxu0  ;;  %v831_v32 = vpop.f32.mrb[8].mxu1 }
 0x330   : > { %v791_v24 = vadd.f32 %v790_v31, %v2600_v34  ;;  %v792_v33 = vpop.f32.mrb[9].mxu0  ;;  %v1906_v36 = vpop.f32.mrb[9].mxu1  ;;  %v832_v51 = vadd.f32 %v831_v32, %v2607_v55 }
 0x331   : > { %v793_v37 = vadd.f32 %v792_v33, %v2603_v35  ;;  %v794_v38 = vpop.f32.mrb[10].mxu0  ;;  %v834_v39 = vpop.f32.mrb[10].mxu1 }
 0x332   : > { %v837_v40 = vadd.f32 %v1726_v30, %v791_v24  ;;  %v795_v42 = vpop.f32.mrb[11].mxu0  ;;  %v1907_v43 = vpop.f32.mrb[11].mxu1  ;;  %v1734_v38 = vld [vmem:[%s1567_s11 + $0x50] sm:$0xff] }
 0x333   : > { %v844_v45 = vadd.f32 %v1727_v41, %v793_v37 }
 0x334   : > { %v1729_v44 = vmul.f32 -1.442695, %v837_v40 }
 0x335   : > { %v1730_v46 = vmul.f32 -1.442695, %v844_v45 }
 0x336   : > { %2139 = vpow2.f32 %v1729_v44 }
 0x337   : > { %2141 = vpow2.f32 %v1730_v46 }
 0x340   : > { %v2140_v47 = vpop.eup %2139 }
 0x341   : > { %v841_v48 = vadd.f32 1.0, %v2140_v47  ;;  %v2142_v49 = vpop.eup %2141 }
 0x342   : > { %v848_v50 = vadd.f32 1.0, %v2142_v49 }
 0x343   : > { %2143 = vrcp.f32 %v841_v48 }
 0x344   : > { %2145 = vrcp.f32 %v848_v50  ;;  %v1735_v50 = vld [vmem:[%s1567_s11 + $0x58] sm:$0xff]  ;;  %s1594_s11 = scalar_lea.vmem %s2441_s15, %s1760_s10  ;;  %s1766_s15 = smul.u32 4294967268, %s2305_s19 }
 0x346   : > { %s1598_s12 = scalar_lea.vmem %s2446_s25, %s1766_s15 }
 0x34d   : > { %v2144_v52 = vpop.eup %2143 }
 0x34e   : > { %v851_v54 = vmul.f32 %v2144_v52, %v832_v51  ;;  %v2146_v57 = vpop.eup %2145 }
 0x34f   : > { %v854_v58 = vsub.f32 1.0, %v2146_v57  ;;  %v856_v61 = vmul.f32 %v2146_v57, %v2659_v26 }
 0x350   : > { %v852_v56 = vadd.f32 %v1728_v53, %v851_v54 }
 0x352   : > { %2147 = vtanh.f32 %v852_v56 }
 0x35c   : > { %v2148_v59 = vpop.eup %2147 }
 0x35d   : > { %v855_v60 = vmul.f32 %v2148_v59, %v854_v58 }
 0x35f   : > { %v2706_v62 = vadd.f32 %v856_v61, %v855_v60  ;;  %v979_v61 = vld [vmem:[%s978_s28] sm:$0xff] }
 0x361   : > { %v858_v63 = vpack.c.bf16 %v2706_v62, %v2706_v62 }
 0x363   : > { %1732 = vst [vmem:[%s1564_s9 + $0x8] sm:$0xf] %v858_v63  ;;  %902 = vmatmul.mubr.bf16.vlgmr.msra.gmra.mrb[12].mxu0 %v858_v63  ;;  %1925 = vmatmul.mubr.bf16.vlgmr.msra.gmra.mrb[12].mxu1 %v858_v63 }
 0x364   : > { %983 = vmatpush1.bf16.msra.mxu0 %v2454_v2  ;;  %1929 = vmatpush3.bf16.msra.mxu1 %v2481_v10 }
 0x365   : > { %984 = vmatprep.subr.bf16.mxu0 %v2460_v5  ;;  %1930 = vmatprep.subr.bf16.mxu1 %v2320_v3 }
 0x366   : > { %1014 = vmatprep.mubr.bf16.mxu0 %v2321_v4  ;;  %1944 = vmatprep.mubr.msk.bf16.mxu1 %vm2322_vm0, %v2320_v3 }
 0x368   : > { %985 = vmatpush1.bf16.msra.mxu0 %v2466_v6  ;;  %1931 = vmatpush3.bf16.msra.mxu1 %v2493_v13 }
 0x369   : > { %986 = vmatprep.subr.bf16.mxu0 %v2470_v7  ;;  %1932 = vmatprep.subr.bf16.mxu1 %v2320_v3 }
 0x36c   : > { %987 = vmatpush1.bf16.msra.mxu0 %v2474_v8  ;;  %1933 = vmatpush3.bf16.msra.mxu1 %v2506_v16 }
 0x36d   : > { %988 = vmatprep.subr.bf16.mxu0 %v2478_v9  ;;  %1934 = vmatprep.subr.bf16.mxu1 %v2320_v3 }
 0x370   : > { %989 = vmatpush1.bf16.msra.mxu0 %v2485_v11  ;;  %1935 = vmatpush3.bf16.msra.mxu1 %v2519_v19 }
 0x371   : > { %990 = vmatprep.subr.bf16.mxu0 %v2489_v12  ;;  %1936 = vmatprep.subr.bf16.mxu1 %v2320_v3 }
 0x374   : > { %991 = vmatpush1.bf16.msra.mxu0 %v2497_v14  ;;  %1937 = vmatpush3.bf16.msra.mxu1 %v2532_v22 }
 0x375   : > { %992 = vmatprep.subr.bf16.mxu0 %v2501_v15  ;;  %1938 = vmatprep.subr.bf16.mxu1 %v2320_v3 }
 0x378   : > { %993 = vmatpush1.bf16.msra.mxu0 %v2511_v17  ;;  %1939 = vmatpush3.bf16.msra.mxu1 %v2544_v25 }
 0x379   : > { %994 = vmatprep.subr.bf16.mxu0 %v2515_v18  ;;  %1940 = vmatprep.subr.bf16.mxu1 %v2320_v3 }
 0x37c   : > { %995 = vmatpush1.bf16.msra.mxu0 %v2524_v20  ;;  %1941 = vmatpush3.bf16.msra.mxu1 %v2552_v27 }
 0x37d   : > { %996 = vmatprep.subr.bf16.mxu0 %v2528_v21  ;;  %1942 = vmatprep.subr.bf16.mxu1 %v2320_v3 }
 0x380   : > { %997 = vmatpush1.bf16.msra.mxu0 %v2537_v23  ;;  %1943 = vmatpush3.bf16.msra.mxu1 %v2560_v28 }
 0x381   : > { %1096 = vmatprep.subr.bf16.mxu0 %v2451_v1  ;;  %1948 = vmatprep.subr.bf16.mxu1 %v2320_v3 }
 0x436   : > { %v903_v26 = vpop.f32.mrb[12].mxu0  ;;  %v944_v29 = vpop.f32.mrb[12].mxu1 }
 0x437   : > { %v904_v30 = vadd.f32 %v903_v26, %v2600_v34  ;;  %v905_v31 = vpop.f32.mrb[13].mxu0  ;;  %v1926_v32 = vpop.f32.mrb[13].mxu1  ;;  %v945_v48 = vadd.f32 %v944_v29, %v2607_v55 }
 0x438   : > { %v906_v24 = vadd.f32 %v905_v31, %v2603_v35  ;;  %v907_v33 = vpop.f32.mrb[14].mxu0  ;;  %v947_v36 = vpop.f32.mrb[14].mxu1 }
 0x439   : > { %v950_v37 = vadd.f32 %v1733_v0, %v904_v30  ;;  %v908_v39 = vpop.f32.mrb[15].mxu0  ;;  %v1927_v40 = vpop.f32.mrb[15].mxu1  ;;  %v980_v33 = vld [vmem:[%s978_s28 + $0x8] sm:$0xff] }
 0x43a   : > { %v957_v42 = vadd.f32 %v1734_v38, %v906_v24 }
 0x43b   : > { %v1736_v41 = vmul.f32 -1.442695, %v950_v37 }
 0x43c   : > { %v1737_v43 = vmul.f32 -1.442695, %v957_v42 }
 0x43d   : > { %2149 = vpow2.f32 %v1736_v41 }
 0x43e   : > { %2151 = vpow2.f32 %v1737_v43 }
 0x447   : > { %v2150_v44 = vpop.eup %2149 }
 0x448   : > { %v954_v45 = vadd.f32 1.0, %v2150_v44  ;;  %v2152_v46 = vpop.eup %2151 }
 0x449   : > { %v961_v47 = vadd.f32 1.0, %v2152_v46  ;;  %v981_v46 = vld [vmem:[%s978_s28 + $0x10] sm:$0xff] }
 0x44a   : > { %2153 = vrcp.f32 %v954_v45 }
 0x44b   : > { %2155 = vrcp.f32 %v961_v47 }
 0x454   : > { %v2154_v49 = vpop.eup %2153 }
 0x455   : > { %v964_v51 = vmul.f32 %v2154_v49, %v945_v48  ;;  %v2156_v53 = vpop.eup %2155 }
 0x456   : > { %v967_v54 = vsub.f32 1.0, %v2156_v53  ;;  %v969_v58 = vmul.f32 %v2156_v53, %v2706_v62 }
 0x457   : > { %v965_v52 = vadd.f32 %v1735_v50, %v964_v51 }
 0x459   : > { %2157 = vtanh.f32 %v965_v52 }
 0x463   : > { %v2158_v56 = vpop.eup %2157 }
 0x464   : > { %v968_v57 = vmul.f32 %v2158_v56, %v967_v54 }
 0x466   : > { %v2753_v59 = vadd.f32 %v969_v58, %v968_v57  ;;  %v1747_v57 = vld [vmem:[%s1578_s14 + $0x88] sm:$0xff] }
 0x468   : > { %v971_v60 = vpack.c.bf16 %v2753_v59, %v2753_v59 }
 0x46a   : > { %1739 = vst [vmem:[%s1570_s23 + $0xc] sm:$0xf] %v971_v60  ;;  %1015 = vmatmul.mubr.bf16.vlgmr.msra.gmra.mrb[16].mxu0 %v971_v60  ;;  %1945 = vmatmul.mubr.bf16.vlgmr.msra.gmra.mrb[16].mxu1 %v971_v60 }
 0x46b   : > { %1097 = vmatpush1.bf16.msra.mxu0 %v2454_v2  ;;  %1949 = vmatpush3.bf16.msra.mxu1 %v2481_v10 }
 0x46c   : > { %1098 = vmatprep.subr.bf16.mxu0 %v2460_v5  ;;  %1950 = vmatprep.subr.bf16.mxu1 %v2320_v3 }
 0x46d   : > { %1128 = vmatprep.mubr.bf16.mxu0 %v2321_v4  ;;  %1964 = vmatprep.mubr.msk.bf16.mxu1 %vm2322_vm0, %v2320_v3 }
 0x46f   : > { %1099 = vmatpush1.bf16.msra.mxu0 %v2466_v6  ;;  %1951 = vmatpush3.bf16.msra.mxu1 %v2493_v13 }
 0x470   : > { %1100 = vmatprep.subr.bf16.mxu0 %v2470_v7  ;;  %1952 = vmatprep.subr.bf16.mxu1 %v2320_v3 }
 0x473   : > { %1101 = vmatpush1.bf16.msra.mxu0 %v2474_v8  ;;  %1953 = vmatpush3.bf16.msra.mxu1 %v2506_v16 }
 0x474   : > { %1102 = vmatprep.subr.bf16.mxu0 %v2478_v9  ;;  %1954 = vmatprep.subr.bf16.mxu1 %v2320_v3 }
 0x477   : > { %1103 = vmatpush1.bf16.msra.mxu0 %v2485_v11  ;;  %1955 = vmatpush3.bf16.msra.mxu1 %v2519_v19 }
 0x478   : > { %1104 = vmatprep.subr.bf16.mxu0 %v2489_v12  ;;  %1956 = vmatprep.subr.bf16.mxu1 %v2320_v3 }
 0x47b   : > { %1105 = vmatpush1.bf16.msra.mxu0 %v2497_v14  ;;  %1957 = vmatpush3.bf16.msra.mxu1 %v2532_v22 }
 0x47c   : > { %1106 = vmatprep.subr.bf16.mxu0 %v2501_v15  ;;  %1958 = vmatprep.subr.bf16.mxu1 %v2320_v3 }
 0x47f   : > { %1107 = vmatpush1.bf16.msra.mxu0 %v2511_v17  ;;  %1959 = vmatpush3.bf16.msra.mxu1 %v2544_v25 }
 0x480   : > { %1108 = vmatprep.subr.bf16.mxu0 %v2515_v18  ;;  %1960 = vmatprep.subr.bf16.mxu1 %v2320_v3 }
 0x483   : > { %1109 = vmatpush1.bf16.msra.mxu0 %v2524_v20  ;;  %1961 = vmatpush3.bf16.msra.mxu1 %v2552_v27 }
 0x484   : > { %1110 = vmatprep.subr.bf16.mxu0 %v2528_v21  ;;  %1962 = vmatprep.subr.bf16.mxu1 %v2320_v3 }
 0x487   : > { %1111 = vmatpush1.bf16.msra.mxu0 %v2537_v23  ;;  %1963 = vmatpush3.bf16.msra.mxu1 %v2560_v28 }
 0x488   : > { %1210 = vmatprep.subr.bf16.mxu0 %v2451_v1  ;;  %1968 = vmatprep.subr.bf16.mxu1 %v2320_v3 }
 0x53d   : > { %v1016_v62 = vpop.f32.mrb[16].mxu0  ;;  %v1057_v63 = vpop.f32.mrb[16].mxu1 }
 0x53e   : > { %v1017_v0 = vadd.f32 %v1016_v62, %v2600_v34  ;;  %v1018_v26 = vpop.f32.mrb[17].mxu0  ;;  %v1946_v29 = vpop.f32.mrb[17].mxu1  ;;  %v1058_v44 = vadd.f32 %v1057_v63, %v2607_v55 }
 0x53f   : > { %v1019_v30 = vadd.f32 %v1018_v26, %v2603_v35  ;;  %v1020_v31 = vpop.f32.mrb[18].mxu0  ;;  %v1060_v32 = vpop.f32.mrb[18].mxu1 }
 0x540   : > { %v1063_v24 = vadd.f32 %v1017_v0, %v979_v61  ;;  %v1021_v1 = vpop.f32.mrb[19].mxu0  ;;  %v1947_v36 = vpop.f32.mrb[19].mxu1  ;;  %v2201_v31 = vld [vmem:[%s2431_s21 + $0x8] ss:$12 sps:$4 sm:$0xff]  }
 0x541   : > { %v1070_v38 = vadd.f32 %v1019_v30, %v980_v33  ;;  %v2200_v30 = vld [vmem:[%s2431_s21] ss:$12 sps:$4 sm:$0xff]   ;;  %v2202_v32 = vld [vmem:[%s2431_s21 + $0x1c] ss:$12 sps:$4 sm:$0xff]  }
 0x542   : > { %v1741_v37 = vmul.f32 -1.442695, %v1063_v24  ;;  %v2203_v24 = vld [vmem:[%s2431_s21 + $0x18] ss:$12 sps:$4 sm:$0xff]   ;;  %v2204_v33 = vld [vmem:[%s2431_s21 + $0x20] ss:$12 sps:$4 sm:$0xff]  }
 0x543   : > { %v1742_v39 = vmul.f32 -1.442695, %v1070_v38  ;;  %v2205_v1 = vld [vmem:[%s2431_s21 + $0x34] ss:$12 sps:$4 sm:$0xff]   ;;  %v2206_v36 = vld [vmem:[%s2431_s21 + $0x30] ss:$12 sps:$4 sm:$0xff]  }
 0x544   : > { %2159 = vpow2.f32 %v1741_v37  ;;  %v2207_v37 = vld [vmem:[%s2431_s21 + $0x38] ss:$12 sps:$4 sm:$0xff]   ;;  %v2209_v38 = vld [vmem:[%s2431_s21 + $0x48] ss:$12 sps:$4 sm:$0xff]  }
 0x545   : > { %2161 = vpow2.f32 %v1742_v39  ;;  %v2210_v39 = vld [vmem:[%s2431_s21 + $0x50] ss:$12 sps:$4 sm:$0xff]  }
 0x54e   : > { %v2160_v40 = vpop.eup %2159 }
 0x54f   : > { %v1067_v41 = vadd.f32 1.0, %v2160_v40  ;;  %v2162_v42 = vpop.eup %2161  ;;  %v2211_v40 = vld [vmem:[%s2431_s21 + $0x64] ss:$12 sps:$4 sm:$0xff]  }
 0x550   : > { %v1074_v43 = vadd.f32 1.0, %v2162_v42  ;;  %v2213_v42 = vld [vmem:[%s2431_s21 + $0x68] ss:$12 sps:$4 sm:$0xff]  }
 0x551   : > { %2163 = vrcp.f32 %v1067_v41  ;;  %v2212_v41 = vld [vmem:[%s2431_s21 + $0x60] ss:$12 sps:$4 sm:$0xff]  }
 0x552   : > { %2165 = vrcp.f32 %v1074_v43  ;;  %v2214_v43 = vld [vmem:[%s2431_s21 + $0x7c] ss:$12 sps:$4 sm:$0xff]  }
 0x55b   : > { %v2164_v45 = vpop.eup %2163 }
 0x55c   : > { %v1077_v47 = vmul.f32 %v2164_v45, %v1058_v44  ;;  %v2166_v49 = vpop.eup %2165  ;;  %v2215_v44 = vld [vmem:[%s2431_s21 + $0x78] ss:$12 sps:$4 sm:$0xff]   ;;  %v2216_v45 = vld [vmem:[%s2431_s21 + $0x80] ss:$12 sps:$4 sm:$0xff]  }
 0x55d   : > { %v1080_v50 = vsub.f32 1.0, %v2166_v49  ;;  %v1082_v53 = vmul.f32 %v2166_v49, %v2753_v59  ;;  %v2220_v49 = vld [vmem:[%s2431_s21 + $0xac] ss:$12 sps:$4 sm:$0xff]  }
 0x55e   : > { %v1078_v48 = vadd.f32 %v1077_v47, %v981_v46  ;;  %v2217_v46 = vld [vmem:[%s2431_s21 + $0x94] ss:$12 sps:$4 sm:$0xff]   ;;  %v2218_v47 = vld [vmem:[%s2431_s21 + $0x90] ss:$12 sps:$4 sm:$0xff]  }
 0x560   : > { %2167 = vtanh.f32 %v1078_v48  ;;  %v2219_v48 = vld [vmem:[%s2431_s21 + $0x98] ss:$12 sps:$4 sm:$0xff]  }
 0x56a   : > { %v2168_v51 = vpop.eup %2167 }
 0x56b   : > { %v1081_v52 = vmul.f32 %v2168_v51, %v1080_v50  ;;  %v2221_v50 = vld [vmem:[%s2431_s21 + $0xa8] ss:$12 sps:$4 sm:$0xff]   ;;  %v2222_v51 = vld [vmem:[%s2431_s21 + $0xb0] ss:$12 sps:$4 sm:$0xff]  }
 0x56d   : > { %v2803_v54 = vadd.f32 %v1082_v53, %v1081_v52  ;;  %v1753_v52 = vld [vmem:[%s1586_s7 + $0x90] sm:$0xff] }
 0x56f   : > { %v1084_v56 = vpack.c.bf16 %v2803_v54, %v2803_v54 }
 0x571   : > { %1087 = vst [vmem:[%s1086_s6] sm:$0xf] %v1084_v56  ;;  %1129 = vmatmul.mubr.bf16.vlgmr.msra.gmra.mrb[20].mxu0 %v1084_v56  ;;  %1965 = vmatmul.mubr.bf16.vlgmr.msra.gmra.mrb[20].mxu1 %v1084_v56 }
 0x572   : > { %1211 = vmatpush1.bf16.msra.mxu0 %v2454_v2  ;;  %1969 = vmatpush3.bf16.msra.mxu1 %v2481_v10  ;;  %v2199_v2 = vld [vmem:[%s2431_s21 + $0x4] ss:$12 sps:$4 sm:$0xff]  }
 0x573   : > { %1212 = vmatprep.subr.bf16.mxu0 %v2460_v5  ;;  %1970 = vmatprep.subr.bf16.mxu1 %v2320_v3  ;;  %v1745_v5 = vld [vmem:[%s1578_s14 + $0x78] sm:$0xff] }
 0x574   : > { %1242 = vmatprep.mubr.bf16.mxu0 %v2321_v4  ;;  %1984 = vmatprep.mubr.msk.bf16.mxu1 %vm2322_vm0, %v2320_v3 }
 0x576   : > { %1213 = vmatpush1.bf16.msra.mxu0 %v2466_v6  ;;  %1971 = vmatpush3.bf16.msra.mxu1 %v2493_v13 }
 0x577   : > { %1214 = vmatprep.subr.bf16.mxu0 %v2470_v7  ;;  %1972 = vmatprep.subr.bf16.mxu1 %v2320_v3 }
 0x57a   : > { %1215 = vmatpush1.bf16.msra.mxu0 %v2474_v8  ;;  %1973 = vmatpush3.bf16.msra.mxu1 %v2506_v16 }
 0x57b   : > { %1216 = vmatprep.subr.bf16.mxu0 %v2478_v9  ;;  %1974 = vmatprep.subr.bf16.mxu1 %v2320_v3 }
 0x57e   : > { %1217 = vmatpush1.bf16.msra.mxu0 %v2485_v11  ;;  %1975 = vmatpush3.bf16.msra.mxu1 %v2519_v19 }
 0x57f   : > { %1218 = vmatprep.subr.bf16.mxu0 %v2489_v12  ;;  %1976 = vmatprep.subr.bf16.mxu1 %v2320_v3 }
 0x582   : > { %1219 = vmatpush1.bf16.msra.mxu0 %v2497_v14  ;;  %1977 = vmatpush3.bf16.msra.mxu1 %v2532_v22 }
 0x583   : > { %1220 = vmatprep.subr.bf16.mxu0 %v2501_v15  ;;  %1978 = vmatprep.subr.bf16.mxu1 %v2320_v3  ;;  %v1746_v15 = vld [vmem:[%s1578_s14 + $0x80] sm:$0xff] }
 0x586   : > { %1221 = vmatpush1.bf16.msra.mxu0 %v2511_v17  ;;  %1979 = vmatpush3.bf16.msra.mxu1 %v2544_v25 }
 0x587   : > { %1222 = vmatprep.subr.bf16.mxu0 %v2515_v18  ;;  %1980 = vmatprep.subr.bf16.mxu1 %v2320_v3 }
 0x58a   : > { %1223 = vmatpush1.bf16.msra.mxu0 %v2524_v20  ;;  %1981 = vmatpush3.bf16.msra.mxu1 %v2552_v27 }
 0x58b   : > { %1224 = vmatprep.subr.bf16.mxu0 %v2528_v21  ;;  %1982 = vmatprep.subr.bf16.mxu1 %v2320_v3 }
 0x58e   : > { %1225 = vmatpush1.bf16.msra.mxu0 %v2537_v23  ;;  %1983 = vmatpush3.bf16.msra.mxu1 %v2560_v28 }
 0x58f   : > { %1324 = vmatprep.subr.bf16.mxu0 %v2199_v2  ;;  %1988 = vmatprep.subr.bf16.mxu1 %v2320_v3 }
 0x644   : > { %v1130_v6 = vpop.f32.mrb[20].mxu0  ;;  %v1171_v7 = vpop.f32.mrb[20].mxu1 }
 0x645   : > { %v1131_v8 = vadd.f32 %v1130_v6, %v2600_v34  ;;  %v1132_v9 = vpop.f32.mrb[21].mxu0  ;;  %v1966_v10 = vpop.f32.mrb[21].mxu1  ;;  %v1172_v27 = vadd.f32 %v1171_v7, %v2607_v55 }
 0x646   : > { %v1133_v11 = vadd.f32 %v1132_v9, %v2603_v35  ;;  %v1134_v12 = vpop.f32.mrb[22].mxu0  ;;  %v1174_v13 = vpop.f32.mrb[22].mxu1  ;;  %v1754_v10 = vld [vmem:[%s1586_s7 + $0x98] sm:$0xff] }
 0x647   : > { %v1177_v14 = vadd.f32 %v1745_v5, %v1131_v8  ;;  %v1135_v16 = vpop.f32.mrb[23].mxu0  ;;  %v1967_v17 = vpop.f32.mrb[23].mxu1 }
 0x648   : > { %v1184_v19 = vadd.f32 %v1746_v15, %v1133_v11 }
 0x649   : > { %v1748_v18 = vmul.f32 -1.442695, %v1177_v14 }
 0x64a   : > { %v1749_v20 = vmul.f32 -1.442695, %v1184_v19 }
 0x64b   : > { %2169 = vpow2.f32 %v1748_v18 }
 0x64c   : > { %2171 = vpow2.f32 %v1749_v20 }
 0x655   : > { %v2170_v21 = vpop.eup %2169 }
 0x656   : > { %v1181_v22 = vadd.f32 1.0, %v2170_v21  ;;  %v2172_v23 = vpop.eup %2171  ;;  %v1755_v21 = vld [vmem:[%s1586_s7 + $0xa0] sm:$0xff] }
 0x657   : > { %v1188_v25 = vadd.f32 1.0, %v2172_v23 }
 0x658   : > { %2173 = vrcp.f32 %v1181_v22 }
 0x659   : > { %2175 = vrcp.f32 %v1188_v25 }
 0x662   : > { %v2174_v28 = vpop.eup %2173 }
 0x663   : > { %v1191_v58 = vmul.f32 %v2174_v28, %v1172_v27  ;;  %v2176_v60 = vpop.eup %2175 }
 0x664   : > { %v1194_v61 = vsub.f32 1.0, %v2176_v60  ;;  %v1196_v0 = vmul.f32 %v2176_v60, %v2803_v54 }
 0x665   : > { %v1192_v59 = vadd.f32 %v1747_v57, %v1191_v58 }
 0x667   : > { %2177 = vtanh.f32 %v1192_v59 }
 0x671   : > { %v2178_v62 = vpop.eup %2177 }
 0x672   : > { %v1195_v63 = vmul.f32 %v2178_v62, %v1194_v61  ;;  %v1761_v61 = vld [vmem:[%s1594_s11 + $0xa8] sm:$0xff] }
 0x674   : > { %v2850_v26 = vadd.f32 %v1196_v0, %v1195_v63 }
 0x676   : > { %v1198_v29 = vpack.c.bf16 %v2850_v26, %v2850_v26 }
 0x678   : > { %1751 = vst [vmem:[%s1582_s29 + $0x14] sm:$0xf] %v1198_v29  ;;  %1243 = vmatmul.mubr.bf16.vlgmr.msra.gmra.mrb[24].mxu0 %v1198_v29  ;;  %1985 = vmatmul.mubr.bf16.vlgmr.msra.gmra.mrb[24].mxu1 %v1198_v29 }
 0x679   : > { %1325 = vmatpush1.bf16.msra.mxu0 %v2200_v30  ;;  %1989 = vmatpush3.bf16.msra.mxu1 %v2201_v31 }
 0x67a   : > { %1326 = vmatprep.subr.bf16.mxu0 %v2202_v32  ;;  %1990 = vmatprep.subr.bf16.mxu1 %v2320_v3 }
 0x67b   : > { %1356 = vmatprep.mubr.bf16.mxu0 %v2321_v4  ;;  %2004 = vmatprep.mubr.msk.bf16.mxu1 %vm2322_vm0, %v2320_v3  ;;  %v2208_v4 = vld [vmem:[%s2431_s21 + $0x4c] ss:$12 sps:$4 sm:$0xff]   ;;  %s1758_s21 = smul.u32 4294967276, %s2305_s19 }
 0x67d   : > { %1327 = vmatpush1.bf16.msra.mxu0 %v2203_v24  ;;  %1991 = vmatpush3.bf16.msra.mxu1 %v2204_v33  ;;  %s1590_s9 = scalar_lea.vmem %s2446_s25, %s1758_s21  ;;  %v1762_v33 = vld [vmem:[%s1594_s11 + $0xb0] sm:$0xff] }
 0x67e   : > { %1328 = vmatprep.subr.bf16.mxu0 %v2205_v1  ;;  %1992 = vmatprep.subr.bf16.mxu1 %v2320_v3 }
 0x681   : > { %1329 = vmatpush1.bf16.msra.mxu0 %v2206_v36  ;;  %1993 = vmatpush3.bf16.msra.mxu1 %v2207_v37 }
 0x682   : > { %1330 = vmatprep.subr.bf16.mxu0 %v2208_v4  ;;  %1994 = vmatprep.subr.bf16.mxu1 %v2320_v3 }
 0x685   : > { %1331 = vmatpush1.bf16.msra.mxu0 %v2209_v38  ;;  %1995 = vmatpush3.bf16.msra.mxu1 %v2210_v39 }
 0x686   : > { %1332 = vmatprep.subr.bf16.mxu0 %v2211_v40  ;;  %1996 = vmatprep.subr.bf16.mxu1 %v2320_v3 }
 0x689   : > { %1333 = vmatpush1.bf16.msra.mxu0 %v2212_v41  ;;  %1997 = vmatpush3.bf16.msra.mxu1 %v2213_v42 }
 0x68a   : > { %1334 = vmatprep.subr.bf16.mxu0 %v2214_v43  ;;  %1998 = vmatprep.subr.bf16.mxu1 %v2320_v3  ;;  %v1763_v43 = vld [vmem:[%s1594_s11 + $0xb8] sm:$0xff] }
 0x68d   : > { %1335 = vmatpush1.bf16.msra.mxu0 %v2215_v44  ;;  %1999 = vmatpush3.bf16.msra.mxu1 %v2216_v45 }
 0x68e   : > { %1336 = vmatprep.subr.bf16.mxu0 %v2217_v46  ;;  %2000 = vmatprep.subr.bf16.mxu1 %v2320_v3 }
 0x691   : > { %1337 = vmatpush1.bf16.msra.mxu0 %v2218_v47  ;;  %2001 = vmatpush3.bf16.msra.mxu1 %v2219_v48 }
 0x692   : > { %1338 = vmatprep.subr.bf16.mxu0 %v2220_v49  ;;  %2002 = vmatprep.subr.bf16.mxu1 %v2320_v3 }
 0x695   : > { %1339 = vmatpush1.bf16.msra.mxu0 %v2221_v50  ;;  %2003 = vmatpush3.bf16.msra.mxu1 %v2222_v51 }
 0x74b   : > { %v1244_v53 = vpop.f32.mrb[24].mxu0  ;;  %v1285_v54 = vpop.f32.mrb[24].mxu1 }
 0x74c   : > { %v1245_v56 = vadd.f32 %v1244_v53, %v2600_v34  ;;  %v1246_v2 = vpop.f32.mrb[25].mxu0  ;;  %v1986_v5 = vpop.f32.mrb[25].mxu1  ;;  %v1286_v19 = vadd.f32 %v1285_v54, %v2607_v55 }
 0x74d   : > { %v1247_v6 = vadd.f32 %v1246_v2, %v2603_v35  ;;  %v1248_v7 = vpop.f32.mrb[26].mxu0  ;;  %v1288_v8 = vpop.f32.mrb[26].mxu1 }
 0x74e   : > { %v1291_v9 = vadd.f32 %v1753_v52, %v1245_v56  ;;  %v1249_v3 = vpop.f32.mrb[27].mxu0  ;;  %v1987_v11 = vpop.f32.mrb[27].mxu1 }
 0x74f   : > { %v1298_v13 = vadd.f32 %v1754_v10, %v1247_v6 }
 0x750   : > { %v1756_v12 = vmul.f32 -1.442695, %v1291_v9 }
 0x751   : > { %v1757_v14 = vmul.f32 -1.442695, %v1298_v13 }
 0x752   : > { %2179 = vpow2.f32 %v1756_v12 }
 0x753   : > { %2181 = vpow2.f32 %v1757_v14 }
 0x75c   : > { %v2180_v15 = vpop.eup %2179 }
 0x75d   : > { %v1295_v16 = vadd.f32 1.0, %v2180_v15  ;;  %v2182_v17 = vpop.eup %2181 }
 0x75e   : > { %v1302_v18 = vadd.f32 1.0, %v2182_v17 }
 0x75f   : > { %2183 = vrcp.f32 %v1295_v16 }
 0x760   : > { %2185 = vrcp.f32 %v1302_v18 }
 0x769   : > { %v2184_v20 = vpop.eup %2183 }
 0x76a   : > { %v1305_v22 = vmul.f32 %v2184_v20, %v1286_v19  ;;  %v2186_v25 = vpop.eup %2185 }
 0x76b   : > { %v1308_v27 = vsub.f32 1.0, %v2186_v25  ;;  %v1310_v58 = vmul.f32 %v2186_v25, %v2850_v26 }
 0x76c   : > { %v1306_v23 = vadd.f32 %v1755_v21, %v1305_v22 }
 0x76e   : > { %2187 = vtanh.f32 %v1306_v23 }
 0x778   : > { %v2188_v28 = vpop.eup %2187 }
 0x779   : > { %v1309_v57 = vmul.f32 %v2188_v28, %v1308_v27 }
 0x77b   : > { %v1311_v59 = vadd.f32 %v1310_v58, %v1309_v57 }
 0x77d   : > { %v1312_v60 = vpack.c.bf16 %v1311_v59, %v1311_v59 }
 0x77f   : > { %1759 = vst [vmem:[%s1590_s9 + $0x18] sm:$0xf] %v1312_v60  ;;  %1357 = vmatmul.mubr.bf16.vlgmr.msra.gmra.mrb[28].mxu0 %v1312_v60  ;;  %2005 = vmatmul.mubr.bf16.vlgmr.msra.gmra.mrb[28].mxu1 %v1312_v60 }
 0x852   : > { %v1358_v62 = vpop.f32.mrb[28].mxu0  ;;  %v1399_v63 = vpop.f32.mrb[28].mxu1 }
 0x853   : > { %v1359_v0 = vadd.f32 %v1358_v62, %v2600_v34  ;;  %v1360_v29 = vpop.f32.mrb[29].mxu0  ;;  %v2006_v30 = vpop.f32.mrb[29].mxu1 }
 0x854   : > { %v1361_v31 = vadd.f32 %v1360_v29, %v2603_v35  ;;  %v1362_v32 = vpop.f32.mrb[30].mxu0  ;;  %v1402_v24 = vpop.f32.mrb[30].mxu1  ;;  %v1400_v35 = vadd.f32 %v1399_v63, %v2607_v55 }
 0x855   : > { %v1405_v26 = vadd.f32 %v1761_v61, %v1359_v0  ;;  %v1363_v1 = vpop.f32.mrb[31].mxu0  ;;  %v2007_v36 = vpop.f32.mrb[31].mxu1 }
 0x856   : > { %v1412_v4 = vadd.f32 %v1762_v33, %v1361_v31 }
 0x857   : > { %v1764_v37 = vmul.f32 -1.442695, %v1405_v26 }
 0x858   : > { %v1765_v38 = vmul.f32 -1.442695, %v1412_v4 }
 0x859   : > { %2189 = vpow2.f32 %v1764_v37 }
 0x85a   : > { %2191 = vpow2.f32 %v1765_v38 }
 0x863   : > { %v2190_v39 = vpop.eup %2189 }
 0x864   : > { %v1409_v40 = vadd.f32 1.0, %v2190_v39  ;;  %v2192_v34 = vpop.eup %2191 }
 0x865   : > { %v1416_v41 = vadd.f32 1.0, %v2192_v34 }
 0x866   : > { %2193 = vrcp.f32 %v1409_v40 }
 0x867   : > { %2195 = vrcp.f32 %v1416_v41 }
 0x870   : > { %v2194_v42 = vpop.eup %2193 }
 0x871   : > { %v1419_v44 = vmul.f32 %v2194_v42, %v1400_v35  ;;  %v2196_v46 = vpop.eup %2195 }
 0x872   : > { %v1422_v47 = vsub.f32 1.0, %v2196_v46  ;;  %v1424_v50 = vmul.f32 %v2196_v46, %v1311_v59 }
 0x873   : > { %v1420_v45 = vadd.f32 %v1763_v43, %v1419_v44 }
 0x875   : > { %2197 = vtanh.f32 %v1420_v45 }
 0x87f   : > { %v2198_v48 = vpop.eup %2197 }
 0x880   : > { %v1423_v49 = vmul.f32 %v2198_v48, %v1422_v47  ;;  %1434 = sbr.rel (%p1768_p1) target bundleno = 2183 (0x887), region = 40 }
 0x882   : > { %v1425_v51 = vadd.f32 %v1424_v50, %v1423_v49 }
 0x884   : > { %v1426_v52 = vpack.c.bf16 %v1425_v51, %v1425_v51  ;;  %1430 = vst [vmem:[#allocation2] sm:$0xff] %v1425_v51  ;;  %1435 = vst [vmem:[%s289_s26] sm:$0xff] (!%p1768_p1), %v1425_v51 }
 0x886   : > { %1767 = vst [vmem:[%s1598_s12 + $0x1c] sm:$0xf] %v1426_v52 }
 0x887 PF: > { %s1770_s23 = sshll.u32 %s2305_s19, 7  ;;  %s1471_s25 = sshll.u32 %s289_s26, 4  ;;  %s1472_s25 = int_to_ptr.vmem [resolvable:$true] %s1471_s25 }
 0x888   : > { %s2910_s28 = scalar_lea.hbm %s2965_s4, %s1770_s23  ;;  %s2983_s5 = sand.u32 1, %s2293_s16  }
 0x889   : > { %s1450_s18 = scalar_lea.sflag [#allocation4], %s2983_s5  ;;  %s2223_s6 = scalar_lea.vmem %s1472_s25, 128 }
 0x88a   : > { %p2224_p2 = scmp.ne.s32.totalorder %s1472_s25, %s2223_s6  ;;  %s2323_s13 = smov [#allocation3]  }
 0x88b   : > { %s2227_s14 = sshll.u32 %s2323_s13, 4  ;;  %s2228_s14 = int_to_ptr.vmem [resolvable:$false] %s2227_s14 }
 0x88c   : > { %p2225_p4 = pnand %p2224_p2, %p2398_p3  ;;  %s2229_s24 = scalar_lea.vmem %s2228_s14, 256 }
 0x88d   : > { %p2230_p6 = scmp.lt.s32.totalorder %s1472_s25, %s2228_s14  ;;  %p2231_p7 = scmp.lt.s32.totalorder %s2229_s24, %s2223_s6 }
 0x88e   : > { %p2226_p5 = pneg %p2225_p4 }
 0x88f   : > { %p2232_p8 = por %p2231_p7, %p2230_p6 }
 0x891   : > { %p2233_p10 = pnand %p2232_p8, %p2226_p5 }
 0x893   : > { %2236 = shalt.err (!%p2233_p10)
}
 0x894   : > { %s2237_s19 = scalar_lea.hbm %s2910_s28, 128  ;;  %s2241_s29 = scalar_lea.hbm %s2965_s4, 256 }
 0x895   : > { %p2238_p11 = scmp.ne.s32.totalorder %s2910_s28, %s2237_s19  ;;  %p2242_p0 = scmp.lt.u32.totalorder %s2910_s28, %s2965_s4 }
 0x896   : > { %p2243_p1 = scmp.lt.u32.totalorder %s2241_s29, %s2237_s19  ;;  %p2245_p4 = scmp.lt.u32.totalorder %s2237_s19, %s2910_s28 }
 0x897   : > { %p2239_p12 = pnand %p2238_p11, %p2398_p3 }
 0x898   : > { %p2244_p2 = por %p2243_p1, %p2242_p0 }
 0x899   : > { %p2240_p13 = pneg %p2239_p12 }
 0x89a   : > { %p2246_p5 = por %p2245_p4, %p2244_p2 }
 0x89c   : > { %p2247_p6 = pnand %p2246_p5, %p2240_p13 }
 0x89e   : > { %2250 = shalt.err (!%p2247_p6)
}
 0x89f   : > { %2012 = dma.vmem_to_hbm [thread:$0]  (%p2398_p3), %s1472_s25, 128, %s2910_s28, %s1450_s18  }
 0x8a0 PF: > { %s2984_s21 = sld [smem:[#allocation6_spill]]  ;;  %p2018_p7 = scmp.ge.s32.totalorder %s2317_s22, 2 }
 0x8a2   : > { %p2015_p8 = pnand %p2018_p7, %p2408_p9 }
 0x8a6   : > { %s1499_s10 = sand.u32 1, %s2984_s21  }
 0x8a7   : > { %s1500_s11 = scalar_lea.sflag [#allocation4], %s1499_s10 }
 0x8a8   : > { %2284 = dma.done.wait (!%p2015_p8), %s1500_s11, 128  }
 0x8a9   : > { %2286 = vsyncadd (!%p2015_p8), %s1500_s11, 4294967168  ;;  %s18_s22 = sadd.s32 1, %s2317_s22   ;;  %s2986_s12 = sld [smem:[#allocation7_spill]] }
 0x8aa   : > { %p15_p10 = scmp.ge.s32.totalorder %s18_s22, 6   ;;  %s2987_s17 = sld [smem:[#allocation13_spill]] }
 0x8ab   : > { %s2988_s18 = sld [smem:[#allocation8_spill]]  ;;  %s2989_s19 = sld [smem:[#allocation9_spill]] }
 0x8ac   : > { %s2990_s20 = sld [smem:[#allocation10_spill]]  ;;  %s2991_s21 = sld [smem:[#allocation11_spill]] }
 0x8ad   : > { %s2992_s15 = smov %s2293_s16  ;;  %17 = sbr.rel (!%p15_p10) target bundleno = 5 (0x5), region = 109 }
 0x8af   : > { %s2993_s16 = smov %s2986_s12 }
 0x8b4   :  { %1505 = vsyncpa [#allocation4], 1 }
 0x8b5   :  { %1507 = vsyncpa [#allocation4 + $0x1], 1 }

// kernel: _lambda_.7
= control target key start
LH: loop header
LB: loop body
LE: loop exit
PB: predicated region body
PF: predicated region fallthrough
CT: control target
= control target key end

     0   :  { %10 = vsyncpa [#allocation4], 0  ;;  %s2946_s0 = inlined_call_operand.vmem [shape: f32[2,16,8,384], index: 0, kind: input, shape index: {}]   ;;  %s2947_s1 = inlined_call_operand.vmem [shape: bf16[2,128,384], index: 1, kind: input, shape index: {}]   ;;  %s2948_s2 = inlined_call_operand.vmem [shape: f32[2,1,384], index: 2, kind: input, shape index: {}]   ;;  %s2949_s3 = inlined_call_operand.hbm [shape: bf16[2,16,8,128], index: 3, kind: output, shape index: {0}]   ;;  %s2950_s4 = inlined_call_operand.vmem [shape: f32[2,8,128], index: 4, kind: output, shape index: {1}]  }
   0x1   :  { %12 = vsyncpa [#allocation4 + $0x1], 0  ;;  %s2317_s15 = smov 0   ;;  %s2319_s16 = smov 0  }
   0x2   :  { %s2321_s17 = smov 0   ;;  %s2323_s18 = smov 0  }
   0x3   :  { %s2325_s19 = smov 0   ;;  %s2327_s20 = smov 0  }
   0x4   :  { %s2329_s21 = smov 0   ;;  %s2331_s22 = smov 0  }
   0x5 LB: > { %2961 = sst [smem:[#allocation6_spill]] %s2255_s15  ;;  %s1633_s23 = sadd.s32 4294967295, %s2283_s22   ;;  %s2283_s22 = sphi %s2331_s22, %s18_s22   ;;  %s2279_s21 = sphi %s2329_s21, %s2981_s21   ;;  %s2275_s20 = sphi %s2327_s20, %s2985_s20   ;;  %s2271_s19 = sphi %s2325_s19, %s2979_s19   ;;  %s2267_s18 = sphi %s2323_s18, %s2978_s18   ;;  %s2263_s17 = sphi %s2321_s17, %s2984_s17   ;;  %s2259_s16 = sphi %s2319_s16, %s2983_s16   ;;  %s2255_s15 = sphi %s2317_s15, %s2982_s15  }
   0x6   : > { %2962 = sst [smem:[#allocation7_spill]] %s2263_s17  ;;  %s1634_s24 = sadd.s32 4294967294, %s2283_s22  }
   0x7   : > { %2963 = sst [smem:[#allocation8_spill]] %s2275_s20  ;;  %s27_s25 = sadd.s32 1, %s2275_s20 }
   0x8   : > { %2964 = sst [smem:[#allocation9_spill]] %s2279_s21  ;;  %s30_s26 = sadd.s32 1, %s2279_s21 }
   0x9   : > { %2965 = sst [smem:[#allocation10_spill]] %s2283_s22  ;;  %p28_p0 = scmp.ge.s32.totalorder %s27_s25, 2 }
   0xa   : > { %s1637_s27 = sshll.u32 %s2275_s20, 1  ;;  %s135_s29 = sadd.s32 1, %s2263_s17 }
   0xb   : > { %s123_s28 = ssub.s32 1, %s1637_s27  ;;  %s2987_s25 = smov (%p28_p0, %s27_s25), 0 }
   0xc   : > { %2966 = sst [smem:[#allocation11_spill]] %s2987_s25  ;;  %s2989_s26 = smov (!%p28_p0, %s30_s26), %s2279_s21 }
   0xd   : > { %s124_s30 = smul.u32 %s2279_s21, %s123_s28  ;;  %s1638_s5 = sshll.u32 %s2987_s25, 1 }
   0xe   : > { %p32_p1 = scmp.ge.s32.totalorder %s2989_s26, 2  ;;  %s127_s6 = ssub.s32 1, %s1638_s5 }
   0xf   : > { %s125_s7 = sadd.s32 %s2275_s20, %s124_s30  ;;  %p145_p2 = scmp.ne.s32.totalorder %s2263_s17, %s2259_s16 }
  0x10   : > { %s2991_s26 = smov (%p32_p1, %s2989_s26), 0  ;;  %p146_p3 = scmp.eq.s32.totalorder %s1633_s23, 3 }
  0x11   : > { %2967 = sst [smem:[#allocation12_spill]] %s2991_s26  ;;  %p151_p4 = scmp.ne.s32.totalorder %s2259_s16, %s2255_s15 }
  0x12   : > { %s128_s8 = smul.u32 %s127_s6, %s2991_s26  ;;  %s130_s9 = ssub.s32 %s2279_s21, %s2991_s26 }
  0x13   : > { %p2378_p5 = por %p146_p3, %p145_p2  ;;  %p152_p6 = scmp.eq.s32.totalorder %s1634_s24, 3 }
  0x14   : > { %s129_s11 = sadd.s32 %s128_s8, %s2987_s25  ;;  %p1641_p7 = scmp.ge.s32.totalorder %s2283_s22, 1 }
  0x15   : > { %s131_s12 = ssub.s32 %s125_s7, %s129_s11  ;;  %p2384_p8 = por %p152_p6, %p151_p4 }
  0x16   : > { %s132_s14 = sor.u32 %s131_s12, %s130_s9  ;;  %p233_p9 = scmp.lt.s32.totalorder %s2283_s22, 5 }
  0x17   : > { %s2969_s13 = scalar_select %p2384_p8, 1, 0 }
  0x18   : > { %p133_p10 = scmp.eq.s32.totalorder %s132_s14, 0  ;;  %p234_p11 = pnand %p1641_p7, %p233_p9 }
  0x19   : > { %2970 = sst [smem:[#allocation13_spill]] %s2969_s13  ;;  %s2953_s24 = sand.u32 (!%p234_p11), 1, %s2259_s16  }
  0x1a   : > { %s2390_s23 = scalar_select %p133_p10, %s2263_s17, %s135_s29  }
  0x1b   : > { %237 = sbr.rel (%p234_p11) target bundleno = 2214 (0x8a6), region = 32  ;;  %s1643_s27 = sshll.u32 (!%p234_p11), %s2267_s18, 1 }
  0x1c   : > { %2971 = sst [smem:[#allocation14_spill]] %s2390_s23  ;;  %s1642_s28 = sshll.u32 (!%p234_p11), %s2953_s24, 5 }
  0x1d   : > { %s282_s30 = ssub.s32 (!%p234_p11), 1, %s1643_s27  ;;  %p286_p12 = scmp.lt.s32.totalorder (!%p234_p11), %s2271_s19, 1 }
  0x1e   : > { %s283_s5 = smul.u32 (!%p234_p11), %s2271_s19, %s282_s30  ;;  %p1648_p0 = scmp.ne.s32.totalorder (!%p234_p11), %s2267_s18, 0 }
  0x20   : > { %s284_s6 = sadd.s32 (!%p234_p11), %s2267_s18, %s283_s5 }
  0x21   : > { %s2399_s7 = sshll.u32 (!%p234_p11), %s284_s6, 3 }
  0x22   : > { %s287_s29 = scalar_select %p286_p12, %s2271_s19, 1 }
  0x23   : > { %p288_p13 = scmp.lt.s32.totalorder %s2399_s7, 15  ;;  %v2285_v0 = vmov (!%p1648_p0), 0.0  }
  0x24   : > { %s1973_s8 = smul.u32 48, %s287_s29  ;;  %s1647_s9 = sshll.u32 %s287_s29, 3  ;;  %323 = vst [vmem:[#allocation2] sm:$0xff] (!%p1648_p0), %v2285_v0 }
  0x25   : > { %s289_s11 = scalar_select %p288_p13, %s2399_s7, 15 }
  0x26   : > { %s1974_s12 = smul.u32 192, %s287_s29  ;;  %s2407_s25 = scalar_lea.vmem %s2950_s4, %s1647_s9 }
  0x27   : > { %s1972_s24 = smul.u32 3, %s289_s11  ;;  %s2424_s9 = scalar_lea.vmem [#allocation3], %s1642_s28 }
  0x28   : > { %s2412_s5 = scalar_lea.vmem %s2947_s1, %s1974_s12  ;;  %s1975_s6 = smul.u32 3, %s287_s29 }
  0x29   : > { %s292_s21 = sadd.s32 %s1973_s8, %s1972_s24  ;;  %322 = sbr.rel (%p1648_p0) target bundleno = 48 (0x30), region = 36 }
  0x2a   : > { %s1645_s20 = sshll.u32 %s292_s21, 3  ;;  %s2417_s13 = scalar_lea.vmem %s2948_s2, %s1975_s6 }
  0x2b   : > { %s2422_s26 = scalar_lea.vmem %s2946_s0, %s1645_s20 }
  0x30 PF: > { %v2428_v1 = vld [vmem:[%s2412_s5 + $0x4] ss:$12 sps:$4 sm:$0xff]   ;;  %v2431_v2 = vld [vmem:[%s2412_s5] ss:$12 sps:$4 sm:$0xff]   ;;  %v2286_v3 = vmov 0.0   ;;  %v2287_v4 = vmov 0   ;;  %v358_v29 = vlaneseq }
  0x31   : > { %1812 = vmatprep.subr.bf16.mxu1 %v2286_v3  ;;  %542 = vmatprep.mubr.bf16.mxu0 %v2287_v4  ;;  %v2437_v5 = vld [vmem:[%s2412_s5 + $0x1c] ss:$12 sps:$4 sm:$0xff]   ;;  %vm2288_vm0 = vmmov 0   ;;  %v2443_v6 = vld [vmem:[%s2412_s5 + $0x18] ss:$12 sps:$4 sm:$0xff]   ;;  %s1737_s15 = smul.u32 168, %s2271_s19 }
  0x32   : > { %510 = vmatprep.subr.bf16.mxu0 %v2428_v1  ;;  %1828 = vmatprep.mubr.msk.bf16.mxu1 %vm2288_vm0, %v2286_v3  ;;  %v2447_v7 = vld [vmem:[%s2412_s5 + $0x34] ss:$12 sps:$4 sm:$0xff]   ;;  %v2451_v8 = vld [vmem:[%s2412_s5 + $0x30] ss:$12 sps:$4 sm:$0xff]   ;;  %v2455_v9 = vld [vmem:[%s2412_s5 + $0x4c] ss:$12 sps:$4 sm:$0xff]  }
  0x33   : > { %511 = vmatpush1.bf16.msra.mxu0 %v2431_v2  ;;  %v2458_v10 = vld [vmem:[%s2412_s5 + $0x8] ss:$12 sps:$4 sm:$0xff]   ;;  %v2466_v12 = vld [vmem:[%s2412_s5 + $0x64] ss:$12 sps:$4 sm:$0xff]   ;;  %v2470_v13 = vld [vmem:[%s2412_s5 + $0x20] ss:$12 sps:$4 sm:$0xff]   ;;  %s377_s17 = scalar_lea.vmem %s2422_s26, %s1737_s15 }
  0x34   : > { %512 = vmatprep.subr.bf16.mxu0 %v2437_v5  ;;  %v2462_v11 = vld [vmem:[%s2412_s5 + $0x48] ss:$12 sps:$4 sm:$0xff]   ;;  %1813 = vmatpush3.bf16.msra.mxu1 %v2458_v10  ;;  %v2474_v14 = vld [vmem:[%s2412_s5 + $0x60] ss:$12 sps:$4 sm:$0xff]   ;;  %v2483_v16 = vld [vmem:[%s2412_s5 + $0x38] ss:$12 sps:$4 sm:$0xff]  }
  0x35   : > { %1814 = vmatprep.subr.bf16.mxu1 %v2286_v3  ;;  %v2478_v15 = vld [vmem:[%s2412_s5 + $0x7c] ss:$12 sps:$4 sm:$0xff]   ;;  %v2488_v17 = vld [vmem:[%s2412_s5 + $0x78] ss:$12 sps:$4 sm:$0xff]   ;;  %v2492_v18 = vld [vmem:[%s2412_s5 + $0x94] ss:$12 sps:$4 sm:$0xff]  }
  0x36   : > { %v2496_v19 = vld [vmem:[%s2412_s5 + $0x50] ss:$12 sps:$4 sm:$0xff]   ;;  %v2505_v21 = vld [vmem:[%s2412_s5 + $0xac] ss:$12 sps:$4 sm:$0xff]   ;;  %v2509_v22 = vld [vmem:[%s2412_s5 + $0x68] ss:$12 sps:$4 sm:$0xff]  }
  0x37   : > { %513 = vmatpush1.bf16.msra.mxu0 %v2443_v6  ;;  %v2501_v20 = vld [vmem:[%s2412_s5 + $0x90] ss:$12 sps:$4 sm:$0xff]   ;;  %v2514_v23 = vld [vmem:[%s2412_s5 + $0xa8] ss:$12 sps:$4 sm:$0xff]   ;;  %v2516_v24 = vld [vmem:[#allocation2] sm:$0xff]  ;;  %v359_v30 = vshrl.u32 %v358_v29, 7 }
  0x38   : > { %514 = vmatprep.subr.bf16.mxu0 %v2447_v7  ;;  %1815 = vmatpush3.bf16.msra.mxu1 %v2470_v13  ;;  %v2521_v25 = vld [vmem:[%s2412_s5 + $0x80] ss:$12 sps:$4 sm:$0xff]   ;;  %v381_v26 = vpack.c.bf16 %v2516_v24, %v2516_v24  ;;  %v2529_v27 = vld [vmem:[%s2412_s5 + $0x98] ss:$12 sps:$4 sm:$0xff]   ;;  %v2537_v28 = vld [vmem:[%s2412_s5 + $0xb0] ss:$12 sps:$4 sm:$0xff]  }
  0x39   : > { %1816 = vmatprep.subr.bf16.mxu1 %v2286_v3  ;;  %v360_v31 = vsub.s32 0, %v359_v30  ;;  %v356_v32 = vld [vmem:[%s2417_s13] sm:$0x7]  ;;  %v364_v33 = vsub.s32 1, %v359_v30  ;;  %v379_v43 = vld [vmem:[%s377_s17 + $0x8] sm:$0xff]  ;;  %v368_v54 = vsub.s32 2, %v359_v30 }
  0x3a   : > { %v378_v36 = vld [vmem:[%s377_s17] sm:$0xff]  ;;  %v380_v60 = vld [vmem:[%s377_s17 + $0x10] sm:$0xff]  ;;  %s1738_s20 = smul.u32 28, %s2271_s19  ;;  %s1699_s27 = sshll.u32 %s2271_s19, 2 }
  0x3b   : > { %515 = vmatpush1.bf16.msra.mxu0 %v2451_v8  ;;  %v2577_v34 = vrot.slane %v356_v32, %v360_v31  ;;  %v2580_v35 = vrot.slane %v356_v32, %v364_v33  ;;  %v2584_v55 = vrot.slane %v356_v32, %v368_v54  ;;  %s1678_s22 = smul.u32 120, %s2271_s19  ;;  %s1534_s30 = scalar_lea.vmem %s2424_s9, %s1699_s27 [#allocation3] }
  0x3c   : > { %516 = vmatprep.subr.bf16.mxu0 %v2455_v9  ;;  %1817 = vmatpush3.bf16.msra.mxu1 %v2483_v16  ;;  %s614_s21 = scalar_lea.vmem %s2424_s9, %s1738_s20 [#allocation3]  ;;  %s1684_s23 = smul.u32 20, %s2271_s19 }
  0x3d   : > { %1818 = vmatprep.subr.bf16.mxu1 %v2286_v3  ;;  %s1516_s13 = scalar_lea.vmem %s2422_s26, %s1678_s22  ;;  %s1686_s28 = smul.u32 72, %s2271_s19 }
  0x3e   : > { %s1520_s24 = scalar_lea.vmem %s2424_s9, %s1684_s23 [#allocation3]  ;;  %s1692_s8 = smul.u32 12, %s2271_s19 }
  0x3f   : > { %517 = vmatpush1.bf16.msra.mxu0 %v2462_v11  ;;  %s1524_s29 = scalar_lea.vmem %s2422_s26, %s1686_s28  ;;  %s1530_s12 = smul.u32 24, %s2271_s19 }
  0x40   : > { %518 = vmatprep.subr.bf16.mxu0 %v2466_v12  ;;  %1819 = vmatpush3.bf16.msra.mxu1 %v2496_v19  ;;  %s1528_s11 = scalar_lea.vmem %s2424_s9, %s1692_s8 [#allocation3]  ;;  %s957_s6 = ssub.s32 4, %s2271_s19 }
  0x41   : > { %1820 = vmatprep.subr.bf16.mxu1 %v2286_v3  ;;  %s1531_s14 = scalar_lea.vmem %s2422_s26, %s1530_s12  ;;  %s1739_s15 = smul.u32 24, %s957_s6 }
  0x42   : > { %s1704_s20 = sshll.u32 %s957_s6, 2  ;;  %s1705_s22 = smul.u32 4294967224, %s2271_s19 }
  0x43   : > { %519 = vmatpush1.bf16.msra.mxu0 %v2474_v14  ;;  %s960_s17 = scalar_lea.vmem %s2422_s26, %s1739_s15  ;;  %s1711_s23 = smul.u32 4294967284, %s2271_s19 }
  0x44   : > { %520 = vmatprep.subr.bf16.mxu0 %v2478_v15  ;;  %1821 = vmatpush3.bf16.msra.mxu1 %v2509_v22  ;;  %s1713_s28 = smul.u32 4294967176, %s2271_s19  ;;  %p1729_p1 = scmp.ne.s32.totalorder %s2267_s18, 1 }
  0x45   : > { %1822 = vmatprep.subr.bf16.mxu1 %v2286_v3 }
  0x47   : > { %521 = vmatpush1.bf16.msra.mxu0 %v2488_v17 }
  0x48   : > { %522 = vmatprep.subr.bf16.mxu0 %v2492_v18  ;;  %1823 = vmatpush3.bf16.msra.mxu1 %v2521_v25 }
  0x49   : > { %1824 = vmatprep.subr.bf16.mxu1 %v2286_v3 }
  0x4b   : > { %523 = vmatpush1.bf16.msra.mxu0 %v2501_v20 }
  0x4c   : > { %524 = vmatprep.subr.bf16.mxu0 %v2505_v21  ;;  %1825 = vmatpush3.bf16.msra.mxu1 %v2529_v27 }
  0x4d   : > { %1826 = vmatprep.subr.bf16.mxu1 %v2286_v3 }
  0x4f   : > { %525 = vmatpush1.bf16.msra.mxu0 %v2514_v23 }
  0x50   : > { %624 = vmatprep.subr.bf16.mxu0 %v2428_v1  ;;  %1827 = vmatpush3.bf16.msra.mxu1 %v2537_v28 }
  0x51   : > { %1832 = vmatprep.subr.bf16.mxu1 %v2286_v3 }
  0x52   : > { %543 = vmatmul.mubr.bf16.vlgmr.msra.gmra.mrb[0].mxu0 %v381_v26 }
  0x53   : > { %625 = vmatpush1.bf16.msra.mxu0 %v2431_v2  ;;  %656 = vmatprep.mubr.bf16.mxu0 %v2287_v4 }
  0x54   : > { %626 = vmatprep.subr.bf16.mxu0 %v2437_v5  ;;  %1829 = vmatmul.mubr.bf16.vlgmr.msra.gmra.mrb[0].mxu1 %v381_v26 }
  0x55   : > { %1833 = vmatpush3.bf16.msra.mxu1 %v2458_v10  ;;  %1848 = vmatprep.mubr.msk.bf16.mxu1 %vm2288_vm0, %v2286_v3 }
  0x56   : > { %1834 = vmatprep.subr.bf16.mxu1 %v2286_v3 }
  0x57   : > { %627 = vmatpush1.bf16.msra.mxu0 %v2443_v6 }
  0x58   : > { %628 = vmatprep.subr.bf16.mxu0 %v2447_v7 }
  0x59   : > { %1835 = vmatpush3.bf16.msra.mxu1 %v2470_v13 }
  0x5a   : > { %1836 = vmatprep.subr.bf16.mxu1 %v2286_v3 }
  0x5b   : > { %629 = vmatpush1.bf16.msra.mxu0 %v2451_v8 }
  0x5c   : > { %630 = vmatprep.subr.bf16.mxu0 %v2455_v9 }
  0x5d   : > { %1837 = vmatpush3.bf16.msra.mxu1 %v2483_v16 }
  0x5e   : > { %1838 = vmatprep.subr.bf16.mxu1 %v2286_v3 }
  0x5f   : > { %631 = vmatpush1.bf16.msra.mxu0 %v2462_v11 }
  0x60   : > { %632 = vmatprep.subr.bf16.mxu0 %v2466_v12 }
  0x61   : > { %1839 = vmatpush3.bf16.msra.mxu1 %v2496_v19 }
  0x62   : > { %1840 = vmatprep.subr.bf16.mxu1 %v2286_v3 }
  0x63   : > { %633 = vmatpush1.bf16.msra.mxu0 %v2474_v14 }
  0x64   : > { %634 = vmatprep.subr.bf16.mxu0 %v2478_v15 }
  0x65   : > { %1841 = vmatpush3.bf16.msra.mxu1 %v2509_v22 }
  0x66   : > { %1842 = vmatprep.subr.bf16.mxu1 %v2286_v3 }
  0x67   : > { %635 = vmatpush1.bf16.msra.mxu0 %v2488_v17 }
  0x68   : > { %636 = vmatprep.subr.bf16.mxu0 %v2492_v18 }
  0x69   : > { %1843 = vmatpush3.bf16.msra.mxu1 %v2521_v25 }
  0x6a   : > { %1844 = vmatprep.subr.bf16.mxu1 %v2286_v3 }
  0x6b   : > { %637 = vmatpush1.bf16.msra.mxu0 %v2501_v20 }
  0x6c   : > { %638 = vmatprep.subr.bf16.mxu0 %v2505_v21 }
  0x6d   : > { %1845 = vmatpush3.bf16.msra.mxu1 %v2529_v27 }
  0x6e   : > { %1846 = vmatprep.subr.bf16.mxu1 %v2286_v3 }
  0x6f   : > { %639 = vmatpush1.bf16.msra.mxu0 %v2514_v23 }
  0x70   : > { %738 = vmatprep.subr.bf16.mxu0 %v2428_v1 }
  0x71   : > { %1847 = vmatpush3.bf16.msra.mxu1 %v2537_v28 }
  0x72   : > { %1852 = vmatprep.subr.bf16.mxu1 %v2286_v3 }
 0x125   : > { %v544_v37 = vpop.f32.mrb[0].mxu0 }
 0x126   : > { %v545_v38 = vadd.f32 %v544_v37, %v2577_v34  ;;  %v546_v39 = vpop.f32.mrb[1].mxu0 }
 0x127   : > { %v547_v40 = vadd.f32 %v546_v39, %v2580_v35  ;;  %v548_v41 = vpop.f32.mrb[2].mxu0  ;;  %v585_v47 = vpop.f32.mrb[0].mxu1 }
 0x128   : > { %v591_v42 = vadd.f32 %v545_v38, %v378_v36  ;;  %v549_v44 = vpop.f32.mrb[3].mxu0  ;;  %v1830_v49 = vpop.f32.mrb[1].mxu1  ;;  %v586_v58 = vadd.f32 %v585_v47, %v2584_v55 }
 0x129   : > { %v598_v46 = vadd.f32 %v547_v40, %v379_v43  ;;  %v588_v50 = vpop.f32.mrb[2].mxu1  ;;  %v1680_v44 = vld [vmem:[%s1516_s13 + $0x20] sm:$0xff] }
 0x12a   : > { %v1675_v45 = vmul.f32 -1.442695, %v591_v42  ;;  %v1831_v51 = vpop.f32.mrb[3].mxu1 }
 0x12b   : > { %v1676_v48 = vmul.f32 -1.442695, %v598_v46 }
 0x12c   : > { %2085 = vpow2.f32 %v1675_v45 }
 0x12d   : > { %2087 = vpow2.f32 %v1676_v48 }
 0x136   : > { %v2086_v52 = vpop.eup %2085 }
 0x137   : > { %v595_v53 = vadd.f32 1.0, %v2086_v52  ;;  %v2088_v56 = vpop.eup %2087 }
 0x138   : > { %v602_v57 = vadd.f32 1.0, %v2088_v56 }
 0x139   : > { %2089 = vrcp.f32 %v595_v53 }
 0x13a   : > { %2091 = vrcp.f32 %v602_v57  ;;  %v1681_v57 = vld [vmem:[%s1516_s13 + $0x28] sm:$0xff] }
 0x143   : > { %v2090_v59 = vpop.eup %2089 }
 0x144   : > { %v605_v61 = vmul.f32 %v2090_v59, %v586_v58  ;;  %v2092_v63 = vpop.eup %2091 }
 0x145   : > { %v608_v0 = vsub.f32 1.0, %v2092_v63  ;;  %v610_v30 = vmul.f32 %v2092_v63, %v2516_v24  ;;  %v1679_v24 = vld [vmem:[%s1516_s13 + $0x18] sm:$0xff]  ;;  %s1542_s13 = scalar_lea.vmem %s2422_s26, %s1705_s22 }
 0x146   : > { %v606_v62 = vadd.f32 %v605_v61, %v380_v60 }
 0x148   : > { %2093 = vtanh.f32 %v606_v62 }
 0x152   : > { %v2094_v26 = vpop.eup %2093 }
 0x153   : > { %v609_v29 = vmul.f32 %v2094_v26, %v608_v0 }
 0x155   : > { %v2589_v31 = vadd.f32 %v610_v30, %v609_v29  ;;  %v1687_v30 = vld [vmem:[%s1524_s29 + $0x30] sm:$0xff] }
 0x157   : > { %v612_v32 = vpack.c.bf16 %v2589_v31, %v2589_v31 }
 0x159   : > { %615 = vst [vmem:[%s614_s21] sm:$0xf] %v612_v32  ;;  %657 = vmatmul.mubr.bf16.vlgmr.msra.gmra.mrb[4].mxu0 %v612_v32  ;;  %1849 = vmatmul.mubr.bf16.vlgmr.msra.gmra.mrb[4].mxu1 %v612_v32  ;;  %s1068_s21 = scalar_lea.vmem %s2424_s9, %s1704_s20 [#allocation3] }
 0x15a   : > { %739 = vmatpush1.bf16.msra.mxu0 %v2431_v2  ;;  %1853 = vmatpush3.bf16.msra.mxu1 %v2458_v10 }
 0x15b   : > { %740 = vmatprep.subr.bf16.mxu0 %v2437_v5  ;;  %1854 = vmatprep.subr.bf16.mxu1 %v2286_v3 }
 0x15c   : > { %770 = vmatprep.mubr.bf16.mxu0 %v2287_v4  ;;  %1868 = vmatprep.mubr.msk.bf16.mxu1 %vm2288_vm0, %v2286_v3 }
 0x15e   : > { %741 = vmatpush1.bf16.msra.mxu0 %v2443_v6  ;;  %1855 = vmatpush3.bf16.msra.mxu1 %v2470_v13 }
 0x15f   : > { %742 = vmatprep.subr.bf16.mxu0 %v2447_v7  ;;  %1856 = vmatprep.subr.bf16.mxu1 %v2286_v3 }
 0x162   : > { %743 = vmatpush1.bf16.msra.mxu0 %v2451_v8  ;;  %1857 = vmatpush3.bf16.msra.mxu1 %v2483_v16 }
 0x163   : > { %744 = vmatprep.subr.bf16.mxu0 %v2455_v9  ;;  %1858 = vmatprep.subr.bf16.mxu1 %v2286_v3 }
 0x166   : > { %745 = vmatpush1.bf16.msra.mxu0 %v2462_v11  ;;  %1859 = vmatpush3.bf16.msra.mxu1 %v2496_v19 }
 0x167   : > { %746 = vmatprep.subr.bf16.mxu0 %v2466_v12  ;;  %1860 = vmatprep.subr.bf16.mxu1 %v2286_v3 }
 0x16a   : > { %747 = vmatpush1.bf16.msra.mxu0 %v2474_v14  ;;  %1861 = vmatpush3.bf16.msra.mxu1 %v2509_v22 }
 0x16b   : > { %748 = vmatprep.subr.bf16.mxu0 %v2478_v15  ;;  %1862 = vmatprep.subr.bf16.mxu1 %v2286_v3 }
 0x16e   : > { %749 = vmatpush1.bf16.msra.mxu0 %v2488_v17  ;;  %1863 = vmatpush3.bf16.msra.mxu1 %v2521_v25 }
 0x16f   : > { %750 = vmatprep.subr.bf16.mxu0 %v2492_v18  ;;  %1864 = vmatprep.subr.bf16.mxu1 %v2286_v3 }
 0x172   : > { %751 = vmatpush1.bf16.msra.mxu0 %v2501_v20  ;;  %1865 = vmatpush3.bf16.msra.mxu1 %v2529_v27 }
 0x173   : > { %752 = vmatprep.subr.bf16.mxu0 %v2505_v21  ;;  %1866 = vmatprep.subr.bf16.mxu1 %v2286_v3 }
 0x176   : > { %753 = vmatpush1.bf16.msra.mxu0 %v2514_v23  ;;  %1867 = vmatpush3.bf16.msra.mxu1 %v2537_v28 }
 0x177   : > { %851 = vmatprep.subr.bf16.mxu0 %v2428_v1  ;;  %1872 = vmatprep.subr.bf16.mxu1 %v2286_v3 }
 0x22c   : > { %v658_v33 = vpop.f32.mrb[4].mxu0  ;;  %v699_v36 = vpop.f32.mrb[4].mxu1 }
 0x22d   : > { %v659_v37 = vadd.f32 %v658_v33, %v2577_v34  ;;  %v660_v38 = vpop.f32.mrb[5].mxu0  ;;  %v1850_v39 = vpop.f32.mrb[5].mxu1  ;;  %v700_v54 = vadd.f32 %v699_v36, %v2584_v55 }
 0x22e   : > { %v661_v40 = vadd.f32 %v660_v38, %v2580_v35  ;;  %v662_v41 = vpop.f32.mrb[6].mxu0  ;;  %v702_v42 = vpop.f32.mrb[6].mxu1 }
 0x22f   : > { %v705_v43 = vadd.f32 %v1679_v24, %v659_v37  ;;  %v663_v45 = vpop.f32.mrb[7].mxu0  ;;  %v1851_v46 = vpop.f32.mrb[7].mxu1  ;;  %v1688_v41 = vld [vmem:[%s1524_s29 + $0x38] sm:$0xff] }
 0x230   : > { %v712_v48 = vadd.f32 %v1680_v44, %v661_v40 }
 0x231   : > { %v1682_v47 = vmul.f32 -1.442695, %v705_v43 }
 0x232   : > { %v1683_v49 = vmul.f32 -1.442695, %v712_v48 }
 0x233   : > { %2095 = vpow2.f32 %v1682_v47 }
 0x234   : > { %2097 = vpow2.f32 %v1683_v49 }
 0x23d   : > { %v2096_v50 = vpop.eup %2095 }
 0x23e   : > { %v709_v51 = vadd.f32 1.0, %v2096_v50  ;;  %v2098_v52 = vpop.eup %2097 }
 0x23f   : > { %v716_v53 = vadd.f32 1.0, %v2098_v52 }
 0x240   : > { %2099 = vrcp.f32 %v709_v51 }
 0x241   : > { %2101 = vrcp.f32 %v716_v53  ;;  %v1689_v53 = vld [vmem:[%s1524_s29 + $0x40] sm:$0xff]  ;;  %s1550_s29 = scalar_lea.vmem %s2422_s26, %s1713_s28 }
 0x24a   : > { %v2100_v56 = vpop.eup %2099 }
 0x24b   : > { %v719_v58 = vmul.f32 %v2100_v56, %v700_v54  ;;  %v2102_v60 = vpop.eup %2101 }
 0x24c   : > { %v722_v61 = vsub.f32 1.0, %v2102_v60  ;;  %v724_v0 = vmul.f32 %v2102_v60, %v2589_v31 }
 0x24d   : > { %v720_v59 = vadd.f32 %v1681_v57, %v719_v58 }
 0x24f   : > { %2103 = vtanh.f32 %v720_v59 }
 0x259   : > { %v2104_v62 = vpop.eup %2103 }
 0x25a   : > { %v723_v63 = vmul.f32 %v2104_v62, %v722_v61 }
 0x25c   : > { %v2636_v26 = vadd.f32 %v724_v0, %v723_v63  ;;  %v1694_v0 = vld [vmem:[%s1531_s14 + $0x48] sm:$0xff] }
 0x25e   : > { %v726_v29 = vpack.c.bf16 %v2636_v26, %v2636_v26 }
 0x260   : > { %1685 = vst [vmem:[%s1520_s24 + $0x4] sm:$0xf] %v726_v29  ;;  %771 = vmatmul.mubr.bf16.vlgmr.msra.gmra.mrb[8].mxu0 %v726_v29  ;;  %1869 = vmatmul.mubr.bf16.vlgmr.msra.gmra.mrb[8].mxu1 %v726_v29  ;;  %s1546_s24 = scalar_lea.vmem %s2424_s9, %s1711_s23 [#allocation3] }
 0x261   : > { %852 = vmatpush1.bf16.msra.mxu0 %v2431_v2  ;;  %1873 = vmatpush3.bf16.msra.mxu1 %v2458_v10 }
 0x262   : > { %853 = vmatprep.subr.bf16.mxu0 %v2437_v5  ;;  %1874 = vmatprep.subr.bf16.mxu1 %v2286_v3 }
 0x263   : > { %883 = vmatprep.mubr.bf16.mxu0 %v2287_v4  ;;  %1888 = vmatprep.mubr.msk.bf16.mxu1 %vm2288_vm0, %v2286_v3 }
 0x265   : > { %854 = vmatpush1.bf16.msra.mxu0 %v2443_v6  ;;  %1875 = vmatpush3.bf16.msra.mxu1 %v2470_v13 }
 0x266   : > { %855 = vmatprep.subr.bf16.mxu0 %v2447_v7  ;;  %1876 = vmatprep.subr.bf16.mxu1 %v2286_v3 }
 0x269   : > { %856 = vmatpush1.bf16.msra.mxu0 %v2451_v8  ;;  %1877 = vmatpush3.bf16.msra.mxu1 %v2483_v16 }
 0x26a   : > { %857 = vmatprep.subr.bf16.mxu0 %v2455_v9  ;;  %1878 = vmatprep.subr.bf16.mxu1 %v2286_v3 }
 0x26d   : > { %858 = vmatpush1.bf16.msra.mxu0 %v2462_v11  ;;  %1879 = vmatpush3.bf16.msra.mxu1 %v2496_v19 }
 0x26e   : > { %859 = vmatprep.subr.bf16.mxu0 %v2466_v12  ;;  %1880 = vmatprep.subr.bf16.mxu1 %v2286_v3 }
 0x271   : > { %860 = vmatpush1.bf16.msra.mxu0 %v2474_v14  ;;  %1881 = vmatpush3.bf16.msra.mxu1 %v2509_v22 }
 0x272   : > { %861 = vmatprep.subr.bf16.mxu0 %v2478_v15  ;;  %1882 = vmatprep.subr.bf16.mxu1 %v2286_v3 }
 0x275   : > { %862 = vmatpush1.bf16.msra.mxu0 %v2488_v17  ;;  %1883 = vmatpush3.bf16.msra.mxu1 %v2521_v25 }
 0x276   : > { %863 = vmatprep.subr.bf16.mxu0 %v2492_v18  ;;  %1884 = vmatprep.subr.bf16.mxu1 %v2286_v3 }
 0x279   : > { %864 = vmatpush1.bf16.msra.mxu0 %v2501_v20  ;;  %1885 = vmatpush3.bf16.msra.mxu1 %v2529_v27 }
 0x27a   : > { %865 = vmatprep.subr.bf16.mxu0 %v2505_v21  ;;  %1886 = vmatprep.subr.bf16.mxu1 %v2286_v3 }
 0x27d   : > { %866 = vmatpush1.bf16.msra.mxu0 %v2514_v23  ;;  %1887 = vmatpush3.bf16.msra.mxu1 %v2537_v28 }
 0x27e   : > { %964 = vmatprep.subr.bf16.mxu0 %v2428_v1  ;;  %1892 = vmatprep.subr.bf16.mxu1 %v2286_v3 }
 0x333   : > { %v772_v31 = vpop.f32.mrb[8].mxu0  ;;  %v813_v32 = vpop.f32.mrb[8].mxu1 }
 0x334   : > { %v773_v24 = vadd.f32 %v772_v31, %v2577_v34  ;;  %v774_v33 = vpop.f32.mrb[9].mxu0  ;;  %v1870_v36 = vpop.f32.mrb[9].mxu1  ;;  %v814_v51 = vadd.f32 %v813_v32, %v2584_v55 }
 0x335   : > { %v775_v37 = vadd.f32 %v774_v33, %v2580_v35  ;;  %v776_v38 = vpop.f32.mrb[10].mxu0  ;;  %v816_v39 = vpop.f32.mrb[10].mxu1 }
 0x336   : > { %v819_v40 = vadd.f32 %v1687_v30, %v773_v24  ;;  %v777_v42 = vpop.f32.mrb[11].mxu0  ;;  %v1871_v43 = vpop.f32.mrb[11].mxu1  ;;  %v1695_v38 = vld [vmem:[%s1531_s14 + $0x50] sm:$0xff] }
 0x337   : > { %v826_v45 = vadd.f32 %v1688_v41, %v775_v37 }
 0x338   : > { %v1690_v44 = vmul.f32 -1.442695, %v819_v40 }
 0x339   : > { %v1691_v46 = vmul.f32 -1.442695, %v826_v45 }
 0x33a   : > { %2105 = vpow2.f32 %v1690_v44 }
 0x33b   : > { %2107 = vpow2.f32 %v1691_v46 }
 0x344   : > { %v2106_v47 = vpop.eup %2105 }
 0x345   : > { %v823_v48 = vadd.f32 1.0, %v2106_v47  ;;  %v2108_v49 = vpop.eup %2107 }
 0x346   : > { %v830_v50 = vadd.f32 1.0, %v2108_v49 }
 0x347   : > { %2109 = vrcp.f32 %v823_v48 }
 0x348   : > { %2111 = vrcp.f32 %v830_v50  ;;  %v1696_v50 = vld [vmem:[%s1531_s14 + $0x58] sm:$0xff] }
 0x351   : > { %v2110_v52 = vpop.eup %2109 }
 0x352   : > { %v833_v54 = vmul.f32 %v2110_v52, %v814_v51  ;;  %v2112_v57 = vpop.eup %2111 }
 0x353   : > { %v836_v58 = vsub.f32 1.0, %v2112_v57  ;;  %v838_v61 = vmul.f32 %v2112_v57, %v2636_v26 }
 0x354   : > { %v834_v56 = vadd.f32 %v1689_v53, %v833_v54 }
 0x356   : > { %2113 = vtanh.f32 %v834_v56 }
 0x360   : > { %v2114_v59 = vpop.eup %2113 }
 0x361   : > { %v837_v60 = vmul.f32 %v2114_v59, %v836_v58 }
 0x363   : > { %v2683_v62 = vadd.f32 %v838_v61, %v837_v60  ;;  %v961_v61 = vld [vmem:[%s960_s17] sm:$0xff] }
 0x365   : > { %v840_v63 = vpack.c.bf16 %v2683_v62, %v2683_v62 }
 0x367   : > { %1693 = vst [vmem:[%s1528_s11 + $0x8] sm:$0xf] %v840_v63  ;;  %884 = vmatmul.mubr.bf16.vlgmr.msra.gmra.mrb[12].mxu0 %v840_v63  ;;  %1889 = vmatmul.mubr.bf16.vlgmr.msra.gmra.mrb[12].mxu1 %v840_v63  ;;  %s1721_s11 = smul.u32 4294967128, %s2271_s19 }
 0x368   : > { %965 = vmatpush1.bf16.msra.mxu0 %v2431_v2  ;;  %1893 = vmatpush3.bf16.msra.mxu1 %v2458_v10 }
 0x369   : > { %966 = vmatprep.subr.bf16.mxu0 %v2437_v5  ;;  %1894 = vmatprep.subr.bf16.mxu1 %v2286_v3  ;;  %s1558_s12 = scalar_lea.vmem %s2422_s26, %s1721_s11  ;;  %s1727_s26 = smul.u32 4294967268, %s2271_s19 }
 0x36a   : > { %996 = vmatprep.mubr.bf16.mxu0 %v2287_v4  ;;  %1908 = vmatprep.mubr.msk.bf16.mxu1 %vm2288_vm0, %v2286_v3 }
 0x36b   : > { %s1562_s14 = scalar_lea.vmem %s2424_s9, %s1727_s26 [#allocation3] }
 0x36c   : > { %967 = vmatpush1.bf16.msra.mxu0 %v2443_v6  ;;  %1895 = vmatpush3.bf16.msra.mxu1 %v2470_v13 }
 0x36d   : > { %968 = vmatprep.subr.bf16.mxu0 %v2447_v7  ;;  %1896 = vmatprep.subr.bf16.mxu1 %v2286_v3 }
 0x370   : > { %969 = vmatpush1.bf16.msra.mxu0 %v2451_v8  ;;  %1897 = vmatpush3.bf16.msra.mxu1 %v2483_v16 }
 0x371   : > { %970 = vmatprep.subr.bf16.mxu0 %v2455_v9  ;;  %1898 = vmatprep.subr.bf16.mxu1 %v2286_v3 }
 0x374   : > { %971 = vmatpush1.bf16.msra.mxu0 %v2462_v11  ;;  %1899 = vmatpush3.bf16.msra.mxu1 %v2496_v19 }
 0x375   : > { %972 = vmatprep.subr.bf16.mxu0 %v2466_v12  ;;  %1900 = vmatprep.subr.bf16.mxu1 %v2286_v3 }
 0x378   : > { %973 = vmatpush1.bf16.msra.mxu0 %v2474_v14  ;;  %1901 = vmatpush3.bf16.msra.mxu1 %v2509_v22 }
 0x379   : > { %974 = vmatprep.subr.bf16.mxu0 %v2478_v15  ;;  %1902 = vmatprep.subr.bf16.mxu1 %v2286_v3 }
 0x37c   : > { %975 = vmatpush1.bf16.msra.mxu0 %v2488_v17  ;;  %1903 = vmatpush3.bf16.msra.mxu1 %v2521_v25 }
 0x37d   : > { %976 = vmatprep.subr.bf16.mxu0 %v2492_v18  ;;  %1904 = vmatprep.subr.bf16.mxu1 %v2286_v3 }
 0x380   : > { %977 = vmatpush1.bf16.msra.mxu0 %v2501_v20  ;;  %1905 = vmatpush3.bf16.msra.mxu1 %v2529_v27 }
 0x381   : > { %978 = vmatprep.subr.bf16.mxu0 %v2505_v21  ;;  %1906 = vmatprep.subr.bf16.mxu1 %v2286_v3 }
 0x384   : > { %979 = vmatpush1.bf16.msra.mxu0 %v2514_v23  ;;  %1907 = vmatpush3.bf16.msra.mxu1 %v2537_v28 }
 0x385   : > { %1078 = vmatprep.subr.bf16.mxu0 %v2428_v1  ;;  %1912 = vmatprep.subr.bf16.mxu1 %v2286_v3 }
 0x43a   : > { %v885_v26 = vpop.f32.mrb[12].mxu0  ;;  %v926_v29 = vpop.f32.mrb[12].mxu1 }
 0x43b   : > { %v886_v30 = vadd.f32 %v885_v26, %v2577_v34  ;;  %v887_v31 = vpop.f32.mrb[13].mxu0  ;;  %v1890_v32 = vpop.f32.mrb[13].mxu1  ;;  %v927_v48 = vadd.f32 %v926_v29, %v2584_v55 }
 0x43c   : > { %v888_v24 = vadd.f32 %v887_v31, %v2580_v35  ;;  %v889_v33 = vpop.f32.mrb[14].mxu0  ;;  %v929_v36 = vpop.f32.mrb[14].mxu1 }
 0x43d   : > { %v932_v37 = vadd.f32 %v1694_v0, %v886_v30  ;;  %v890_v39 = vpop.f32.mrb[15].mxu0  ;;  %v1891_v40 = vpop.f32.mrb[15].mxu1  ;;  %v962_v33 = vld [vmem:[%s960_s17 + $0x8] sm:$0xff] }
 0x43e   : > { %v939_v42 = vadd.f32 %v1695_v38, %v888_v24 }
 0x43f   : > { %v1697_v41 = vmul.f32 -1.442695, %v932_v37 }
 0x440   : > { %v1698_v43 = vmul.f32 -1.442695, %v939_v42 }
 0x441   : > { %2115 = vpow2.f32 %v1697_v41 }
 0x442   : > { %2117 = vpow2.f32 %v1698_v43 }
 0x44b   : > { %v2116_v44 = vpop.eup %2115 }
 0x44c   : > { %v936_v45 = vadd.f32 1.0, %v2116_v44  ;;  %v2118_v46 = vpop.eup %2117 }
 0x44d   : > { %v943_v47 = vadd.f32 1.0, %v2118_v46  ;;  %v963_v46 = vld [vmem:[%s960_s17 + $0x10] sm:$0xff] }
 0x44e   : > { %2119 = vrcp.f32 %v936_v45 }
 0x44f   : > { %2121 = vrcp.f32 %v943_v47 }
 0x458   : > { %v2120_v49 = vpop.eup %2119 }
 0x459   : > { %v946_v51 = vmul.f32 %v2120_v49, %v927_v48  ;;  %v2122_v53 = vpop.eup %2121 }
 0x45a   : > { %v949_v54 = vsub.f32 1.0, %v2122_v53  ;;  %v951_v58 = vmul.f32 %v2122_v53, %v2683_v62 }
 0x45b   : > { %v947_v52 = vadd.f32 %v1696_v50, %v946_v51 }
 0x45d   : > { %2123 = vtanh.f32 %v947_v52 }
 0x467   : > { %v2124_v56 = vpop.eup %2123 }
 0x468   : > { %v950_v57 = vmul.f32 %v2124_v56, %v949_v54 }
 0x46a   : > { %v2730_v59 = vadd.f32 %v951_v58, %v950_v57  ;;  %v1708_v57 = vld [vmem:[%s1542_s13 + $0x88] sm:$0xff] }
 0x46c   : > { %v953_v60 = vpack.c.bf16 %v2730_v59, %v2730_v59 }
 0x46e   : > { %1700 = vst [vmem:[%s1534_s30 + $0xc] sm:$0xf] %v953_v60  ;;  %997 = vmatmul.mubr.bf16.vlgmr.msra.gmra.mrb[16].mxu0 %v953_v60  ;;  %1909 = vmatmul.mubr.bf16.vlgmr.msra.gmra.mrb[16].mxu1 %v953_v60 }
 0x46f   : > { %1079 = vmatpush1.bf16.msra.mxu0 %v2431_v2  ;;  %1913 = vmatpush3.bf16.msra.mxu1 %v2458_v10 }
 0x470   : > { %1080 = vmatprep.subr.bf16.mxu0 %v2437_v5  ;;  %1914 = vmatprep.subr.bf16.mxu1 %v2286_v3 }
 0x471   : > { %1110 = vmatprep.mubr.bf16.mxu0 %v2287_v4  ;;  %1928 = vmatprep.mubr.msk.bf16.mxu1 %vm2288_vm0, %v2286_v3 }
 0x473   : > { %1081 = vmatpush1.bf16.msra.mxu0 %v2443_v6  ;;  %1915 = vmatpush3.bf16.msra.mxu1 %v2470_v13 }
 0x474   : > { %1082 = vmatprep.subr.bf16.mxu0 %v2447_v7  ;;  %1916 = vmatprep.subr.bf16.mxu1 %v2286_v3 }
 0x477   : > { %1083 = vmatpush1.bf16.msra.mxu0 %v2451_v8  ;;  %1917 = vmatpush3.bf16.msra.mxu1 %v2483_v16 }
 0x478   : > { %1084 = vmatprep.subr.bf16.mxu0 %v2455_v9  ;;  %1918 = vmatprep.subr.bf16.mxu1 %v2286_v3 }
 0x47b   : > { %1085 = vmatpush1.bf16.msra.mxu0 %v2462_v11  ;;  %1919 = vmatpush3.bf16.msra.mxu1 %v2496_v19 }
 0x47c   : > { %1086 = vmatprep.subr.bf16.mxu0 %v2466_v12  ;;  %1920 = vmatprep.subr.bf16.mxu1 %v2286_v3 }
 0x47f   : > { %1087 = vmatpush1.bf16.msra.mxu0 %v2474_v14  ;;  %1921 = vmatpush3.bf16.msra.mxu1 %v2509_v22 }
 0x480   : > { %1088 = vmatprep.subr.bf16.mxu0 %v2478_v15  ;;  %1922 = vmatprep.subr.bf16.mxu1 %v2286_v3 }
 0x483   : > { %1089 = vmatpush1.bf16.msra.mxu0 %v2488_v17  ;;  %1923 = vmatpush3.bf16.msra.mxu1 %v2521_v25 }
 0x484   : > { %1090 = vmatprep.subr.bf16.mxu0 %v2492_v18  ;;  %1924 = vmatprep.subr.bf16.mxu1 %v2286_v3 }
 0x487   : > { %1091 = vmatpush1.bf16.msra.mxu0 %v2501_v20  ;;  %1925 = vmatpush3.bf16.msra.mxu1 %v2529_v27 }
 0x488   : > { %1092 = vmatprep.subr.bf16.mxu0 %v2505_v21  ;;  %1926 = vmatprep.subr.bf16.mxu1 %v2286_v3 }
 0x48b   : > { %1093 = vmatpush1.bf16.msra.mxu0 %v2514_v23  ;;  %1927 = vmatpush3.bf16.msra.mxu1 %v2537_v28 }
 0x48c   : > { %1192 = vmatprep.subr.bf16.mxu0 %v2428_v1  ;;  %1932 = vmatprep.subr.bf16.mxu1 %v2286_v3 }
 0x541   : > { %v998_v62 = vpop.f32.mrb[16].mxu0  ;;  %v1039_v63 = vpop.f32.mrb[16].mxu1 }
 0x542   : > { %v999_v0 = vadd.f32 %v998_v62, %v2577_v34  ;;  %v1000_v26 = vpop.f32.mrb[17].mxu0  ;;  %v1910_v29 = vpop.f32.mrb[17].mxu1  ;;  %v1040_v44 = vadd.f32 %v1039_v63, %v2584_v55 }
 0x543   : > { %v1001_v30 = vadd.f32 %v1000_v26, %v2580_v35  ;;  %v1002_v31 = vpop.f32.mrb[18].mxu0  ;;  %v1042_v32 = vpop.f32.mrb[18].mxu1 }
 0x544   : > { %v1045_v24 = vadd.f32 %v999_v0, %v961_v61  ;;  %v1003_v1 = vpop.f32.mrb[19].mxu0  ;;  %v1911_v36 = vpop.f32.mrb[19].mxu1  ;;  %v2167_v31 = vld [vmem:[%s2412_s5 + $0x8] ss:$12 sps:$4 sm:$0xff]  }
 0x545   : > { %v1052_v38 = vadd.f32 %v1001_v30, %v962_v33  ;;  %v2166_v30 = vld [vmem:[%s2412_s5] ss:$12 sps:$4 sm:$0xff]   ;;  %v2168_v32 = vld [vmem:[%s2412_s5 + $0x1c] ss:$12 sps:$4 sm:$0xff]  }
 0x546   : > { %v1702_v37 = vmul.f32 -1.442695, %v1045_v24  ;;  %v2169_v24 = vld [vmem:[%s2412_s5 + $0x18] ss:$12 sps:$4 sm:$0xff]   ;;  %v2170_v33 = vld [vmem:[%s2412_s5 + $0x20] ss:$12 sps:$4 sm:$0xff]  }
 0x547   : > { %v1703_v39 = vmul.f32 -1.442695, %v1052_v38  ;;  %v2171_v1 = vld [vmem:[%s2412_s5 + $0x34] ss:$12 sps:$4 sm:$0xff]   ;;  %v2172_v36 = vld [vmem:[%s2412_s5 + $0x30] ss:$12 sps:$4 sm:$0xff]  }
 0x548   : > { %2125 = vpow2.f32 %v1702_v37  ;;  %v2173_v37 = vld [vmem:[%s2412_s5 + $0x38] ss:$12 sps:$4 sm:$0xff]   ;;  %v2175_v38 = vld [vmem:[%s2412_s5 + $0x48] ss:$12 sps:$4 sm:$0xff]  }
 0x549   : > { %2127 = vpow2.f32 %v1703_v39  ;;  %v2176_v39 = vld [vmem:[%s2412_s5 + $0x50] ss:$12 sps:$4 sm:$0xff]  }
 0x552   : > { %v2126_v40 = vpop.eup %2125 }
 0x553   : > { %v1049_v41 = vadd.f32 1.0, %v2126_v40  ;;  %v2128_v42 = vpop.eup %2127  ;;  %v2177_v40 = vld [vmem:[%s2412_s5 + $0x64] ss:$12 sps:$4 sm:$0xff]  }
 0x554   : > { %v1056_v43 = vadd.f32 1.0, %v2128_v42  ;;  %v2179_v42 = vld [vmem:[%s2412_s5 + $0x68] ss:$12 sps:$4 sm:$0xff]  }
 0x555   : > { %2129 = vrcp.f32 %v1049_v41  ;;  %v2178_v41 = vld [vmem:[%s2412_s5 + $0x60] ss:$12 sps:$4 sm:$0xff]  }
 0x556   : > { %2131 = vrcp.f32 %v1056_v43  ;;  %v2180_v43 = vld [vmem:[%s2412_s5 + $0x7c] ss:$12 sps:$4 sm:$0xff]  }
 0x55f   : > { %v2130_v45 = vpop.eup %2129 }
 0x560   : > { %v1059_v47 = vmul.f32 %v2130_v45, %v1040_v44  ;;  %v2132_v49 = vpop.eup %2131  ;;  %v2181_v44 = vld [vmem:[%s2412_s5 + $0x78] ss:$12 sps:$4 sm:$0xff]   ;;  %v2182_v45 = vld [vmem:[%s2412_s5 + $0x80] ss:$12 sps:$4 sm:$0xff]  }
 0x561   : > { %v1062_v50 = vsub.f32 1.0, %v2132_v49  ;;  %v1064_v53 = vmul.f32 %v2132_v49, %v2730_v59  ;;  %v2186_v49 = vld [vmem:[%s2412_s5 + $0xac] ss:$12 sps:$4 sm:$0xff]  }
 0x562   : > { %v1060_v48 = vadd.f32 %v1059_v47, %v963_v46  ;;  %v2183_v46 = vld [vmem:[%s2412_s5 + $0x94] ss:$12 sps:$4 sm:$0xff]   ;;  %v2184_v47 = vld [vmem:[%s2412_s5 + $0x90] ss:$12 sps:$4 sm:$0xff]  }
 0x564   : > { %2133 = vtanh.f32 %v1060_v48  ;;  %v2185_v48 = vld [vmem:[%s2412_s5 + $0x98] ss:$12 sps:$4 sm:$0xff]  }
 0x56e   : > { %v2134_v51 = vpop.eup %2133 }
 0x56f   : > { %v1063_v52 = vmul.f32 %v2134_v51, %v1062_v50  ;;  %v2187_v50 = vld [vmem:[%s2412_s5 + $0xa8] ss:$12 sps:$4 sm:$0xff]   ;;  %v2188_v51 = vld [vmem:[%s2412_s5 + $0xb0] ss:$12 sps:$4 sm:$0xff]  }
 0x571   : > { %v2780_v54 = vadd.f32 %v1064_v53, %v1063_v52  ;;  %v1714_v52 = vld [vmem:[%s1550_s29 + $0x90] sm:$0xff] }
 0x573   : > { %v1066_v56 = vpack.c.bf16 %v2780_v54, %v2780_v54 }
 0x575   : > { %1069 = vst [vmem:[%s1068_s21] sm:$0xf] %v1066_v56  ;;  %1111 = vmatmul.mubr.bf16.vlgmr.msra.gmra.mrb[20].mxu0 %v1066_v56  ;;  %1929 = vmatmul.mubr.bf16.vlgmr.msra.gmra.mrb[20].mxu1 %v1066_v56 }
 0x576   : > { %1193 = vmatpush1.bf16.msra.mxu0 %v2431_v2  ;;  %1933 = vmatpush3.bf16.msra.mxu1 %v2458_v10  ;;  %v2165_v2 = vld [vmem:[%s2412_s5 + $0x4] ss:$12 sps:$4 sm:$0xff]  }
 0x577   : > { %1194 = vmatprep.subr.bf16.mxu0 %v2437_v5  ;;  %1934 = vmatprep.subr.bf16.mxu1 %v2286_v3  ;;  %v1706_v5 = vld [vmem:[%s1542_s13 + $0x78] sm:$0xff] }
 0x578   : > { %1224 = vmatprep.mubr.bf16.mxu0 %v2287_v4  ;;  %1948 = vmatprep.mubr.msk.bf16.mxu1 %vm2288_vm0, %v2286_v3 }
 0x57a   : > { %1195 = vmatpush1.bf16.msra.mxu0 %v2443_v6  ;;  %1935 = vmatpush3.bf16.msra.mxu1 %v2470_v13 }
 0x57b   : > { %1196 = vmatprep.subr.bf16.mxu0 %v2447_v7  ;;  %1936 = vmatprep.subr.bf16.mxu1 %v2286_v3 }
 0x57e   : > { %1197 = vmatpush1.bf16.msra.mxu0 %v2451_v8  ;;  %1937 = vmatpush3.bf16.msra.mxu1 %v2483_v16 }
 0x57f   : > { %1198 = vmatprep.subr.bf16.mxu0 %v2455_v9  ;;  %1938 = vmatprep.subr.bf16.mxu1 %v2286_v3 }
 0x582   : > { %1199 = vmatpush1.bf16.msra.mxu0 %v2462_v11  ;;  %1939 = vmatpush3.bf16.msra.mxu1 %v2496_v19 }
 0x583   : > { %1200 = vmatprep.subr.bf16.mxu0 %v2466_v12  ;;  %1940 = vmatprep.subr.bf16.mxu1 %v2286_v3 }
 0x586   : > { %1201 = vmatpush1.bf16.msra.mxu0 %v2474_v14  ;;  %1941 = vmatpush3.bf16.msra.mxu1 %v2509_v22 }
 0x587   : > { %1202 = vmatprep.subr.bf16.mxu0 %v2478_v15  ;;  %1942 = vmatprep.subr.bf16.mxu1 %v2286_v3  ;;  %v1707_v15 = vld [vmem:[%s1542_s13 + $0x80] sm:$0xff] }
 0x58a   : > { %1203 = vmatpush1.bf16.msra.mxu0 %v2488_v17  ;;  %1943 = vmatpush3.bf16.msra.mxu1 %v2521_v25 }
 0x58b   : > { %1204 = vmatprep.subr.bf16.mxu0 %v2492_v18  ;;  %1944 = vmatprep.subr.bf16.mxu1 %v2286_v3 }
 0x58e   : > { %1205 = vmatpush1.bf16.msra.mxu0 %v2501_v20  ;;  %1945 = vmatpush3.bf16.msra.mxu1 %v2529_v27 }
 0x58f   : > { %1206 = vmatprep.subr.bf16.mxu0 %v2505_v21  ;;  %1946 = vmatprep.subr.bf16.mxu1 %v2286_v3 }
 0x592   : > { %1207 = vmatpush1.bf16.msra.mxu0 %v2514_v23  ;;  %1947 = vmatpush3.bf16.msra.mxu1 %v2537_v28 }
 0x593   : > { %1306 = vmatprep.subr.bf16.mxu0 %v2165_v2  ;;  %1952 = vmatprep.subr.bf16.mxu1 %v2286_v3 }
 0x648   : > { %v1112_v6 = vpop.f32.mrb[20].mxu0  ;;  %v1153_v7 = vpop.f32.mrb[20].mxu1 }
 0x649   : > { %v1113_v8 = vadd.f32 %v1112_v6, %v2577_v34  ;;  %v1114_v9 = vpop.f32.mrb[21].mxu0  ;;  %v1930_v10 = vpop.f32.mrb[21].mxu1  ;;  %v1154_v27 = vadd.f32 %v1153_v7, %v2584_v55 }
 0x64a   : > { %v1115_v11 = vadd.f32 %v1114_v9, %v2580_v35  ;;  %v1116_v12 = vpop.f32.mrb[22].mxu0  ;;  %v1156_v13 = vpop.f32.mrb[22].mxu1  ;;  %v1715_v10 = vld [vmem:[%s1550_s29 + $0x98] sm:$0xff] }
 0x64b   : > { %v1159_v14 = vadd.f32 %v1706_v5, %v1113_v8  ;;  %v1117_v16 = vpop.f32.mrb[23].mxu0  ;;  %v1931_v17 = vpop.f32.mrb[23].mxu1 }
 0x64c   : > { %v1166_v19 = vadd.f32 %v1707_v15, %v1115_v11 }
 0x64d   : > { %v1709_v18 = vmul.f32 -1.442695, %v1159_v14 }
 0x64e   : > { %v1710_v20 = vmul.f32 -1.442695, %v1166_v19 }
 0x64f   : > { %2135 = vpow2.f32 %v1709_v18 }
 0x650   : > { %2137 = vpow2.f32 %v1710_v20 }
 0x659   : > { %v2136_v21 = vpop.eup %2135 }
 0x65a   : > { %v1163_v22 = vadd.f32 1.0, %v2136_v21  ;;  %v2138_v23 = vpop.eup %2137  ;;  %v1716_v21 = vld [vmem:[%s1550_s29 + $0xa0] sm:$0xff] }
 0x65b   : > { %v1170_v25 = vadd.f32 1.0, %v2138_v23 }
 0x65c   : > { %2139 = vrcp.f32 %v1163_v22 }
 0x65d   : > { %2141 = vrcp.f32 %v1170_v25 }
 0x666   : > { %v2140_v28 = vpop.eup %2139 }
 0x667   : > { %v1173_v58 = vmul.f32 %v2140_v28, %v1154_v27  ;;  %v2142_v60 = vpop.eup %2141 }
 0x668   : > { %v1176_v61 = vsub.f32 1.0, %v2142_v60  ;;  %v1178_v0 = vmul.f32 %v2142_v60, %v2780_v54 }
 0x669   : > { %v1174_v59 = vadd.f32 %v1708_v57, %v1173_v58 }
 0x66b   : > { %2143 = vtanh.f32 %v1174_v59 }
 0x675   : > { %v2144_v62 = vpop.eup %2143 }
 0x676   : > { %v1177_v63 = vmul.f32 %v2144_v62, %v1176_v61  ;;  %v1722_v61 = vld [vmem:[%s1558_s12 + $0xa8] sm:$0xff] }
 0x678   : > { %v2827_v26 = vadd.f32 %v1178_v0, %v1177_v63 }
 0x67a   : > { %v1180_v29 = vpack.c.bf16 %v2827_v26, %v2827_v26 }
 0x67c   : > { %1712 = vst [vmem:[%s1546_s24 + $0x14] sm:$0xf] %v1180_v29  ;;  %1225 = vmatmul.mubr.bf16.vlgmr.msra.gmra.mrb[24].mxu0 %v1180_v29  ;;  %1949 = vmatmul.mubr.bf16.vlgmr.msra.gmra.mrb[24].mxu1 %v1180_v29 }
 0x67d   : > { %1307 = vmatpush1.bf16.msra.mxu0 %v2166_v30  ;;  %1953 = vmatpush3.bf16.msra.mxu1 %v2167_v31 }
 0x67e   : > { %1308 = vmatprep.subr.bf16.mxu0 %v2168_v32  ;;  %1954 = vmatprep.subr.bf16.mxu1 %v2286_v3 }
 0x67f   : > { %1338 = vmatprep.mubr.bf16.mxu0 %v2287_v4  ;;  %1968 = vmatprep.mubr.msk.bf16.mxu1 %vm2288_vm0, %v2286_v3  ;;  %v2174_v4 = vld [vmem:[%s2412_s5 + $0x4c] ss:$12 sps:$4 sm:$0xff]   ;;  %s1719_s5 = smul.u32 4294967276, %s2271_s19 }
 0x681   : > { %1309 = vmatpush1.bf16.msra.mxu0 %v2169_v24  ;;  %1955 = vmatpush3.bf16.msra.mxu1 %v2170_v33  ;;  %s1554_s8 = scalar_lea.vmem %s2424_s9, %s1719_s5 [#allocation3]  ;;  %v1723_v33 = vld [vmem:[%s1558_s12 + $0xb0] sm:$0xff] }
 0x682   : > { %1310 = vmatprep.subr.bf16.mxu0 %v2171_v1  ;;  %1956 = vmatprep.subr.bf16.mxu1 %v2286_v3 }
 0x685   : > { %1311 = vmatpush1.bf16.msra.mxu0 %v2172_v36  ;;  %1957 = vmatpush3.bf16.msra.mxu1 %v2173_v37 }
 0x686   : > { %1312 = vmatprep.subr.bf16.mxu0 %v2174_v4  ;;  %1958 = vmatprep.subr.bf16.mxu1 %v2286_v3 }
 0x689   : > { %1313 = vmatpush1.bf16.msra.mxu0 %v2175_v38  ;;  %1959 = vmatpush3.bf16.msra.mxu1 %v2176_v39 }
 0x68a   : > { %1314 = vmatprep.subr.bf16.mxu0 %v2177_v40  ;;  %1960 = vmatprep.subr.bf16.mxu1 %v2286_v3 }
 0x68d   : > { %1315 = vmatpush1.bf16.msra.mxu0 %v2178_v41  ;;  %1961 = vmatpush3.bf16.msra.mxu1 %v2179_v42 }
 0x68e   : > { %1316 = vmatprep.subr.bf16.mxu0 %v2180_v43  ;;  %1962 = vmatprep.subr.bf16.mxu1 %v2286_v3  ;;  %v1724_v43 = vld [vmem:[%s1558_s12 + $0xb8] sm:$0xff] }
 0x691   : > { %1317 = vmatpush1.bf16.msra.mxu0 %v2181_v44  ;;  %1963 = vmatpush3.bf16.msra.mxu1 %v2182_v45 }
 0x692   : > { %1318 = vmatprep.subr.bf16.mxu0 %v2183_v46  ;;  %1964 = vmatprep.subr.bf16.mxu1 %v2286_v3 }
 0x695   : > { %1319 = vmatpush1.bf16.msra.mxu0 %v2184_v47  ;;  %1965 = vmatpush3.bf16.msra.mxu1 %v2185_v48 }
 0x696   : > { %1320 = vmatprep.subr.bf16.mxu0 %v2186_v49  ;;  %1966 = vmatprep.subr.bf16.mxu1 %v2286_v3 }
 0x699   : > { %1321 = vmatpush1.bf16.msra.mxu0 %v2187_v50  ;;  %1967 = vmatpush3.bf16.msra.mxu1 %v2188_v51 }
 0x74f   : > { %v1226_v53 = vpop.f32.mrb[24].mxu0  ;;  %v1267_v54 = vpop.f32.mrb[24].mxu1 }
 0x750   : > { %v1227_v56 = vadd.f32 %v1226_v53, %v2577_v34  ;;  %v1228_v2 = vpop.f32.mrb[25].mxu0  ;;  %v1950_v5 = vpop.f32.mrb[25].mxu1  ;;  %v1268_v19 = vadd.f32 %v1267_v54, %v2584_v55 }
 0x751   : > { %v1229_v6 = vadd.f32 %v1228_v2, %v2580_v35  ;;  %v1230_v7 = vpop.f32.mrb[26].mxu0  ;;  %v1270_v8 = vpop.f32.mrb[26].mxu1 }
 0x752   : > { %v1273_v9 = vadd.f32 %v1714_v52, %v1227_v56  ;;  %v1231_v3 = vpop.f32.mrb[27].mxu0  ;;  %v1951_v11 = vpop.f32.mrb[27].mxu1 }
 0x753   : > { %v1280_v13 = vadd.f32 %v1715_v10, %v1229_v6 }
 0x754   : > { %v1717_v12 = vmul.f32 -1.442695, %v1273_v9 }
 0x755   : > { %v1718_v14 = vmul.f32 -1.442695, %v1280_v13 }
 0x756   : > { %2145 = vpow2.f32 %v1717_v12 }
 0x757   : > { %2147 = vpow2.f32 %v1718_v14 }
 0x760   : > { %v2146_v15 = vpop.eup %2145 }
 0x761   : > { %v1277_v16 = vadd.f32 1.0, %v2146_v15  ;;  %v2148_v17 = vpop.eup %2147 }
 0x762   : > { %v1284_v18 = vadd.f32 1.0, %v2148_v17 }
 0x763   : > { %2149 = vrcp.f32 %v1277_v16 }
 0x764   : > { %2151 = vrcp.f32 %v1284_v18 }
 0x76d   : > { %v2150_v20 = vpop.eup %2149 }
 0x76e   : > { %v1287_v22 = vmul.f32 %v2150_v20, %v1268_v19  ;;  %v2152_v25 = vpop.eup %2151 }
 0x76f   : > { %v1290_v27 = vsub.f32 1.0, %v2152_v25  ;;  %v1292_v58 = vmul.f32 %v2152_v25, %v2827_v26 }
 0x770   : > { %v1288_v23 = vadd.f32 %v1716_v21, %v1287_v22 }
 0x772   : > { %2153 = vtanh.f32 %v1288_v23 }
 0x77c   : > { %v2154_v28 = vpop.eup %2153 }
 0x77d   : > { %v1291_v57 = vmul.f32 %v2154_v28, %v1290_v27 }
 0x77f   : > { %v1293_v59 = vadd.f32 %v1292_v58, %v1291_v57 }
 0x781   : > { %v1294_v60 = vpack.c.bf16 %v1293_v59, %v1293_v59 }
 0x783   : > { %1720 = vst [vmem:[%s1554_s8 + $0x18] sm:$0xf] %v1294_v60  ;;  %1339 = vmatmul.mubr.bf16.vlgmr.msra.gmra.mrb[28].mxu0 %v1294_v60  ;;  %1969 = vmatmul.mubr.bf16.vlgmr.msra.gmra.mrb[28].mxu1 %v1294_v60 }
 0x856   : > { %v1340_v62 = vpop.f32.mrb[28].mxu0  ;;  %v1381_v63 = vpop.f32.mrb[28].mxu1 }
 0x857   : > { %v1341_v0 = vadd.f32 %v1340_v62, %v2577_v34  ;;  %v1342_v29 = vpop.f32.mrb[29].mxu0  ;;  %v1970_v30 = vpop.f32.mrb[29].mxu1 }
 0x858   : > { %v1343_v31 = vadd.f32 %v1342_v29, %v2580_v35  ;;  %v1344_v32 = vpop.f32.mrb[30].mxu0  ;;  %v1384_v24 = vpop.f32.mrb[30].mxu1  ;;  %v1382_v35 = vadd.f32 %v1381_v63, %v2584_v55 }
 0x859   : > { %v1387_v26 = vadd.f32 %v1722_v61, %v1341_v0  ;;  %v1345_v1 = vpop.f32.mrb[31].mxu0  ;;  %v1971_v36 = vpop.f32.mrb[31].mxu1 }
 0x85a   : > { %v1394_v4 = vadd.f32 %v1723_v33, %v1343_v31 }
 0x85b   : > { %v1725_v37 = vmul.f32 -1.442695, %v1387_v26 }
 0x85c   : > { %v1726_v38 = vmul.f32 -1.442695, %v1394_v4 }
 0x85d   : > { %2155 = vpow2.f32 %v1725_v37 }
 0x85e   : > { %2157 = vpow2.f32 %v1726_v38 }
 0x867   : > { %v2156_v39 = vpop.eup %2155 }
 0x868   : > { %v1391_v40 = vadd.f32 1.0, %v2156_v39  ;;  %v2158_v34 = vpop.eup %2157 }
 0x869   : > { %v1398_v41 = vadd.f32 1.0, %v2158_v34 }
 0x86a   : > { %2159 = vrcp.f32 %v1391_v40 }
 0x86b   : > { %2161 = vrcp.f32 %v1398_v41 }
 0x874   : > { %v2160_v42 = vpop.eup %2159 }
 0x875   : > { %v1401_v44 = vmul.f32 %v2160_v42, %v1382_v35  ;;  %v2162_v46 = vpop.eup %2161 }
 0x876   : > { %v1404_v47 = vsub.f32 1.0, %v2162_v46  ;;  %v1406_v50 = vmul.f32 %v2162_v46, %v1293_v59 }
 0x877   : > { %v1402_v45 = vadd.f32 %v1724_v43, %v1401_v44 }
 0x879   : > { %2163 = vtanh.f32 %v1402_v45 }
 0x883   : > { %v2164_v48 = vpop.eup %2163 }
 0x884   : > { %v1405_v49 = vmul.f32 %v2164_v48, %v1404_v47  ;;  %1416 = sbr.rel (%p1729_p1) target bundleno = 2187 (0x88b), region = 40 }
 0x886   : > { %v1407_v51 = vadd.f32 %v1406_v50, %v1405_v49 }
 0x888   : > { %v1408_v52 = vpack.c.bf16 %v1407_v51, %v1407_v51  ;;  %1412 = vst [vmem:[#allocation2] sm:$0xff] %v1407_v51  ;;  %1417 = vst [vmem:[%s2407_s25] sm:$0xff] (!%p1729_p1), %v1407_v51 }
 0x88a   : > { %1728 = vst [vmem:[%s1562_s14 + $0x1c] sm:$0xf] %v1408_v52 }
 0x88b PF: > { %s1733_s27 = sshll.u32 %s2271_s19, 4  ;;  %s1442_s6 = sshll.u32 %s2424_s9, 4  ;;  %s2885_s6 = int_to_ptr.vmem [resolvable:$true] %s1442_s6 }
 0x88c   : > { %s1439_s30 = sadd.s32 %s1733_s27, %s2399_s7  ;;  %s2972_s25 = sand.u32 1, %s2259_s16  }
 0x88d   : > { %s1734_s15 = sshll.u32 %s1439_s30, 6  ;;  %s2894_s21 = scalar_lea.sflag [#allocation4], %s2972_s25 }
 0x88e   : > { %s2890_s18 = scalar_lea.hbm %s2949_s3, %s1734_s15  ;;  %s2189_s22 = scalar_lea.vmem %s2885_s6, 512 }
 0x88f   : > { %p2190_p2 = scmp.ne.s32.totalorder %s2885_s6, %s2189_s22  ;;  %s2289_s19 = smov [#allocation3]  }
 0x890   : > { %s2193_s7 = sshll.u32 %s2289_s19, 4  ;;  %s2194_s7 = int_to_ptr.vmem [resolvable:$false] %s2193_s7 }
 0x891   : > { %p2191_p3 = pnand %p2190_p2, %p2378_p5  ;;  %s2195_s9 = scalar_lea.vmem %s2194_s7, 1024 }
 0x892   : > { %p2196_p6 = scmp.lt.s32.totalorder %s2885_s6, %s2194_s7  ;;  %p2197_p7 = scmp.lt.s32.totalorder %s2195_s9, %s2189_s22 }
 0x893   : > { %p2192_p4 = pneg %p2191_p3 }
 0x894   : > { %p2198_p9 = por %p2197_p7, %p2196_p6 }
 0x896   : > { %p2199_p10 = pnand %p2198_p9, %p2192_p4 }
 0x898   : > { %2202 = shalt.err (!%p2199_p10)
}
 0x899   : > { %s2203_s13 = scalar_lea.hbm %s2890_s18, 512  ;;  %s2207_s28 = scalar_lea.hbm %s2949_s3, 2048 }
 0x89a   : > { %p2204_p11 = scmp.ne.s32.totalorder %s2890_s18, %s2203_s13  ;;  %p2208_p0 = scmp.lt.u32.totalorder %s2890_s18, %s2949_s3 }
 0x89b   : > { %p2209_p1 = scmp.lt.u32.totalorder %s2207_s28, %s2203_s13  ;;  %p2211_p3 = scmp.lt.u32.totalorder %s2203_s13, %s2890_s18 }
 0x89c   : > { %p2205_p12 = pnand %p2204_p11, %p2378_p5 }
 0x89d   : > { %p2210_p2 = por %p2209_p1, %p2208_p0 }
 0x89e   : > { %p2206_p13 = pneg %p2205_p12 }
 0x89f   : > { %p2212_p4 = por %p2211_p3, %p2210_p2 }
 0x8a1   : > { %p2213_p6 = pnand %p2212_p4, %p2206_p13 }
 0x8a3   : > { %2216 = shalt.err (!%p2213_p6)
}
 0x8a4   : > { %s2290_s8 = smov 64   ;;  %s2291_s11 = smov 4  }
 0x8a5   : > { %1976 = dma.vmem_to_hbm [thread:$0]  (%p2378_p5), %s2885_s6, 512, %s2890_s18, %s2894_s21, %s2290_s8, %s2290_s8, %s2291_s11  }
 0x8a6 PF: > { %s2973_s12 = sld [smem:[#allocation10_spill]]  ;;  %s2974_s26 = sld [smem:[#allocation6_spill]] }
 0x8ac   : > { %p1982_p7 = scmp.ge.s32.totalorder %s2973_s12, 2  ;;  %s1460_s27 = sand.u32 1, %s2974_s26  }
 0x8ad   : > { %s1461_s30 = scalar_lea.sflag [#allocation4], %s1460_s27 }
 0x8ae   : > { %p1979_p9 = pnand %p1982_p7, %p2384_p8 }
 0x8b0   : > { %2250 = dma.done.wait (!%p1979_p9), %s1461_s30, 512  }
 0x8b1   : > { %2252 = vsyncadd (!%p1979_p9), %s1461_s30, 4294966784  ;;  %s18_s22 = sadd.s32 1, %s2973_s12   ;;  %s2976_s17 = sld [smem:[#allocation7_spill]] }
 0x8b2   : > { %p15_p10 = scmp.ge.s32.totalorder %s18_s22, 6   ;;  %s2977_s20 = sld [smem:[#allocation14_spill]] }
 0x8b3   : > { %s2978_s18 = sld [smem:[#allocation8_spill]]  ;;  %s2979_s19 = sld [smem:[#allocation9_spill]] }
 0x8b4   : > { %s2980_s10 = sld [smem:[#allocation11_spill]]  ;;  %s2981_s21 = sld [smem:[#allocation12_spill]] }
 0x8b5   : > { %s2982_s15 = smov %s2259_s16  ;;  %17 = sbr.rel (!%p15_p10) target bundleno = 5 (0x5), region = 109 }
 0x8b7   : > { %s2983_s16 = smov %s2976_s17 }
 0x8b8   : > { %s2984_s17 = smov %s2977_s20 }
 0x8ba   : > { %s2985_s20 = smov %s2980_s10 }
 0x8bc   :  { %1473 = vsyncpa [#allocation4], 1 }
 0x8bd   :  { %1475 = vsyncpa [#allocation4 + $0x1], 1 }

</bundles_post_ra>
